<compile_context>
chip_gen: v7x
topology: tpu7x:2x2x1
jax: 0.10.0
libtpu: 0.0.40
codegen_flags: <defaults>
</compile_context>

<pallas_src>
import jax
import jax.numpy as jnp
from jax import lax
from jax.experimental import pallas as pl
from jax.experimental.pallas import tpu as pltpu


def _erf(x):
    # Abramowitz & Stegun 7.1.26 polynomial approximation, |err| < 1.5e-7.
    a1, a2, a3, a4, a5 = (0.254829592, -0.284496736, 1.421413741,
                          -1.453152027, 1.061405429)
    p = 0.3275911
    ax = jnp.abs(x)
    t = 1.0 / (1.0 + p * ax)
    poly = ((((a5 * t + a4) * t + a3) * t + a2) * t + a1) * t
    y = 1.0 - poly * jnp.exp(-ax * ax)
    return jnp.where(x < 0.0, -y, y)


def _gelu_exact(x):
    return 0.5 * x * (1.0 + _erf(x * 0.7071067811865476))


def make_dmlp_kernel(H, W, dim, hidden):
    HW = H * W
    P = W + 1  # left/right zero pad on the flattened HW axis

    def kernel(x_ref, w0_ref, w1a_ref, w1b_ref, b1_ref, w2_ref, b2_ref,
               masks_ref, o_ref):
        xp = x_ref[0]                     # (dim, HW + 2P), channel-major
        w0 = w0_ref[...]                  # (2, dim, 9) per-replica 3x3 taps
        masks = masks_ref[...]            # (2, HW)
        mask_l = masks[0:1, :]            # 0 where col == 0     (for dx = -1)
        mask_r = masks[1:2, :]            # 0 where col == W - 1 (for dx = +1)

        # ---- grouped 3x3 conv (groups=dim, 2 output channels per input) ----
        xc = xp[:, P:P + HW]              # center-tap window == original x
        dw0 = w0[0, :, 4:5] * xc          # replica 0 -> orig hidden chan 2c
        dw1 = w0[1, :, 4:5] * xc          # replica 1 -> orig hidden chan 2c+1
        for dy in (-1, 0, 1):
            for dx in (-1, 0, 1):
                if dy == 0 and dx == 0:
                    continue
                i = (dy + 1) * 3 + (dx + 1)
                s = P + dy * W + dx
                win = xp[:, s:s + HW]     # shifted lane window (dim, HW)
                if dx == -1:
                    win = win * mask_l    # kill row wrap at column 0
                elif dx == 1:
                    win = win * mask_r    # kill row wrap at column W-1
                dw0 = dw0 + w0[0, :, i:i + 1] * win
                dw1 = dw1 + w0[1, :, i:i + 1] * win

        # ---- 1x1 conv hidden->hidden (grouped-conv bias folded into b1) ----
        h = (jnp.dot(w1a_ref[...], dw0, preferred_element_type=jnp.float32) +
             jnp.dot(w1b_ref[...], dw1, preferred_element_type=jnp.float32) +
             b1_ref[...])

        # ---- GELU (exact, erf-based) ----------------------------------------
        h = _gelu_exact(h)

        # ---- 1x1 conv hidden->dim -------------------------------------------
        out = (jnp.dot(w2_ref[...], h, preferred_element_type=jnp.float32) +
               b2_ref[...])
        o_ref[0] = out                    # (dim, HW): 256-lane dense store

    return kernel


def dmlp_forward(x_nchw, params):
    """x_nchw: (B, dim, H, W) float32; params in PyTorch layouts. Returns NCHW."""
    w0, b0, w1, b1, w2, b2 = params
    B, dim, H, W = x_nchw.shape
    hidden = w0.shape[0]
    HW = H * W
    P = W + 1

    x = x_nchw.reshape(B, dim, HW).astype(jnp.float32)
    x_pad = jnp.pad(x, ((0, 0), (0, 0), (P, P)))            # (B, dim, HW+2P)

    # ---- repack weights for the channel-major kernel ------------------------
    # torch grouped weight (hidden,1,3,3): output channel 2c+r uses input c.
    w0_taps = jnp.transpose(w0.reshape(dim, 2, 3, 3),
                            (1, 0, 2, 3)).reshape(2, dim, 9)
    w1_mat = w1[:, :, 0, 0]                                  # (hidden, hidden)
    w1a = w1_mat[:, 0::2]                                    # columns for replica 0
    w1b = w1_mat[:, 1::2]                                    # columns for replica 1
    b1_eff = (b1 + jnp.dot(w1_mat, b0,
                           precision=lax.Precision.HIGHEST)).reshape(hidden, 1)
    w2_mat = w2[:, :, 0, 0]                                  # (dim, hidden)
    b2_col = b2.reshape(dim, 1)

    col = jnp.arange(HW, dtype=jnp.int32) % W
    masks = jnp.stack([col > 0, col < W - 1]).astype(jnp.float32)   # (2, HW)

    kernel = make_dmlp_kernel(H, W, dim, hidden)
    out = pl.pallas_call(
        kernel,
        out_shape=jax.ShapeDtypeStruct((B, dim, HW), jnp.float32),
        grid_spec=pltpu.PrefetchScalarGridSpec(
            num_scalar_prefetch=0,
            grid=(B,),
            in_specs=[
                pl.BlockSpec((1, dim, HW + 2 * P), lambda b: (b, 0, 0)),
                pl.BlockSpec((2, dim, 9), lambda b: (0, 0, 0)),
                pl.BlockSpec((hidden, dim), lambda b: (0, 0)),
                pl.BlockSpec((hidden, dim), lambda b: (0, 0)),
                pl.BlockSpec((hidden, 1), lambda b: (0, 0)),
                pl.BlockSpec((dim, hidden), lambda b: (0, 0)),
                pl.BlockSpec((dim, 1), lambda b: (0, 0)),
                pl.BlockSpec((2, HW), lambda b: (0, 0)),
            ],
            out_specs=pl.BlockSpec((1, dim, HW), lambda b: (b, 0, 0)),
        ),
        compiler_params=pltpu.CompilerParams(
            dimension_semantics=("parallel",)),
    )(x_pad, w0_taps, w1a, w1b, b1_eff, w2_mat, b2_col, masks)

    return out.reshape(B, dim, H, W)


def reference_forward(x, params):
    """Pure-JAX reference mirroring the PyTorch DMlp forward (f32, HIGHEST)."""
    w0, b0, w1, b1, w2, b2 = params
    B, dim, H, W = x.shape
    HIGH = lax.Precision.HIGHEST
    h = lax.conv_general_dilated(
        x.astype(jnp.float32), w0, (1, 1), 'SAME',
        dimension_numbers=('NCHW', 'OIHW', 'NCHW'),
        feature_group_count=dim, precision=HIGH) + b0[None, :, None, None]
    h = jnp.einsum('bchw,oc->bohw', h, w1[:, :, 0, 0],
                   precision=HIGH) + b1[None, :, None, None]
    h = jax.nn.gelu(h, approximate=False)
    h = jnp.einsum('bchw,oc->bohw', h, w2[:, :, 0, 0],
                   precision=HIGH) + b2[None, :, None, None]
    return h


if __name__ == "__main__":
    B, dim, H, W = 2, 32, 16, 16
    growth_rate = 2.0
    hidden = int(dim * growth_rate)

    key = jax.random.PRNGKey(0)
    k0, k1, k2, k3, k4, k5, kx = jax.random.split(key, 7)
    # PyTorch-layout parameters of the DMlp module (Conv2d default bias=True).
    w0 = jax.random.normal(k0, (hidden, 1, 3, 3), jnp.float32) / 3.0
    b0 = 0.1 * jax.random.normal(k1, (hidden,), jnp.float32)
    w1 = jax.random.normal(k2, (hidden, hidden, 1, 1), jnp.float32) / jnp.sqrt(hidden)
    b1 = 0.1 * jax.random.normal(k3, (hidden,), jnp.float32)
    w2 = jax.random.normal(k4, (dim, hidden, 1, 1), jnp.float32) / jnp.sqrt(hidden)
    b2 = 0.1 * jax.random.normal(k5, (dim,), jnp.float32)
    params = (w0, b0, w1, b1, w2, b2)

    x = jax.random.normal(kx, (B, dim, H, W), jnp.float32)

    y = dmlp_forward(x, params)
    y = jax.block_until_ready(y)

    assert y.shape == (B, dim, H, W)
    assert bool(jnp.all(jnp.isfinite(y)))

    y_ref = reference_forward(x, params)
    # Kernel matmuls use default (single-pass bf16) MXU precision per the perf
    # review; reference uses HIGHEST, so allow a modest tolerance.
    assert bool(jnp.allclose(y, y_ref, rtol=2e-2, atol=2e-2)), \
        "Pallas kernel output does not match JAX reference"

    print("KERNEL_OK")
</pallas_src>

<mosaic_0001>
module attributes {stable_mosaic.version = 11 : i64} {
  func.func @kernel(%arg0: i32, %arg1: memref<1x32x290xf32, #tpu.memory_space<vmem>>, %arg2: memref<2x32x9xf32, #tpu.memory_space<vmem>>, %arg3: memref<64x32xf32, #tpu.memory_space<vmem>>, %arg4: memref<64x32xf32, #tpu.memory_space<vmem>>, %arg5: memref<64x1xf32, #tpu.memory_space<vmem>>, %arg6: memref<32x64xf32, #tpu.memory_space<vmem>>, %arg7: memref<32x1xf32, #tpu.memory_space<vmem>>, %arg8: memref<2x256xf32, #tpu.memory_space<vmem>>, %arg9: memref<1x32x256xf32, #tpu.memory_space<vmem>>) attributes {dimension_semantics = [#tpu.dimension_semantics<parallel>], iteration_bounds = array<i64: 2>, scalar_prefetch = 0 : i64, scratch_operands = 0 : i64, tpu.core_type = #tpu.core_type<tc>, window_params = [{transform_indices = @transform_0, window_bounds = array<i64: 1, 32, 290>}, {pipeline_mode = #tpu.pipeline_mode<synchronous>, transform_indices = @transform_1, window_bounds = array<i64: 2, 32, 9>}, {pipeline_mode = #tpu.pipeline_mode<synchronous>, transform_indices = @transform_2, window_bounds = array<i64: 64, 32>}, {pipeline_mode = #tpu.pipeline_mode<synchronous>, transform_indices = @transform_3, window_bounds = array<i64: 64, 32>}, {pipeline_mode = #tpu.pipeline_mode<synchronous>, transform_indices = @transform_4, window_bounds = array<i64: 64, 1>}, {pipeline_mode = #tpu.pipeline_mode<synchronous>, transform_indices = @transform_5, window_bounds = array<i64: 32, 64>}, {pipeline_mode = #tpu.pipeline_mode<synchronous>, transform_indices = @transform_6, window_bounds = array<i64: 32, 1>}, {pipeline_mode = #tpu.pipeline_mode<synchronous>, transform_indices = @transform_7, window_bounds = array<i64: 2, 256>}, {transform_indices = @transform_8, window_bounds = array<i64: 1, 32, 256>}]} {
    %c0 = arith.constant 0 : index
    %c0_0 = arith.constant 0 : index
    %c0_1 = arith.constant 0 : index
    %0 = vector.load %arg1[%c0, %c0_0, %c0_1] : memref<1x32x290xf32, #tpu.memory_space<vmem>>, vector<1x32x290xf32>
    %1 = vector.shape_cast %0 : vector<1x32x290xf32> to vector<32x290xf32>
    %c0_2 = arith.constant 0 : index
    %c0_3 = arith.constant 0 : index
    %c0_4 = arith.constant 0 : index
    %2 = vector.load %arg2[%c0_2, %c0_3, %c0_4] : memref<2x32x9xf32, #tpu.memory_space<vmem>>, vector<2x32x9xf32>
    %c0_5 = arith.constant 0 : index
    %c0_6 = arith.constant 0 : index
    %3 = vector.load %arg8[%c0_5, %c0_6] : memref<2x256xf32, #tpu.memory_space<vmem>>, vector<2x256xf32>
    %4 = vector.extract_strided_slice %3 {offsets = [0, 0], sizes = [1, 256], strides = [1, 1]} : vector<2x256xf32> to vector<1x256xf32>
    %5 = vector.extract_strided_slice %3 {offsets = [1, 0], sizes = [1, 256], strides = [1, 1]} : vector<2x256xf32> to vector<1x256xf32>
    %6 = vector.extract_strided_slice %1 {offsets = [0, 17], sizes = [32, 256], strides = [1, 1]} : vector<32x290xf32> to vector<32x256xf32>
    %7 = vector.extract_strided_slice %2 {offsets = [0, 0, 4], sizes = [1, 32, 1], strides = [1, 1, 1]} : vector<2x32x9xf32> to vector<1x32x1xf32>
    %8 = vector.shape_cast %7 : vector<1x32x1xf32> to vector<32x1xf32>
    %9 = vector.broadcast %8 : vector<32x1xf32> to vector<32x256xf32>
    %10 = arith.mulf %9, %6 : vector<32x256xf32>
    %11 = vector.extract_strided_slice %2 {offsets = [1, 0, 4], sizes = [1, 32, 1], strides = [1, 1, 1]} : vector<2x32x9xf32> to vector<1x32x1xf32>
    %12 = vector.shape_cast %11 : vector<1x32x1xf32> to vector<32x1xf32>
    %13 = vector.broadcast %12 : vector<32x1xf32> to vector<32x256xf32>
    %14 = arith.mulf %13, %6 : vector<32x256xf32>
    %15 = vector.extract_strided_slice %1 {offsets = [0, 0], sizes = [32, 256], strides = [1, 1]} : vector<32x290xf32> to vector<32x256xf32>
    %16 = vector.broadcast %4 : vector<1x256xf32> to vector<32x256xf32>
    %17 = arith.mulf %15, %16 : vector<32x256xf32>
    %18 = vector.extract_strided_slice %2 {offsets = [0, 0, 0], sizes = [1, 32, 1], strides = [1, 1, 1]} : vector<2x32x9xf32> to vector<1x32x1xf32>
    %19 = vector.shape_cast %18 : vector<1x32x1xf32> to vector<32x1xf32>
    %20 = vector.broadcast %19 : vector<32x1xf32> to vector<32x256xf32>
    %21 = arith.mulf %20, %17 : vector<32x256xf32>
    %22 = arith.addf %10, %21 : vector<32x256xf32>
    %23 = vector.extract_strided_slice %2 {offsets = [1, 0, 0], sizes = [1, 32, 1], strides = [1, 1, 1]} : vector<2x32x9xf32> to vector<1x32x1xf32>
    %24 = vector.shape_cast %23 : vector<1x32x1xf32> to vector<32x1xf32>
    %25 = vector.broadcast %24 : vector<32x1xf32> to vector<32x256xf32>
    %26 = arith.mulf %25, %17 : vector<32x256xf32>
    %27 = arith.addf %14, %26 : vector<32x256xf32>
    %28 = vector.extract_strided_slice %1 {offsets = [0, 1], sizes = [32, 256], strides = [1, 1]} : vector<32x290xf32> to vector<32x256xf32>
    %29 = vector.extract_strided_slice %2 {offsets = [0, 0, 1], sizes = [1, 32, 1], strides = [1, 1, 1]} : vector<2x32x9xf32> to vector<1x32x1xf32>
    %30 = vector.shape_cast %29 : vector<1x32x1xf32> to vector<32x1xf32>
    %31 = vector.broadcast %30 : vector<32x1xf32> to vector<32x256xf32>
    %32 = arith.mulf %31, %28 : vector<32x256xf32>
    %33 = arith.addf %22, %32 : vector<32x256xf32>
    %34 = vector.extract_strided_slice %2 {offsets = [1, 0, 1], sizes = [1, 32, 1], strides = [1, 1, 1]} : vector<2x32x9xf32> to vector<1x32x1xf32>
    %35 = vector.shape_cast %34 : vector<1x32x1xf32> to vector<32x1xf32>
    %36 = vector.broadcast %35 : vector<32x1xf32> to vector<32x256xf32>
    %37 = arith.mulf %36, %28 : vector<32x256xf32>
    %38 = arith.addf %27, %37 : vector<32x256xf32>
    %39 = vector.extract_strided_slice %1 {offsets = [0, 2], sizes = [32, 256], strides = [1, 1]} : vector<32x290xf32> to vector<32x256xf32>
    %40 = vector.broadcast %5 : vector<1x256xf32> to vector<32x256xf32>
    %41 = arith.mulf %39, %40 : vector<32x256xf32>
    %42 = vector.extract_strided_slice %2 {offsets = [0, 0, 2], sizes = [1, 32, 1], strides = [1, 1, 1]} : vector<2x32x9xf32> to vector<1x32x1xf32>
    %43 = vector.shape_cast %42 : vector<1x32x1xf32> to vector<32x1xf32>
    %44 = vector.broadcast %43 : vector<32x1xf32> to vector<32x256xf32>
    %45 = arith.mulf %44, %41 : vector<32x256xf32>
    %46 = arith.addf %33, %45 : vector<32x256xf32>
    %47 = vector.extract_strided_slice %2 {offsets = [1, 0, 2], sizes = [1, 32, 1], strides = [1, 1, 1]} : vector<2x32x9xf32> to vector<1x32x1xf32>
    %48 = vector.shape_cast %47 : vector<1x32x1xf32> to vector<32x1xf32>
    %49 = vector.broadcast %48 : vector<32x1xf32> to vector<32x256xf32>
    %50 = arith.mulf %49, %41 : vector<32x256xf32>
    %51 = arith.addf %38, %50 : vector<32x256xf32>
    %52 = vector.extract_strided_slice %1 {offsets = [0, 16], sizes = [32, 256], strides = [1, 1]} : vector<32x290xf32> to vector<32x256xf32>
    %53 = vector.broadcast %4 : vector<1x256xf32> to vector<32x256xf32>
    %54 = arith.mulf %52, %53 : vector<32x256xf32>
    %55 = vector.extract_strided_slice %2 {offsets = [0, 0, 3], sizes = [1, 32, 1], strides = [1, 1, 1]} : vector<2x32x9xf32> to vector<1x32x1xf32>
    %56 = vector.shape_cast %55 : vector<1x32x1xf32> to vector<32x1xf32>
    %57 = vector.broadcast %56 : vector<32x1xf32> to vector<32x256xf32>
    %58 = arith.mulf %57, %54 : vector<32x256xf32>
    %59 = arith.addf %46, %58 : vector<32x256xf32>
    %60 = vector.extract_strided_slice %2 {offsets = [1, 0, 3], sizes = [1, 32, 1], strides = [1, 1, 1]} : vector<2x32x9xf32> to vector<1x32x1xf32>
    %61 = vector.shape_cast %60 : vector<1x32x1xf32> to vector<32x1xf32>
    %62 = vector.broadcast %61 : vector<32x1xf32> to vector<32x256xf32>
    %63 = arith.mulf %62, %54 : vector<32x256xf32>
    %64 = arith.addf %51, %63 : vector<32x256xf32>
    %65 = vector.extract_strided_slice %1 {offsets = [0, 18], sizes = [32, 256], strides = [1, 1]} : vector<32x290xf32> to vector<32x256xf32>
    %66 = vector.broadcast %5 : vector<1x256xf32> to vector<32x256xf32>
    %67 = arith.mulf %65, %66 : vector<32x256xf32>
    %68 = vector.extract_strided_slice %2 {offsets = [0, 0, 5], sizes = [1, 32, 1], strides = [1, 1, 1]} : vector<2x32x9xf32> to vector<1x32x1xf32>
    %69 = vector.shape_cast %68 : vector<1x32x1xf32> to vector<32x1xf32>
    %70 = vector.broadcast %69 : vector<32x1xf32> to vector<32x256xf32>
    %71 = arith.mulf %70, %67 : vector<32x256xf32>
    %72 = arith.addf %59, %71 : vector<32x256xf32>
    %73 = vector.extract_strided_slice %2 {offsets = [1, 0, 5], sizes = [1, 32, 1], strides = [1, 1, 1]} : vector<2x32x9xf32> to vector<1x32x1xf32>
    %74 = vector.shape_cast %73 : vector<1x32x1xf32> to vector<32x1xf32>
    %75 = vector.broadcast %74 : vector<32x1xf32> to vector<32x256xf32>
    %76 = arith.mulf %75, %67 : vector<32x256xf32>
    %77 = arith.addf %64, %76 : vector<32x256xf32>
    %78 = vector.extract_strided_slice %1 {offsets = [0, 32], sizes = [32, 256], strides = [1, 1]} : vector<32x290xf32> to vector<32x256xf32>
    %79 = vector.broadcast %4 : vector<1x256xf32> to vector<32x256xf32>
    %80 = arith.mulf %78, %79 : vector<32x256xf32>
    %81 = vector.extract_strided_slice %2 {offsets = [0, 0, 6], sizes = [1, 32, 1], strides = [1, 1, 1]} : vector<2x32x9xf32> to vector<1x32x1xf32>
    %82 = vector.shape_cast %81 : vector<1x32x1xf32> to vector<32x1xf32>
    %83 = vector.broadcast %82 : vector<32x1xf32> to vector<32x256xf32>
    %84 = arith.mulf %83, %80 : vector<32x256xf32>
    %85 = arith.addf %72, %84 : vector<32x256xf32>
    %86 = vector.extract_strided_slice %2 {offsets = [1, 0, 6], sizes = [1, 32, 1], strides = [1, 1, 1]} : vector<2x32x9xf32> to vector<1x32x1xf32>
    %87 = vector.shape_cast %86 : vector<1x32x1xf32> to vector<32x1xf32>
    %88 = vector.broadcast %87 : vector<32x1xf32> to vector<32x256xf32>
    %89 = arith.mulf %88, %80 : vector<32x256xf32>
    %90 = arith.addf %77, %89 : vector<32x256xf32>
    %91 = vector.extract_strided_slice %1 {offsets = [0, 33], sizes = [32, 256], strides = [1, 1]} : vector<32x290xf32> to vector<32x256xf32>
    %92 = vector.extract_strided_slice %2 {offsets = [0, 0, 7], sizes = [1, 32, 1], strides = [1, 1, 1]} : vector<2x32x9xf32> to vector<1x32x1xf32>
    %93 = vector.shape_cast %92 : vector<1x32x1xf32> to vector<32x1xf32>
    %94 = vector.broadcast %93 : vector<32x1xf32> to vector<32x256xf32>
    %95 = arith.mulf %94, %91 : vector<32x256xf32>
    %96 = arith.addf %85, %95 : vector<32x256xf32>
    %97 = vector.extract_strided_slice %2 {offsets = [1, 0, 7], sizes = [1, 32, 1], strides = [1, 1, 1]} : vector<2x32x9xf32> to vector<1x32x1xf32>
    %98 = vector.shape_cast %97 : vector<1x32x1xf32> to vector<32x1xf32>
    %99 = vector.broadcast %98 : vector<32x1xf32> to vector<32x256xf32>
    %100 = arith.mulf %99, %91 : vector<32x256xf32>
    %101 = arith.addf %90, %100 : vector<32x256xf32>
    %102 = vector.extract_strided_slice %1 {offsets = [0, 34], sizes = [32, 256], strides = [1, 1]} : vector<32x290xf32> to vector<32x256xf32>
    %103 = vector.broadcast %5 : vector<1x256xf32> to vector<32x256xf32>
    %104 = arith.mulf %102, %103 : vector<32x256xf32>
    %105 = vector.extract_strided_slice %2 {offsets = [0, 0, 8], sizes = [1, 32, 1], strides = [1, 1, 1]} : vector<2x32x9xf32> to vector<1x32x1xf32>
    %106 = vector.shape_cast %105 : vector<1x32x1xf32> to vector<32x1xf32>
    %107 = vector.broadcast %106 : vector<32x1xf32> to vector<32x256xf32>
    %108 = arith.mulf %107, %104 : vector<32x256xf32>
    %109 = arith.addf %96, %108 : vector<32x256xf32>
    %110 = vector.extract_strided_slice %2 {offsets = [1, 0, 8], sizes = [1, 32, 1], strides = [1, 1, 1]} : vector<2x32x9xf32> to vector<1x32x1xf32>
    %111 = vector.shape_cast %110 : vector<1x32x1xf32> to vector<32x1xf32>
    %112 = vector.broadcast %111 : vector<32x1xf32> to vector<32x256xf32>
    %113 = arith.mulf %112, %104 : vector<32x256xf32>
    %114 = arith.addf %101, %113 : vector<32x256xf32>
    %c0_7 = arith.constant 0 : index
    %c0_8 = arith.constant 0 : index
    %115 = vector.load %arg3[%c0_7, %c0_8] : memref<64x32xf32, #tpu.memory_space<vmem>>, vector<64x32xf32>
    %cst = arith.constant dense<0.000000e+00> : vector<64x256xf32>
    %116 = tpu.matmul %115, %109, %cst {dimension_numbers = #tpu.dot_dimension_numbers<[1], [0], [0], [1], [0, 0, 1, 1], [], []>} : vector<64x32xf32>, vector<32x256xf32>, vector<64x256xf32> -> vector<64x256xf32>
    %c0_9 = arith.constant 0 : index
    %c0_10 = arith.constant 0 : index
    %117 = vector.load %arg4[%c0_9, %c0_10] : memref<64x32xf32, #tpu.memory_space<vmem>>, vector<64x32xf32>
    %cst_11 = arith.constant dense<0.000000e+00> : vector<64x256xf32>
    %118 = tpu.matmul %117, %114, %cst_11 {dimension_numbers = #tpu.dot_dimension_numbers<[1], [0], [0], [1], [0, 0, 1, 1], [], []>} : vector<64x32xf32>, vector<32x256xf32>, vector<64x256xf32> -> vector<64x256xf32>
    %119 = arith.addf %116, %118 : vector<64x256xf32>
    %c0_12 = arith.constant 0 : index
    %c0_13 = arith.constant 0 : index
    %120 = vector.load %arg5[%c0_12, %c0_13] : memref<64x1xf32, #tpu.memory_space<vmem>>, vector<64x1xf32>
    %121 = vector.broadcast %120 : vector<64x1xf32> to vector<64x256xf32>
    %122 = arith.addf %119, %121 : vector<64x256xf32>
    %cst_14 = arith.constant 5.000000e-01 : f32
    %123 = vector.broadcast %cst_14 : f32 to vector<64x256xf32>
    %124 = arith.mulf %123, %122 : vector<64x256xf32>
    %cst_15 = arith.constant 0.707106769 : f32
    %125 = vector.broadcast %cst_15 : f32 to vector<64x256xf32>
    %126 = arith.mulf %122, %125 : vector<64x256xf32>
    %127 = math.absf %126 : vector<64x256xf32>
    %cst_16 = arith.constant 0.327591091 : f32
    %128 = vector.broadcast %cst_16 : f32 to vector<64x256xf32>
    %129 = arith.mulf %128, %127 : vector<64x256xf32>
    %cst_17 = arith.constant 1.000000e+00 : f32
    %130 = vector.broadcast %cst_17 : f32 to vector<64x256xf32>
    %131 = arith.addf %130, %129 : vector<64x256xf32>
    %cst_18 = arith.constant 1.000000e+00 : f32
    %132 = vector.broadcast %cst_18 : f32 to vector<64x256xf32>
    %133 = arith.divf %132, %131 : vector<64x256xf32>
    %cst_19 = arith.constant 1.06140542 : f32
    %134 = vector.broadcast %cst_19 : f32 to vector<64x256xf32>
    %135 = arith.mulf %134, %133 : vector<64x256xf32>
    %cst_20 = arith.constant -1.45315206 : f32
    %136 = vector.broadcast %cst_20 : f32 to vector<64x256xf32>
    %137 = arith.addf %135, %136 : vector<64x256xf32>
    %138 = arith.mulf %137, %133 : vector<64x256xf32>
    %cst_21 = arith.constant 1.42141378 : f32
    %139 = vector.broadcast %cst_21 : f32 to vector<64x256xf32>
    %140 = arith.addf %138, %139 : vector<64x256xf32>
    %141 = arith.mulf %140, %133 : vector<64x256xf32>
    %cst_22 = arith.constant -0.284496725 : f32
    %142 = vector.broadcast %cst_22 : f32 to vector<64x256xf32>
    %143 = arith.addf %141, %142 : vector<64x256xf32>
    %144 = arith.mulf %143, %133 : vector<64x256xf32>
    %cst_23 = arith.constant 0.254829586 : f32
    %145 = vector.broadcast %cst_23 : f32 to vector<64x256xf32>
    %146 = arith.addf %144, %145 : vector<64x256xf32>
    %147 = arith.mulf %146, %133 : vector<64x256xf32>
    %cst_24 = arith.constant 0.000000e+00 : f32
    %148 = vector.broadcast %cst_24 : f32 to vector<64x256xf32>
    %149 = arith.subf %148, %127 : vector<64x256xf32>
    %150 = arith.mulf %149, %127 : vector<64x256xf32>
    %151 = math.exp %150 : vector<64x256xf32>
    %152 = arith.mulf %147, %151 : vector<64x256xf32>
    %cst_25 = arith.constant 1.000000e+00 : f32
    %153 = vector.broadcast %cst_25 : f32 to vector<64x256xf32>
    %154 = arith.subf %153, %152 : vector<64x256xf32>
    %cst_26 = arith.constant 0.000000e+00 : f32
    %155 = vector.broadcast %cst_26 : f32 to vector<64x256xf32>
    %156 = arith.cmpf olt, %126, %155 : vector<64x256xf32>
    %cst_27 = arith.constant 0.000000e+00 : f32
    %157 = vector.broadcast %cst_27 : f32 to vector<64x256xf32>
    %158 = arith.subf %157, %154 : vector<64x256xf32>
    %159 = arith.select %156, %158, %154 : vector<64x256xi1>, vector<64x256xf32>
    %cst_28 = arith.constant 1.000000e+00 : f32
    %160 = vector.broadcast %cst_28 : f32 to vector<64x256xf32>
    %161 = arith.addf %160, %159 : vector<64x256xf32>
    %162 = arith.mulf %124, %161 : vector<64x256xf32>
    %c0_29 = arith.constant 0 : index
    %c0_30 = arith.constant 0 : index
    %163 = vector.load %arg6[%c0_29, %c0_30] : memref<32x64xf32, #tpu.memory_space<vmem>>, vector<32x64xf32>
    %cst_31 = arith.constant dense<0.000000e+00> : vector<32x256xf32>
    %164 = tpu.matmul %163, %162, %cst_31 {dimension_numbers = #tpu.dot_dimension_numbers<[1], [0], [0], [1], [0, 0, 1, 1], [], []>} : vector<32x64xf32>, vector<64x256xf32>, vector<32x256xf32> -> vector<32x256xf32>
    %c0_32 = arith.constant 0 : index
    %c0_33 = arith.constant 0 : index
    %165 = vector.load %arg7[%c0_32, %c0_33] : memref<32x1xf32, #tpu.memory_space<vmem>>, vector<32x1xf32>
    %166 = vector.broadcast %165 : vector<32x1xf32> to vector<32x256xf32>
    %167 = arith.addf %164, %166 : vector<32x256xf32>
    %c0_34 = arith.constant 0 : index
    %c0_35 = arith.constant 0 : index
    %c0_36 = arith.constant 0 : index
    %168 = vector.load %arg9[%c0_34, %c0_35, %c0_36] : memref<1x32x256xf32, #tpu.memory_space<vmem>>, vector<1x32x256xf32>
    %169 = vector.shape_cast %168 : vector<1x32x256xf32> to vector<32x256xf32>
    %170 = vector.shape_cast %167 : vector<32x256xf32> to vector<1x32x256xf32>
    tpu.vector_store %arg9[%c0_34, %c0_35, %c0_36], %170 {strides = array<i32>} : memref<1x32x256xf32, #tpu.memory_space<vmem>>, vector<1x32x256xf32>,
    return
  }
  func.func @transform_0(%arg0: i32) -> (i32, i32, i32) {
    %c0_i32 = arith.constant 0 : i32
    %c0_i32_0 = arith.constant 0 : i32
    %c0_i32_1 = arith.constant 0 : i32
    return %arg0, %c0_i32, %c0_i32_0 : i32, i32, i32
  }
  func.func @transform_1(%arg0: i32) -> (i32, i32, i32) {
    %c0_i32 = arith.constant 0 : i32
    %c0_i32_0 = arith.constant 0 : i32
    %c0_i32_1 = arith.constant 0 : i32
    %c0_i32_2 = arith.constant 0 : i32
    return %c0_i32, %c0_i32_0, %c0_i32_1 : i32, i32, i32
  }
  func.func @transform_2(%arg0: i32) -> (i32, i32) {
    %c0_i32 = arith.constant 0 : i32
    %c0_i32_0 = arith.constant 0 : i32
    %c0_i32_1 = arith.constant 0 : i32
    return %c0_i32, %c0_i32_0 : i32, i32
  }
  func.func @transform_3(%arg0: i32) -> (i32, i32) {
    %c0_i32 = arith.constant 0 : i32
    %c0_i32_0 = arith.constant 0 : i32
    %c0_i32_1 = arith.constant 0 : i32
    return %c0_i32, %c0_i32_0 : i32, i32
  }
  func.func @transform_4(%arg0: i32) -> (i32, i32) {
    %c0_i32 = arith.constant 0 : i32
    %c0_i32_0 = arith.constant 0 : i32
    %c0_i32_1 = arith.constant 0 : i32
    return %c0_i32, %c0_i32_0 : i32, i32
  }
  func.func @transform_5(%arg0: i32) -> (i32, i32) {
    %c0_i32 = arith.constant 0 : i32
    %c0_i32_0 = arith.constant 0 : i32
    %c0_i32_1 = arith.constant 0 : i32
    return %c0_i32, %c0_i32_0 : i32, i32
  }
  func.func @transform_6(%arg0: i32) -> (i32, i32) {
    %c0_i32 = arith.constant 0 : i32
    %c0_i32_0 = arith.constant 0 : i32
    %c0_i32_1 = arith.constant 0 : i32
    return %c0_i32, %c0_i32_0 : i32, i32
  }
  func.func @transform_7(%arg0: i32) -> (i32, i32) {
    %c0_i32 = arith.constant 0 : i32
    %c0_i32_0 = arith.constant 0 : i32
    %c0_i32_1 = arith.constant 0 : i32
    return %c0_i32, %c0_i32_0 : i32, i32
  }
  func.func @transform_8(%arg0: i32) -> (i32, i32, i32) {
    %c0_i32 = arith.constant 0 : i32
    %c0_i32_0 = arith.constant 0 : i32
    %c0_i32_1 = arith.constant 0 : i32
    return %arg0, %c0_i32, %c0_i32_0 : i32, i32, i32
  }
}

</mosaic_0001>

<bundles_post_ra>
// kernel: tpu_custom_call.1
= control target key start
LH: loop header
LB: loop body
LE: loop exit
PB: predicated region body
PF: predicated region fallthrough
CT: control target
= control target key end

     0   :  { %13 = vsyncpa [#allocation3], 0  ;;  %s6279_s0 = inlined_call_operand.vmem [shape: f32[2,32,290], index: 0, kind: input, shape index: {}]   ;;  %s6280_s1 = inlined_call_operand.vmem [shape: f32[2,32,9], index: 1, kind: input, shape index: {}]   ;;  %s6281_s2 = inlined_call_operand.vmem [shape: f32[64,32], index: 2, kind: input, shape index: {}]   ;;  %s6282_s3 = inlined_call_operand.vmem [shape: f32[64,32], index: 3, kind: input, shape index: {}]   ;;  %s6283_s4 = inlined_call_operand.vmem [shape: f32[64,1], index: 4, kind: input, shape index: {}]   ;;  %s6284_s5 = inlined_call_operand.vmem [shape: f32[32,64], index: 5, kind: input, shape index: {}]   ;;  %s6285_s6 = inlined_call_operand.vmem [shape: f32[32,1], index: 6, kind: input, shape index: {}]   ;;  %s6286_s7 = inlined_call_operand.vmem [shape: f32[2,256], index: 7, kind: input, shape index: {}]   ;;  %s6287_s8 = inlined_call_operand.hbm [shape: f32[2,32,256], index: 8, kind: output, shape index: {}]  }
   0x1   :  { %15 = vsyncpa [#allocation3 + $0x1], 0  ;;  %s3609_s27 = smov 0   ;;  %s3611_s28 = smov 0  }
   0x2   :  { %s3613_s29 = smov 0   ;;  %s3615_s30 = smov 0  }
   0x3 LB: > { %s3630_s9 = sadd.s32 4294967295, %s3538_s30   ;;  %s3150_s10 = sadd.s32 4294967294, %s3538_s30   ;;  %s3538_s30 = sphi %s3615_s30, %s6721_s30   ;;  %s3534_s29 = sphi %s3613_s29, %s6720_s29   ;;  %s3530_s28 = sphi %s3611_s28, %s6719_s28   ;;  %s3526_s27 = sphi %s3609_s27, %s6718_s27  }
   0x4   : > { %s3634_s11 = sadd.s32 1, %s3538_s30   ;;  %s201_s12 = sadd.s32 1, %s3534_s29 }
   0x5   : > { %s198_s13 = ssub.s32 %s3538_s30, %s3634_s11  ;;  %p211_p0 = scmp.ne.s32.totalorder %s3534_s29, %s3530_s28 }
   0x6   : > { %p199_p1 = scmp.eq.s32.totalorder %s198_s13, 0  ;;  %p212_p2 = scmp.eq.s32.totalorder %s3630_s9, 1 }
   0x7   : > { %p217_p3 = scmp.ne.s32.totalorder %s3530_s28, %s3526_s27  ;;  %p218_p4 = scmp.eq.s32.totalorder %s3150_s10, 1 }
   0x8   : > { %s3645_s14 = scalar_select %p199_p1, %s3534_s29, %s201_s12  }
   0x9   : > { %p3647_p5 = por %p212_p2, %p211_p0  ;;  %p3651_p6 = por %p218_p4, %p217_p3 }
   0xa   : > { %p3153_p7 = scmp.ge.s32.totalorder %s3538_s30, 1  ;;  %p265_p8 = scmp.lt.s32.totalorder %s3538_s30, 3 }
   0xc   : > { %p266_p9 = pnand %p3153_p7, %p265_p8 }
   0xe   : > { %269 = sbr.rel (%p266_p9) target bundleno = 1466 (0x5ba), region = 52 }
  0x15   : > { %v3660_v0 = vld [vmem:[%s6280_s1 + $0x38] sm:$0xff]  ;;  %v3665_v1 = vld [vmem:[%s6280_s1 + $0x10] sm:$0xff]  ;;  %v390_v2 = vlaneseq  ;;  %v3540_v3 = vmov 1   ;;  %v3541_v4 = vmov 4   ;;  %v3679_v7 = vld [vmem:[%s6286_s7] sm:$0xf] }
  0x16   : > { %3303 = vset.pattern.permute.xlu0 %v3540_v3  ;;  %3297 = vset.pattern.permute.xlu1 %v3541_v4  ;;  %v3674_v6 = vld [vmem:[%s6280_s1 + $0x18] sm:$0xff]  ;;  %v3686_v12 = vld [vmem:[%s6280_s1 + $0x28] sm:$0xff]  ;;  %s3542_s10 = smov 2   ;;  %v3699_v16 = vld [vmem:[%s6280_s1] sm:$0xff]  ;;  %v3543_v19 = vmov 0   ;;  %s3544_s19 = smov 16  }
  0x17   : > { %679 = vperm.xlu0 %3303, %v3660_v0   ;;  %337 = vperm.xlu1 %3297, %v3665_v1   ;;  %v391_v5 = vshrl.u32 %v390_v2, 7  ;;  %v3704_v17 = vld [vmem:[%s6280_s1 + $0x20] sm:$0xff]  ;;  %v3545_v20 = vmov 7   ;;  %v3546_v21 = vmov 2   ;;  %v3727_v22 = vld [vmem:[%s6280_s1 + $0x8] sm:$0xff]  ;;  %v3735_v23 = vld [vmem:[%s6280_s1 + $0x30] sm:$0xff] }
  0x18   : > { %s3547_s24 = smov 32   ;;  %v3548_v24 = vmov 3   ;;  %v3549_v27 = vmov 5   ;;  %v3550_v29 = vmov 6   ;;  %v3551_v31 = vmov 8   ;;  %s3552_s25 = smov 18  }
  0x19   : > { %v764_v8 = vsub.s32 1, %v391_v5  ;;  %v768_v9 = vsub.s32 3, %v391_v5  ;;  %v396_v10 = vsub.s32 2, %v391_v5  ;;  %v3690_v14 = vsub.s32 0, %v391_v5  ;;  %s3553_s26 = smov 34   ;;  %p299_p10 = scmp.lt.s32.totalorder %s3630_s9, 1 }
  0x1a   : > { %s3554_s20 = smov 17   ;;  %vm786_vm0 = vcmask 15360   ;;  %s3555_s21 = smov 15   ;;  %vm633_vm1 = vcmask 130048   ;;  %vm1215_vm2 = vcmask 146432   ;;  %vm1429_vm3 = vcmask 261120  }
  0x1b   : > { %342 = vperm.xlu1 %3297, %v3674_v6   ;;  %v769_v11 = vrot.slane %v3679_v7, %v768_v9  ;;  %v397_v15 = vrot.slane %v3679_v7, %v396_v10  ;;  %v765_v25 = vrot.slane %v3679_v7, %v764_v8  ;;  %v393_v28 = vrot.slane %v3679_v7, %v3690_v14  ;;  %s3556_s22 = smov 1   ;;  %s3557_s23 = smov 127  }
  0x1c   : > { %vm1836_vm4 = vcmask 277504   ;;  %vm464_vm5 = vcmask 138240   ;;  %vm867_vm6 = vcmask 121856   ;;  %vm1082_vm7 = vcmask 7168  }
  0x1d   : > { %v3688_v13 = vrot.slane %v769_v11, %v764_v8  ;;  %v3707_v18 = vrot.slane %v397_v15, %v3690_v14  ;;  %v3751_v26 = vrot.slane %v765_v25, %v764_v8  ;;  %v3771_v30 = vrot.slane %v393_v28, %v3690_v14 }
  0x1e   : > { %vm1296_vm8 = vcmask 1039360   ;;  %vm1510_vm9 = vcmask 924672   ;;  %vm1703_vm10 = vcmask 916480   ;;  %vm1917_vm11 = vcmask 908288  }
  0x1f   : > { %784 = vrot.lane.b32.xlu0 %v3688_v13, %s3542_s10  ;;  %364 = vperm.xlu1 %3297, %v3686_v12  }
  0x23   : > { %3298 = vset.pattern.permute.xlu1 %v3543_v19  ;;  %570 = vperm.xlu0 %3303, %v3699_v16  }
  0x24   : > { %494 = vperm.xlu1 %3298, %v3704_v17  }
  0x27   : > { %1000 = vrot.lane.b32.xlu0 %v3707_v18, %s3544_s19 }
  0x28   : > { %3299 = vset.pattern.permute.xlu1 %v3540_v3  ;;  %3315 = vset.pattern.permute.xlu0 %v3545_v20 }
  0x29   : > { %667 = vperm.xlu1 %3299, %v3704_v17  }
  0x2b   : > { %1741 = vperm.xlu0 %3315, %v3686_v12  }
  0x2d   : > { %671 = vperm.xlu1 %3299, %v3686_v12  }
  0x2f   : > { %3316 = vset.pattern.permute.xlu0 %v3546_v21 }
  0x30   : > { %901 = vperm.xlu0 %3316, %v3704_v17  }
  0x31   : > { %3300 = vset.pattern.permute.xlu1 %v3543_v19 }
  0x32   : > { %506 = vperm.xlu1 %3300, %v3660_v0  }
  0x34   : > { %913 = vperm.xlu0 %3316, %v3660_v0  }
  0x36   : > { %3301 = vset.pattern.permute.xlu1 %v3546_v21 }
  0x37   : > { %905 = vperm.xlu1 %3301, %v3686_v12  }
  0x38   : > { %808 = vperm.xlu0 %3316, %v3727_v22  }
  0x3b   : > { %3302 = vset.pattern.permute.xlu1 %v3540_v3 }
  0x3c   : > { %675 = vperm.xlu1 %3302, %v3735_v23   ;;  %1427 = vrot.lane.b32.xlu0 %v3707_v18, %s3547_s24 }
  0x40   : > { %3304 = vset.pattern.permute.xlu1 %v3548_v24  ;;  %812 = vperm.xlu0 %3316, %v3665_v1  }
  0x41   : > { %1116 = vperm.xlu1 %3304, %v3704_v17  }
  0x44   : > { %3321 = vset.pattern.permute.xlu0 %v3548_v24 }
  0x45   : > { %1120 = vperm.xlu1 %3304, %v3686_v12   ;;  %1128 = vperm.xlu0 %3321, %v3660_v0  }
  0x49   : > { %3305 = vset.pattern.permute.xlu1 %v3543_v19  ;;  %1019 = vperm.xlu0 %3321, %v3699_v16  }
  0x4a   : > { %421 = vperm.xlu1 %3305, %v3727_v22  }
  0x4d   : > { %1027 = vperm.xlu0 %3321, %v3665_v1  }
  0x4e   : > { %782 = vrot.lane.b32.xlu1 %v3751_v26, %s3542_s10  ;;  %s300_s10 = scalar_select %p299_p10, %s3630_s9, 1 }
  0x4f   : > { %3306 = vset.pattern.permute.xlu1 %v3546_v21 }
  0x50   : > { %s3234_s12 = smul.u32 96, %s300_s10 }
  0x51   : > { %3325 = vset.pattern.permute.xlu0 %v3549_v27 }
  0x52   : > { %909 = vperm.xlu1 %3306, %v3735_v23   ;;  %1338 = vperm.xlu0 %3325, %v3735_v23   ;;  %s3937_s18 = scalar_lea.vmem %s6279_s0, %s3234_s12  ;;  %s3562_s12 = smov [#allocation2]  }
  0x53   : > { %s3480_s13 = sshll.u32 %s3562_s12, 4  ;;  %s3481_s13 = int_to_ptr.vmem [resolvable:$false] %s3480_s13 }
  0x54   : > { %s3482_s17 = scalar_lea.vmem %s3481_s13, 2048 }
  0x56   : > { %3307 = vset.pattern.permute.xlu1 %v3549_v27  ;;  %1237 = vperm.xlu0 %3325, %v3727_v22  }
  0x57   : > { %1330 = vperm.xlu1 %3307, %v3704_v17  }
  0x5a   : > { %1245 = vperm.xlu0 %3325, %v3674_v6  }
  0x5b   : > { %1334 = vperm.xlu1 %3307, %v3686_v12  }
  0x5e   : > { %3330 = vset.pattern.permute.xlu0 %v3550_v29 }
  0x5f   : > { %3308 = vset.pattern.permute.xlu1 %v3540_v3  ;;  %1556 = vperm.xlu0 %3330, %v3660_v0  }
  0x60   : > { %574 = vperm.xlu1 %3308, %v3727_v22  }
  0x63   : > { %1451 = vperm.xlu0 %3330, %v3727_v22  }
  0x64   : > { %998 = vrot.lane.b32.xlu1 %v3771_v30, %s3544_s19 }
  0x65   : > { %3309 = vset.pattern.permute.xlu1 %v3548_v24 }
  0x67   : > { %1455 = vperm.xlu0 %3330, %v3665_v1  }
  0x68   : > { %1124 = vperm.xlu1 %3309, %v3735_v23  }
  0x6b   : > { %3332 = vset.pattern.permute.xlu0 %v3551_v31 }
  0x6c   : > { %3310 = vset.pattern.permute.xlu1 %v3550_v29  ;;  %1959 = vperm.xlu0 %3332, %v3735_v23  }
  0x6d   : > { %1544 = vperm.xlu1 %3310, %v3704_v17  }
  0x70   : > { %1858 = vperm.xlu0 %3332, %v3727_v22  }
  0x71   : > { %1548 = vperm.xlu1 %3310, %v3686_v12  }
  0x74   : > { %1862 = vperm.xlu0 %3332, %v3665_v1  }
  0x75   : > { %3311 = vset.pattern.permute.xlu1 %v3543_v19 }
  0x76   : > { %429 = vperm.xlu1 %3311, %v3674_v6  }
  0x78   : > { %3336 = vset.pattern.permute.xlu0 %v3541_v4 }
  0x79   : > { %327 = vperm.xlu0 %3336, %v3699_v16  }
  0x7a   : > { %3312 = vset.pattern.permute.xlu1 %v3546_v21 }
  0x7b   : > { %804 = vperm.xlu1 %3312, %v3699_v16  }
  0x7d   : > { %332 = vperm.xlu0 %3336, %v3727_v22  }
  0x7f   : > { %1211 = vrot.lane.b32.xlu1 %v3751_v26, %s3552_s25 }
  0x80   : > { %3313 = vset.pattern.permute.xlu1 %v3549_v27 }
  0x81   : > { %359 = vperm.xlu0 %3336, %v3704_v17  }
  0x83   : > { %1213 = vrot.lane.b32.xlu1 %v3688_v13, %s3552_s25  ;;  %s3559_s25 = smov 112  }
  0x85   : > { %369 = vperm.xlu0 %3336, %v3735_v23  }
  0x87   : > { %1342 = vperm.xlu1 %3313, %v3660_v0  }
  0x89   : > { %374 = vperm.xlu0 %3336, %v3660_v0  }
  0x8b   : > { %3314 = vset.pattern.permute.xlu1 %v3545_v20 }
  0x8c   : > { %1737 = vperm.xlu1 %3314, %v3704_v17  }
  0x8d   : > { %3338 = vset.pattern.permute.xlu0 %v3543_v19 }
  0x8e   : > { %498 = vperm.xlu0 %3338, %v3686_v12  }
  0x90   : > { %3317 = vset.pattern.permute.xlu1 %v3540_v3 }
  0x91   : > { %578 = vperm.xlu1 %3317, %v3665_v1  }
  0x92   : > { %502 = vperm.xlu0 %3338, %v3735_v23  }
  0x95   : > { %582 = vperm.xlu1 %3317, %v3674_v6  }
  0x96   : > { %v3809_v32 = vpop.permute.xlu1 %337  ;;  %417 = vperm.xlu0 %3338, %v3699_v16   ;;  %v3812_v33 = vpop.permute.xlu0 %679 }
  0x97   : > { %6419 = vst [vmem:[#allocation5_spill] sm:$0xff] %v3809_v32 }
  0x99   : > { %3318 = vset.pattern.permute.xlu1 %v3548_v24 }
  0x9a   : > { %v3815_v34 = vpop.permute.xlu1 %342  ;;  %1023 = vperm.xlu1 %3318, %v3727_v22   ;;  %425 = vperm.xlu0 %3338, %v3665_v1   ;;  %v3819_v35 = vpop.permute.xlu0 %784 }
  0x9b   : > { %6420 = vst [vmem:[#allocation6_spill] sm:$0xff] %v3815_v34 }
  0x9e   : > { %v3821_v36 = vpop.permute.xlu1 %364  ;;  %1425 = vrot.lane.b32.xlu1 %v3771_v30, %s3547_s24  ;;  %s3558_s24 = smov 113  }
  0x9f   : > { %6421 = vst [vmem:[#allocation7_spill] sm:$0xff] %v3821_v36  ;;  %3319 = vset.pattern.permute.xlu1 %v3550_v29 }
  0xa2   : > { %1552 = vperm.xlu1 %3319, %v3735_v23   ;;  %v3827_v37 = vpop.permute.xlu0 %570 }
  0xa3   : > { %v3829_v38 = vpop.permute.xlu1 %494 }
  0xa6   : > { %3320 = vset.pattern.permute.xlu1 %v3551_v31  ;;  %v3832_v39 = vpop.permute.xlu0 %1000 }
  0xa7   : > { %1951 = vperm.xlu1 %3320, %v3704_v17  }
  0xa8   : > { %v3835_v40 = vpop.permute.xlu1 %667 }
  0xaa   : > { %v3837_v41 = vpop.permute.xlu0 %1741 }
  0xab   : > { %6422 = vst [vmem:[#allocation8_spill] sm:$0xff] %v3837_v41  ;;  %1955 = vperm.xlu1 %3320, %v3686_v12  }
  0xac   : > { %v3840_v42 = vpop.permute.xlu1 %671 }
  0xaf   : > { %3322 = vset.pattern.permute.xlu1 %v3546_v21  ;;  %v3843_v43 = vpop.permute.xlu0 %901 }
  0xb0   : > { %816 = vperm.xlu1 %3322, %v3674_v6  }
  0xb1   : > { %v3846_v44 = vpop.permute.xlu1 %506 }
  0xb3   : > { %v3848_v45 = vpop.permute.xlu0 %913 }
  0xb4   : > { %3323 = vset.pattern.permute.xlu1 %v3549_v27 }
  0xb5   : > { %1233 = vperm.xlu1 %3323, %v3699_v16  }
  0xb6   : > { %v3852_v46 = vpop.permute.xlu1 %905 }
  0xb7   : > { %v3854_v47 = vpop.permute.xlu0 %808 }
  0xb9   : > { %3324 = vset.pattern.permute.xlu1 %v3545_v20 }
  0xba   : > { %1745 = vperm.xlu1 %3324, %v3735_v23  }
  0xbb   : > { %v3858_v48 = vpop.permute.xlu1 %675  ;;  %v3860_v49 = vpop.permute.xlu0 %1427 }
  0xbe   : > { %1749 = vperm.xlu1 %3324, %v3660_v0  }
  0xbf   : > { %v3863_v50 = vpop.permute.xlu0 %812 }
  0xc0   : > { %6423 = vst [vmem:[#allocation9_spill] sm:$0xff] %v3863_v50  ;;  %v3865_v51 = vpop.permute.xlu1 %1116 }
  0xc2   : > { %3326 = vset.pattern.permute.xlu1 %v3548_v24 }
  0xc3   : > { %1031 = vperm.xlu1 %3326, %v3674_v6  }
  0xc4   : > { %v3869_v52 = vpop.permute.xlu1 %1120  ;;  %v3871_v53 = vpop.permute.xlu0 %1128 }
  0xc7   : > { %3327 = vset.pattern.permute.xlu1 %v3550_v29 }
  0xc8   : > { %1447 = vperm.xlu1 %3327, %v3699_v16   ;;  %v3875_v54 = vpop.permute.xlu0 %1019 }
  0xc9   : > { %6424 = vst [vmem:[#allocation10_spill] sm:$0xff] %v3875_v54  ;;  %v3877_v55 = vpop.permute.xlu1 %421 }
  0xcc   : > { %1832 = vrot.lane.b32.xlu1 %v3751_v26, %s3553_s26  ;;  %v3880_v56 = vpop.permute.xlu0 %1027 }
  0xcd   : > { %6425 = vst [vmem:[#allocation11_spill] sm:$0xff] %v3880_v56  ;;  %v3882_v57 = vpop.permute.xlu1 %782  ;;  %3328 = vset.pattern.permute.xlu1 %v3551_v31 }
  0xd0   : > { %1834 = vrot.lane.b32.xlu1 %v3688_v13, %s3553_s26  ;;  %v3940_v13 = vld [vmem:[%s3937_s18] sm:$0xff]  ;;  %s3560_s26 = smov 111  }
  0xd1   : > { %v3886_v58 = vpop.permute.xlu1 %909  ;;  %v3888_v59 = vpop.permute.xlu0 %1338  ;;  %v3947_v15 = vmul.f32 %v3771_v30, %v3940_v13  ;;  %v682_v34 = vmul.f32 %v3835_v40, %v3940_v13  ;;  %v4079_v50 = vmul.f32 %v3882_v57, %v3940_v13 }
  0xd3   : > { %v509_v21 = vmul.f32 %v3829_v38, %v3947_v15 }
  0xd4   : > { %1963 = vperm.xlu1 %3328, %v3660_v0  }
  0xd5   : > { %v3891_v60 = vpop.permute.xlu0 %1237 }
  0xd6   : > { %6426 = vst [vmem:[#allocation12_spill] sm:$0xff] %v3891_v60  ;;  %v3893_v61 = vpop.permute.xlu1 %1330 }
  0xd8   : > { %3329 = vset.pattern.permute.xlu1 %v3549_v27 }
  0xd9   : > { %1241 = vperm.xlu1 %3329, %v3665_v1   ;;  %v3897_v62 = vpop.permute.xlu0 %1245 }
  0xda   : > { %6427 = vst [vmem:[#allocation13_spill] sm:$0xff] %v3897_v62  ;;  %v3899_v63 = vpop.permute.xlu1 %1334  ;;  %v4051_v62 = vld [vmem:[%s3937_s18 + $0x50] sm:$0xff] }
  0xdb   : > { %v4061_v56 = vmul.f32 %v3707_v18, %v4051_v62 }
  0xdd   : > { %3331 = vset.pattern.permute.xlu1 %v3545_v20 }
  0xde   : > { %1640 = vperm.xlu1 %3331, %v3699_v16   ;;  %v3903_v2 = vpop.permute.xlu0 %1556 }
  0xdf   : > { %6428 = vst [vmem:[#allocation14_spill] sm:$0xff] %v3903_v2  ;;  %v3905_v0 = vpop.permute.xlu1 %574 }
  0xe2   : > { %1644 = vperm.xlu1 %3331, %v3727_v22   ;;  %v3908_v3 = vpop.permute.xlu0 %1451 }
  0xe3   : > { %6429 = vst [vmem:[#allocation15_spill] sm:$0xff] %v3908_v3  ;;  %v3910_v4 = vpop.permute.xlu1 %998 }
  0xe6   : > { %3333 = vset.pattern.permute.xlu1 %v3550_v29  ;;  %v3913_v5 = vpop.permute.xlu0 %1455  ;;  %v3984_v29 = vld [vmem:[%s3937_s18 + $0x20] sm:$0xff] }
  0xe7   : > { %6430 = vst [vmem:[#allocation16_spill] sm:$0xff] %v3913_v5  ;;  %v3915_v7 = vpop.permute.xlu1 %1124  ;;  %1459 = vperm.xlu1 %3333, %v3674_v6   ;;  %v4048_v5 = vld [vmem:[%s3937_s18 + $0x48] sm:$0xff] }
  0xe8   : > { %v4057_v3 = vmul.f32 %v3771_v30, %v4048_v5 }
  0xeb   : > { %3334 = vset.pattern.permute.xlu1 %v3551_v31  ;;  %v3920_v8 = vpop.permute.xlu0 %1959 }
  0xec   : > { %6431 = vst [vmem:[#allocation17_spill] sm:$0xff] %v3920_v8  ;;  %v3923_v9 = vpop.permute.xlu1 %1544  ;;  %1854 = vperm.xlu1 %3334, %v3699_v16   ;;  %v3952_v16 = vld [vmem:[%s3937_s18 + $0x8] sm:$0xff] }
  0xef   : > { %v3926_v10 = vpop.permute.xlu0 %1858 }
  0xf0   : > { %6432 = vst [vmem:[#allocation18_spill] sm:$0xff] %v3926_v10  ;;  %v3928_v11 = vpop.permute.xlu1 %1548  ;;  %3335 = vset.pattern.permute.xlu1 %v3545_v20  ;;  %v3960_v20 = vmul.f32 %v3707_v18, %v3952_v16 }
  0xf1   : > { %1648 = vperm.xlu1 %3335, %v3665_v1  }
  0xf3   : > { %v3932_v12 = vpop.permute.xlu0 %1862 }
  0xf4   : > { %6433 = vst [vmem:[#allocation19_spill] sm:$0xff] %v3932_v12 }
  0xf5   : > { %v3942_v14 = vpop.permute.xlu1 %429  ;;  %1652 = vperm.xlu1 %3335, %v3674_v6  }
  0xf8   : > { %v3949_v1 = vpop.permute.xlu0 %327 }
  0xf9   : > { %6434 = vst [vmem:[#allocation20_spill] sm:$0xff] %v3949_v1  ;;  %3337 = vset.pattern.permute.xlu1 %v3551_v31  ;;  %v3987_v31 = vld [vmem:[%s3937_s18 + $0x18] sm:$0xff] }
  0xfa   : > { %1866 = vperm.xlu1 %3337, %v3674_v6   ;;  %v3956_v17 = vpop.permute.xlu1 %804  ;;  %v510_v6 = vmul.f32 %v3829_v38, %v3960_v20  ;;  %v3993_v38 = vmul.f32 %v3771_v30, %v3987_v31  ;;  %v685_v12 = vmul.f32 %v3840_v42, %v3987_v31  ;;  %v4095_v2 = vmul.f32 %v3882_v57, %v3987_v31 }
  0xfc   : > { %v3964_v22 = vpop.permute.xlu0 %332 }
  0xfd   : > { %6435 = vst [vmem:[#allocation21_spill] sm:$0xff] %v3964_v22 }
  0xfe   : > { %v3966_v23 = vpop.permute.xlu1 %1211  ;;  %525 = vrot.lane.b32.xlu1 %v509_v21, %s3554_s20  ;;  %v3997_v21 = vmul.f32 %v3707_v18, %v3984_v29 }
  0xff   : > { %3399 = vset.pattern.permute.xlu1 %v3543_v19 }
 0x100   : > { %v3972_v24 = vpop.permute.xlu0 %359 }
 0x101   : > { %6436 = vst [vmem:[#allocation22_spill] sm:$0xff] %v3972_v24  ;;  %v4026_v24 = vld [vmem:[%s3937_s18 + $0x28] sm:$0xff] }
 0x102   : > { %v3974_v25 = vpop.permute.xlu1 %1213  ;;  %527 = vrot.lane.b32.xlu1 %v510_v6, %s3554_s20  ;;  %v687_v36 = vmul.f32 %v3840_v42, %v4026_v24  ;;  %v4115_v54 = vmul.f32 %v3819_v35, %v4026_v24 }
 0x104   : > { %v3977_v26 = vpop.permute.xlu0 %369 }
 0x105   : > { %6437 = vst [vmem:[#allocation23_spill] sm:$0xff] %v3977_v26  ;;  %v683_v26 = vmul.f32 %v3835_v40, %v3952_v16 }
 0x106   : > { %v3979_v27 = vpop.permute.xlu1 %1342 }
 0x108   : > { %v3981_v28 = vpop.permute.xlu0 %374 }
 0x109   : > { %6438 = vst [vmem:[#allocation24_spill] sm:$0xff] %v3981_v28 }
 0x10b   : > { %v3989_v19 = vpop.permute.xlu1 %1737 }
 0x10c   : > { %6439 = vst [vmem:[#allocation25_spill] sm:$0xff] %v3989_v19 }
 0x10d   : > { %v499_v6 = vpop.permute.xlu0 %498 }
 0x10e   : > { %v511_v22 = vmul.f32 %v499_v6, %v3993_v38  ;;  %v512_v1 = vmul.f32 %v499_v6, %v3997_v21  ;;  %v4014_v6 = vld [vmem:[%s3937_s18 + $0x10] sm:$0xff] }
 0x10f   : > { %v4180_v41 = vmul.f32 %v3832_v39, %v4014_v6 }
 0x110   : > { %v4001_v28 = vpop.permute.xlu1 %578  ;;  %529 = vrot.lane.b32.xlu0 %v511_v22, %s3554_s20  ;;  %531 = vrot.lane.b32.xlu1 %v512_v1, %s3554_s20  ;;  %v684_v1 = vmul.f32 %v3835_v40, %v4014_v6  ;;  %v4023_v22 = vld [vmem:[%s3937_s18 + $0x38] sm:$0xff] }
 0x111   : > { %6440 = vst [vmem:[#allocation26_spill] sm:$0xff] %v4001_v28  ;;  %v4041_v40 = vmul.f32 %v3707_v18, %v4023_v22  ;;  %v516_v18 = vmul.f32 %v3846_v44, %v4061_v56 }
 0x114   : > { %v4009_v32 = vpop.permute.xlu1 %582  ;;  %706 = vrot.lane.b32.xlu0 %v682_v34, %s3544_s19  ;;  %708 = vrot.lane.b32.xlu1 %v683_v26, %s3544_s19  ;;  %v4029_v34 = vld [vmem:[%s3937_s18 + $0x30] sm:$0xff] }
 0x115   : > { %6441 = vst [vmem:[#allocation27_spill] sm:$0xff] %v4009_v32  ;;  %v4037_v10 = vmul.f32 %v3771_v30, %v4029_v34  ;;  %v515_v30 = vmul.f32 %v3846_v44, %v4057_v3  ;;  %v692_v32 = vmul.f32 %v3812_v33, %v4051_v62 }
 0x118   : > { %710 = vrot.lane.b32.xlu0 %v684_v1, %s3544_s19  ;;  %712 = vrot.lane.b32.xlu1 %v685_v12, %s3544_s19  ;;  %v686_v12 = vmul.f32 %v3840_v42, %v3984_v29  ;;  %v503_v1 = vpop.permute.xlu0 %502 }
 0x119   : > { %v4031_v26 = vpop.permute.xlu1 %1023  ;;  %v513_v42 = vmul.f32 %v503_v1, %v4037_v10 }
 0x11a   : > { %6442 = vst [vmem:[#allocation28_spill] sm:$0xff] %v4031_v26 }
 0x11c   : > { %714 = vrot.lane.b32.xlu0 %v686_v12, %s3544_s19  ;;  %716 = vrot.lane.b32.xlu1 %v687_v36, %s3544_s19  ;;  %v514_v12 = vmul.f32 %v503_v1, %v4041_v40  ;;  %v4067_v36 = vsel %vm786_vm0, %v3882_v57, %v3819_v35 }
 0x11d   : > { %v4053_v8 = vpop.permute.xlu1 %1425  ;;  %v4083_v1 = vmul.f32 %v4067_v36, %v3952_v16  ;;  %v4111_v26 = vmul.f32 %v4067_v36, %v3984_v29 }
 0x11f   : > { %v917_v44 = vmul.f32 %v3843_v43, %v4083_v1 }
 0x120   : > { %533 = vrot.lane.b32.xlu0 %v513_v42, %s3554_s20  ;;  %535 = vrot.lane.b32.xlu1 %v514_v12, %s3554_s20  ;;  %v916_v12 = vmul.f32 %v3843_v43, %v4079_v50 }
 0x121   : > { %v4071_v60 = vpop.permute.xlu1 %1552 }
 0x122   : > { %6443 = vst [vmem:[#allocation29_spill] sm:$0xff] %v4071_v60  ;;  %v4099_v60 = vmul.f32 %v3819_v35, %v4014_v6 }
 0x124   : > { %537 = vrot.lane.b32.xlu0 %v515_v30, %s3554_s20  ;;  %539 = vrot.lane.b32.xlu1 %v516_v18, %s3554_s20  ;;  %v918_v18 = vmul.f32 %v3843_v43, %v4099_v60  ;;  %v920_v43 = vmul.f32 %v3852_v46, %v4111_v26 }
 0x126   : > { %v4087_v42 = vpop.permute.xlu1 %1951 }
 0x127   : > { %6444 = vst [vmem:[#allocation30_spill] sm:$0xff] %v4087_v42  ;;  %v919_v42 = vmul.f32 %v3852_v46, %v4095_v2 }
 0x128   : > { %940 = vrot.lane.b32.xlu0 %v916_v12, %s3555_s21  ;;  %942 = vrot.lane.b32.xlu1 %v917_v44, %s3555_s21  ;;  %v921_v12 = vmul.f32 %v3852_v46, %v4115_v54  ;;  %v4136_v46 = vld [vmem:[%s3937_s18 + $0x40] sm:$0xff] }
 0x12a   : > { %v4103_v30 = vpop.permute.xlu1 %1955 }
 0x12b   : > { %6445 = vst [vmem:[#allocation31_spill] sm:$0xff] %v4103_v30  ;;  %v689_v30 = vmul.f32 %v3858_v48, %v4023_v22 }
 0x12c   : > { %944 = vrot.lane.b32.xlu0 %v918_v18, %s3555_s21  ;;  %946 = vrot.lane.b32.xlu1 %v919_v42, %s3555_s21  ;;  %v688_v18 = vmul.f32 %v3858_v48, %v4029_v34 }
 0x12f   : > { %v4123_v44 = vpop.permute.xlu1 %816 }
 0x130   : > { %6446 = vst [vmem:[#allocation32_spill] sm:$0xff] %v4123_v44  ;;  %948 = vrot.lane.b32.xlu0 %v920_v43, %s3555_s21  ;;  %950 = vrot.lane.b32.xlu1 %v921_v12, %s3555_s21  ;;  %v691_v43 = vmul.f32 %v3812_v33, %v4048_v5  ;;  %v690_v12 = vmul.f32 %v3858_v48, %v4136_v46 }
 0x131   : > { %v4145_v44 = vsel %vm633_vm1, %v3910_v4, %v3832_v39  ;;  %v4160_v48 = vmul.f32 %v3910_v4, %v3940_v13 }
 0x132   : > { %v4164_v28 = vmul.f32 %v4145_v44, %v3952_v16 }
 0x133   : > { %6449 = vst [vmem:[#allocation35_spill] sm:$0xff] %v4160_v48 }
 0x134   : > { %v4131_v42 = vpop.permute.xlu1 %1233  ;;  %718 = vrot.lane.b32.xlu0 %v688_v18, %s3544_s19  ;;  %720 = vrot.lane.b32.xlu1 %v689_v30, %s3544_s19  ;;  %v4150_v18 = vld [vmem:[%s3937_s18 + $0x58] sm:$0xff]  ;;  %6450 = vst [vmem:[#allocation36_spill] sm:$0xff] %v4164_v28 }
 0x135   : > { %6447 = vst [vmem:[#allocation33_spill] sm:$0xff] %v4131_v42  ;;  %v693_v42 = vmul.f32 %v3812_v33, %v4150_v18  ;;  %v1131_v33 = vmul.f32 %v3865_v51, %v4160_v48 }
 0x138   : > { %722 = vrot.lane.b32.xlu0 %v690_v12, %s3544_s19  ;;  %724 = vrot.lane.b32.xlu1 %v691_v43, %s3544_s19  ;;  %v4172_v12 = vmul.f32 %v3910_v4, %v3987_v31 }
 0x139   : > { %v4152_v30 = vpop.permute.xlu1 %1745 }
 0x13a   : > { %6448 = vst [vmem:[#allocation34_spill] sm:$0xff] %v4152_v30  ;;  %6452 = vst [vmem:[#allocation38_spill] sm:$0xff] %v4172_v12  ;;  %v1132_v30 = vmul.f32 %v3865_v51, %v4164_v28  ;;  %v1134_v48 = vmul.f32 %v3869_v52, %v4172_v12  ;;  %v4196_v28 = vmul.f32 %v3832_v39, %v4026_v24 }
 0x13c   : > { %726 = vrot.lane.b32.xlu0 %v692_v32, %s3544_s19  ;;  %728 = vrot.lane.b32.xlu1 %v693_v42, %s3544_s19  ;;  %v4186_v32 = vmul.f32 %v4145_v44, %v3984_v29 }
 0x13d   : > { %v4168_v43 = vpop.permute.xlu1 %1749 }
 0x13e   : > { %6451 = vst [vmem:[#allocation37_spill] sm:$0xff] %v4168_v43  ;;  %v1133_v43 = vmul.f32 %v3865_v51, %v4180_v41 }
 0x140   : > { %1155 = vrot.lane.b32.xlu0 %v1131_v33, %s3556_s22  ;;  %1157 = vrot.lane.b32.xlu1 %v1132_v30, %s3556_s22  ;;  %v1136_v30 = vmul.f32 %v3869_v52, %v4196_v28  ;;  %v1135_v33 = vmul.f32 %v3869_v52, %v4186_v32  ;;  %v434_v52 = vmul.f32 %v3877_v55, %v3993_v38 }
 0x142   : > { %v4188_v42 = vpop.permute.xlu1 %1031 }
 0x143   : > { %6453 = vst [vmem:[#allocation39_spill] sm:$0xff] %v4188_v42  ;;  %v418_v42 = vpop.permute.xlu0 %417 }
 0x144   : > { %1159 = vrot.lane.b32.xlu0 %v1133_v43, %s3556_s22  ;;  %1161 = vrot.lane.b32.xlu1 %v1134_v48, %s3556_s22  ;;  %v432_v51 = vmul.f32 %v418_v42, %v3947_v15  ;;  %v433_v12 = vmul.f32 %v418_v42, %v3960_v20  ;;  %v435_v48 = vmul.f32 %v3877_v55, %v3997_v21 }
 0x145   : > { %v4228_v15 = vmul.f32 %v3882_v57, %v4029_v34  ;;  %v4234_v55 = vmul.f32 %v3882_v57, %v4048_v5  ;;  %v4250_v57 = vmul.f32 %v4067_v36, %v4051_v62 }
 0x147   : > { %v4204_v19 = vpop.permute.xlu1 %1447  ;;  %v922_v38 = vmul.f32 %v3886_v58, %v4228_v15 }
 0x148   : > { %6454 = vst [vmem:[#allocation40_spill] sm:$0xff] %v4204_v19  ;;  %1163 = vrot.lane.b32.xlu0 %v1135_v33, %s3556_s22  ;;  %1165 = vrot.lane.b32.xlu1 %v1136_v30, %s3556_s22  ;;  %v4220_v33 = vmul.f32 %v4067_v36, %v4023_v22 }
 0x14a   : > { %v923_v20 = vmul.f32 %v3886_v58, %v4220_v33 }
 0x14b   : > { %v4210_v43 = vpop.permute.xlu1 %1832 }
 0x14c   : > { %450 = vrot.lane.b32.xlu1 %v433_v12, %s3554_s20  ;;  %448 = vrot.lane.b32.xlu0 %v432_v51, %s3554_s20  ;;  %v4242_v12 = vmul.f32 %v3819_v35, %v4136_v46  ;;  %v925_v51 = vmul.f32 %v3848_v45, %v4234_v55 }
 0x14e   : > { %v924_v42 = vmul.f32 %v3886_v58, %v4242_v12 }
 0x14f   : > { %v4222_v30 = vpop.permute.xlu1 %1834 }
 0x150   : > { %454 = vrot.lane.b32.xlu1 %v435_v48, %s3554_s20  ;;  %452 = vrot.lane.b32.xlu0 %v434_v52, %s3554_s20  ;;  %v4256_v52 = vsel %vm1215_vm2, %v3966_v23, %v3974_v25  ;;  %v4260_v48 = vmul.f32 %v3819_v35, %v4150_v18  ;;  %v926_v35 = vmul.f32 %v3848_v45, %v4250_v57 }
 0x151   : > { %v4270_v36 = vmul.f32 %v4256_v52, %v3952_v16  ;;  %v4292_v19 = vmul.f32 %v4256_v52, %v3984_v29 }
 0x152   : > { %v927_v58 = vmul.f32 %v3848_v45, %v4260_v48 }
 0x153   : > { %v4238_v21 = vpop.permute.xlu1 %1963  ;;  %6460 = vst [vmem:[#allocation46_spill] sm:$0xff] %v4292_v19 }
 0x154   : > { %6455 = vst [vmem:[#allocation41_spill] sm:$0xff] %v4238_v21  ;;  %954 = vrot.lane.b32.xlu1 %v923_v20, %s3555_s21  ;;  %952 = vrot.lane.b32.xlu0 %v922_v38, %s3555_s21  ;;  %v4274_v38 = vmul.f32 %v3974_v25, %v4014_v6  ;;  %v4288_v21 = vmul.f32 %v3974_v25, %v4026_v24 }
 0x156   : > { %6457 = vst [vmem:[#allocation43_spill] sm:$0xff] %v4274_v38  ;;  %6459 = vst [vmem:[#allocation45_spill] sm:$0xff] %v4288_v21 }
 0x158   : > { %v4262_v20 = vpop.permute.xlu1 %1241  ;;  %958 = vrot.lane.b32.xlu1 %v925_v51, %s3555_s21  ;;  %956 = vrot.lane.b32.xlu0 %v924_v42, %s3555_s21  ;;  %v1347_v42 = vmul.f32 %v3893_v61, %v4274_v38  ;;  %v4308_v38 = vmul.f32 %v3966_v23, %v3987_v31 }
 0x159   : > { %6456 = vst [vmem:[#allocation42_spill] sm:$0xff] %v4262_v20  ;;  %v1346_v20 = vmul.f32 %v3893_v61, %v4270_v36 }
 0x15c   : > { %962 = vrot.lane.b32.xlu1 %v927_v58, %s3555_s21  ;;  %960 = vrot.lane.b32.xlu0 %v926_v35, %s3555_s21  ;;  %v4300_v58 = vmul.f32 %v3966_v23, %v3940_v13  ;;  %v1350_v35 = vmul.f32 %v3899_v63, %v4288_v21 }
 0x15d   : > { %v4280_v51 = vpop.permute.xlu1 %1640 }
 0x15e   : > { %6458 = vst [vmem:[#allocation44_spill] sm:$0xff] %v4280_v51  ;;  %v1349_v51 = vmul.f32 %v3899_v63, %v4292_v19  ;;  %v585_v19 = vmul.f32 %v3827_v37, %v3940_v13 }
 0x160   : > { %1373 = vrot.lane.b32.xlu1 %v1347_v42, %s3557_s23  ;;  %1371 = vrot.lane.b32.xlu0 %v1346_v20, %s3557_s23  ;;  %v1348_v42 = vmul.f32 %v3899_v63, %v4308_v38  ;;  %v587_v63 = vmul.f32 %v3827_v37, %v4014_v6 }
 0x161   : > { %v4296_v45 = vpop.permute.xlu1 %1644 }
 0x162   : > { %6461 = vst [vmem:[#allocation47_spill] sm:$0xff] %v4296_v45  ;;  %v1345_v45 = vmul.f32 %v3893_v61, %v4300_v58  ;;  %v588_v61 = vmul.f32 %v3905_v0, %v3987_v31 }
 0x164   : > { %1379 = vrot.lane.b32.xlu1 %v1350_v35, %s3557_s23  ;;  %1377 = vrot.lane.b32.xlu0 %v1349_v51, %s3557_s23  ;;  %v586_v35 = vmul.f32 %v3827_v37, %v3952_v16  ;;  %v4346_v37 = vmul.f32 %v3910_v4, %v4029_v34 }
 0x166   : > { %v4312_v20 = vpop.permute.xlu1 %1459 }
 0x167   : > { %6462 = vst [vmem:[#allocation48_spill] sm:$0xff] %v4312_v20 }
 0x168   : > { %1375 = vrot.lane.b32.xlu1 %v1348_v42, %s3557_s23  ;;  %1369 = vrot.lane.b32.xlu0 %v1345_v45, %s3557_s23  ;;  %v589_v45 = vmul.f32 %v3905_v0, %v3984_v29  ;;  %v590_v42 = vmul.f32 %v3905_v0, %v4026_v24 }
 0x16b   : > { %v4324_v21 = vpop.permute.xlu1 %1854 }
 0x16c   : > { %6463 = vst [vmem:[#allocation49_spill] sm:$0xff] %v4324_v21  ;;  %611 = vrot.lane.b32.xlu1 %v586_v35, %s3544_s19  ;;  %609 = vrot.lane.b32.xlu0 %v585_v19, %s3544_s19  ;;  %v4342_v19 = vmul.f32 %v4145_v44, %v4023_v22  ;;  %v4379_v21 = vsel %vm1429_vm3, %v4053_v8, %v3860_v49 }
 0x16e   : > { %v1138_v0 = vmul.f32 %v3915_v7, %v4342_v19 }
 0x170   : > { %v4332_v51 = vpop.permute.xlu1 %1648  ;;  %615 = vrot.lane.b32.xlu1 %v588_v61, %s3544_s19  ;;  %613 = vrot.lane.b32.xlu0 %v587_v63, %s3544_s19  ;;  %v1137_v63 = vmul.f32 %v3915_v7, %v4346_v37  ;;  %v4358_v61 = vmul.f32 %v3910_v4, %v4048_v5 }
 0x171   : > { %6464 = vst [vmem:[#allocation50_spill] sm:$0xff] %v4332_v51  ;;  %v4362_v51 = vmul.f32 %v3832_v39, %v4136_v46 }
 0x172   : > { %v1140_v4 = vmul.f32 %v3871_v53, %v4358_v61 }
 0x174   : > { %v4348_v35 = vpop.permute.xlu1 %1652  ;;  %619 = vrot.lane.b32.xlu1 %v590_v42, %s3544_s19  ;;  %617 = vrot.lane.b32.xlu0 %v589_v45, %s3544_s19  ;;  %v1139_v42 = vmul.f32 %v3915_v7, %v4362_v51 }
 0x175   : > { %6465 = vst [vmem:[#allocation51_spill] sm:$0xff] %v4348_v35  ;;  %v4372_v35 = vmul.f32 %v4145_v44, %v4051_v62 }
 0x177   : > { %6467 = vst [vmem:[#allocation53_spill] sm:$0xff] %v4372_v35  ;;  %v1141_v20 = vmul.f32 %v3871_v53, %v4372_v35  ;;  %v4417_v35 = vmul.f32 %v3860_v49, %v4026_v24 }
 0x178   : > { %1169 = vrot.lane.b32.xlu1 %v1138_v0, %s3556_s22  ;;  %1167 = vrot.lane.b32.xlu0 %v1137_v63, %s3556_s22  ;;  %v4383_v63 = vmul.f32 %v3832_v39, %v4150_v18  ;;  %v426_v0 = vpop.permute.xlu0 %425  ;;  %v4399_v39 = vmul.f32 %v3860_v49, %v4014_v6 }
 0x179   : > { %v4366_v45 = vpop.permute.xlu1 %1866  ;;  %6475 = vst [vmem:[#allocation61_spill] sm:$0xff] %v4417_v35 }
 0x17a   : > { %6466 = vst [vmem:[#allocation52_spill] sm:$0xff] %v4366_v45  ;;  %6468 = vst [vmem:[#allocation54_spill] sm:$0xff] %v4383_v63  ;;  %v1142_v44 = vmul.f32 %v3871_v53, %v4383_v63  ;;  %v4393_v45 = vmul.f32 %v4379_v21, %v3952_v16  ;;  %v4413_v53 = vmul.f32 %v4379_v21, %v3984_v29 }
 0x17b   : > { %6471 = vst [vmem:[#allocation57_spill] sm:$0xff] %v4399_v39 }
 0x17c   : > { %1173 = vrot.lane.b32.xlu1 %v1140_v4, %s3556_s22  ;;  %1171 = vrot.lane.b32.xlu0 %v1139_v42, %s3556_s22  ;;  %6470 = vst [vmem:[#allocation56_spill] sm:$0xff] %v4393_v45  ;;  %v1561_v4 = vmul.f32 %v3923_v9, %v4399_v39  ;;  %v1560_v63 = vmul.f32 %v3923_v9, %v4393_v45  ;;  %6474 = vst [vmem:[#allocation60_spill] sm:$0xff] %v4413_v53 }
 0x17d   : > { %v4387_v7 = vpop.permute.xlu1 %525  ;;  %v1563_v39 = vmul.f32 %v3928_v11, %v4413_v53  ;;  %v4435_v45 = vmul.f32 %v4053_v8, %v3987_v31 }
 0x17e   : > { %6469 = vst [vmem:[#allocation55_spill] sm:$0xff] %v4387_v7 }
 0x180   : > { %1177 = vrot.lane.b32.xlu1 %v1142_v44, %s3556_s22  ;;  %1175 = vrot.lane.b32.xlu0 %v1141_v20, %s3556_s22  ;;  %v1564_v44 = vmul.f32 %v3928_v11, %v4417_v35 }
 0x181   : > { %v4403_v42 = vpop.permute.xlu1 %527 }
 0x182   : > { %6472 = vst [vmem:[#allocation58_spill] sm:$0xff] %v4403_v42  ;;  %v4407_v7 = vpop.permute.xlu0 %529 }
 0x183   : > { %6473 = vst [vmem:[#allocation59_spill] sm:$0xff] %v4407_v7  ;;  %v4427_v7 = vmul.f32 %v4053_v8, %v3940_v13 }
 0x184   : > { %1587 = vrot.lane.b32.xlu1 %v1561_v4, %s3558_s24  ;;  %1585 = vrot.lane.b32.xlu0 %v1560_v63, %s3558_s24 }
 0x185   : > { %v4421_v20 = vpop.permute.xlu1 %531 }
 0x186   : > { %6476 = vst [vmem:[#allocation62_spill] sm:$0xff] %v4421_v20  ;;  %v4429_v42 = vpop.permute.xlu0 %706  ;;  %v1562_v20 = vmul.f32 %v3928_v11, %v4435_v45 }
 0x187   : > { %6477 = vst [vmem:[#allocation63_spill] sm:$0xff] %v4429_v42  ;;  %v1559_v42 = vmul.f32 %v3923_v9, %v4427_v7  ;;  %v438_v9 = vmul.f32 %v3942_v14, %v4057_v3  ;;  %v821_v3 = vmul.f32 %v3956_v17, %v4099_v60  ;;  %v4497_v60 = vmul.f32 %v3974_v25, %v4136_v46 }
 0x188   : > { %1593 = vrot.lane.b32.xlu1 %v1564_v44, %s3558_s24  ;;  %1591 = vrot.lane.b32.xlu0 %v1563_v39, %s3558_s24  ;;  %v436_v44 = vmul.f32 %v426_v0, %v4037_v10  ;;  %v437_v39 = vmul.f32 %v426_v0, %v4041_v40  ;;  %v819_v40 = vmul.f32 %v3956_v17, %v4079_v50 }
 0x189   : > { %v4439_v63 = vpop.permute.xlu1 %708  ;;  %v820_v0 = vmul.f32 %v3956_v17, %v4083_v1  ;;  %v824_v1 = vmul.f32 %v3854_v47, %v4115_v54  ;;  %v4509_v54 = vmul.f32 %v4256_v52, %v4051_v62 }
 0x18a   : > { %v4441_v4 = vpop.permute.xlu0 %710 }
 0x18c   : > { %1589 = vrot.lane.b32.xlu1 %v1562_v20, %s3558_s24  ;;  %1583 = vrot.lane.b32.xlu0 %v1559_v42, %s3558_s24  ;;  %v439_v42 = vmul.f32 %v3942_v14, %v4061_v56 }
 0x18d   : > { %v4449_v53 = vpop.permute.xlu1 %712 }
 0x18e   : > { %v4453_v35 = vpop.permute.xlu0 %714 }
 0x190   : > { %458 = vrot.lane.b32.xlu1 %v437_v39, %s3554_s20  ;;  %456 = vrot.lane.b32.xlu0 %v436_v44, %s3554_s20  ;;  %v822_v39 = vmul.f32 %v3854_v47, %v4095_v2  ;;  %v823_v2 = vmul.f32 %v3854_v47, %v4111_v26  ;;  %v4519_v47 = vmul.f32 %v3974_v25, %v4150_v18 }
 0x191   : > { %v4457_v11 = vpop.permute.xlu1 %716 }
 0x192   : > { %v4463_v20 = vpop.permute.xlu0 %533 }
 0x193   : > { %6478 = vst [vmem:[#allocation64_spill] sm:$0xff] %v4463_v20 }
 0x194   : > { %462 = vrot.lane.b32.xlu1 %v439_v42, %s3554_s20  ;;  %460 = vrot.lane.b32.xlu0 %v438_v9, %s3554_s20  ;;  %v4493_v9 = vmul.f32 %v4256_v52, %v4023_v22  ;;  %v1355_v52 = vmul.f32 %v3979_v27, %v4509_v54 }
 0x195   : > { %v4467_v10 = vpop.permute.xlu1 %535 }
 0x196   : > { %6479 = vst [vmem:[#allocation65_spill] sm:$0xff] %v4467_v10  ;;  %v4473_v44 = vpop.permute.xlu0 %537 }
 0x197   : > { %6480 = vst [vmem:[#allocation66_spill] sm:$0xff] %v4473_v44 }
 0x198   : > { %845 = vrot.lane.b32.xlu1 %v820_v0, %s3555_s21  ;;  %843 = vrot.lane.b32.xlu0 %v819_v40, %s3555_s21  ;;  %v1353_v0 = vmul.f32 %v3888_v59, %v4497_v60 }
 0x199   : > { %v4477_v56 = vpop.permute.xlu1 %539 }
 0x19a   : > { %6481 = vst [vmem:[#allocation67_spill] sm:$0xff] %v4477_v56  ;;  %v4481_v14 = vpop.permute.xlu0 %940 }
 0x19c   : > { %849 = vrot.lane.b32.xlu1 %v822_v39, %s3555_s21  ;;  %847 = vrot.lane.b32.xlu0 %v821_v3, %s3555_s21  ;;  %v1352_v3 = vmul.f32 %v3888_v59, %v4493_v9  ;;  %v1356_v39 = vmul.f32 %v3979_v27, %v4519_v47 }
 0x19d   : > { %v4487_v50 = vpop.permute.xlu1 %942 }
 0x19e   : > { %v4499_v17 = vpop.permute.xlu0 %944 }
 0x1a0   : > { %853 = vrot.lane.b32.xlu1 %v824_v1, %s3555_s21  ;;  %851 = vrot.lane.b32.xlu0 %v823_v2, %s3555_s21  ;;  %v6487_v2 = vld [vmem:[#allocation25_spill] sm:$0xff] }
 0x1a1   : > { %v4505_v42 = vpop.permute.xlu1 %946 }
 0x1a2   : > { %6482 = vst [vmem:[#allocation68_spill] sm:$0xff] %v4505_v42  ;;  %v4511_v40 = vpop.permute.xlu0 %948 }
 0x1a3   : > { %6483 = vst [vmem:[#allocation69_spill] sm:$0xff] %v4511_v40  ;;  %v4721_v40 = vmul.f32 %v4053_v8, %v4029_v34 }
 0x1a4   : > { %1385 = vrot.lane.b32.xlu1 %v1353_v0, %s3557_s23  ;;  %1383 = vrot.lane.b32.xlu0 %v1352_v3, %s3557_s23  ;;  %v1753_v0 = vmul.f32 %v6487_v2, %v3952_v16  ;;  %v1754_v3 = vmul.f32 %v6487_v2, %v4014_v6 }
 0x1a5   : > { %v4523_v26 = vpop.permute.xlu1 %950 }
 0x1a6   : > { %6484 = vst [vmem:[#allocation70_spill] sm:$0xff] %v4523_v26  ;;  %v4529_v1 = vpop.permute.xlu0 %718 }
 0x1a7   : > { %6485 = vst [vmem:[#allocation71_spill] sm:$0xff] %v4529_v1 }
 0x1a8   : > { %1391 = vrot.lane.b32.xlu1 %v1356_v39, %s3557_s23  ;;  %1389 = vrot.lane.b32.xlu0 %v1355_v52, %s3557_s23  ;;  %v6490_v39 = vld [vmem:[#allocation8_spill] sm:$0xff] }
 0x1a9   : > { %v4533_v25 = vpop.permute.xlu1 %720  ;;  %v1756_v52 = vmul.f32 %v6490_v39, %v3984_v29  ;;  %v1757_v1 = vmul.f32 %v6490_v39, %v4026_v24 }
 0x1aa   : > { %6486 = vst [vmem:[#allocation72_spill] sm:$0xff] %v4533_v25  ;;  %v4539_v44 = vpop.permute.xlu0 %722  ;;  %v4551_v25 = vmul.f32 %v3966_v23, %v4029_v34 }
 0x1ab   : > { %6488 = vst [vmem:[#allocation25_spill] sm:$0xff] %v4539_v44  ;;  %v4557_v44 = vmul.f32 %v3966_v23, %v4048_v5 }
 0x1ac   : > { %1780 = vrot.lane.b32.xlu1 %v1754_v3, %s3559_s25  ;;  %1778 = vrot.lane.b32.xlu0 %v1753_v0, %s3559_s25  ;;  %v1351_v10 = vmul.f32 %v3888_v59, %v4551_v25  ;;  %v6497_v59 = vld [vmem:[#allocation26_spill] sm:$0xff] }
 0x1ad   : > { %v4543_v56 = vpop.permute.xlu1 %724  ;;  %v1354_v3 = vmul.f32 %v3979_v27, %v4557_v44 }
 0x1ae   : > { %6489 = vst [vmem:[#allocation73_spill] sm:$0xff] %v4543_v56  ;;  %v4553_v20 = vpop.permute.xlu0 %726 }
 0x1af   : > { %6491 = vst [vmem:[#allocation8_spill] sm:$0xff] %v4553_v20 }
 0x1b0   : > { %1786 = vrot.lane.b32.xlu1 %v1757_v1, %s3559_s25  ;;  %1784 = vrot.lane.b32.xlu0 %v1756_v52, %s3559_s25  ;;  %v1755_v1 = vmul.f32 %v6490_v39, %v3987_v31  ;;  %v1752_v52 = vmul.f32 %v6487_v2, %v3940_v13  ;;  %v593_v39 = vmul.f32 %v6497_v59, %v4136_v46 }
 0x1b1   : > { %v4561_v0 = vpop.permute.xlu1 %728 }
 0x1b2   : > { %6492 = vst [vmem:[#allocation74_spill] sm:$0xff] %v4561_v0  ;;  %v4565_v56 = vpop.permute.xlu0 %1155 }
 0x1b3   : > { %6493 = vst [vmem:[#allocation75_spill] sm:$0xff] %v4565_v56 }
 0x1b4   : > { %1387 = vrot.lane.b32.xlu1 %v1354_v3, %s3557_s23  ;;  %1381 = vrot.lane.b32.xlu0 %v1351_v10, %s3557_s23  ;;  %v591_v3 = vmul.f32 %v6497_v59, %v4029_v34  ;;  %v592_v10 = vmul.f32 %v6497_v59, %v4023_v22 }
 0x1b5   : > { %v4571_v23 = vpop.permute.xlu1 %1157 }
 0x1b6   : > { %6494 = vst [vmem:[#allocation76_spill] sm:$0xff] %v4571_v23  ;;  %v4577_v20 = vpop.permute.xlu0 %1159 }
 0x1b7   : > { %6495 = vst [vmem:[#allocation77_spill] sm:$0xff] %v4577_v20 }
 0x1b8   : > { %1782 = vrot.lane.b32.xlu1 %v1755_v1, %s3559_s25  ;;  %1776 = vrot.lane.b32.xlu0 %v1752_v52, %s3559_s25  ;;  %v6500_v1 = vld [vmem:[#allocation27_spill] sm:$0xff] }
 0x1b9   : > { %v4581_v27 = vpop.permute.xlu1 %1161  ;;  %v594_v52 = vmul.f32 %v6500_v1, %v4048_v5 }
 0x1ba   : > { %6496 = vst [vmem:[#allocation78_spill] sm:$0xff] %v4581_v27  ;;  %v4587_v0 = vpop.permute.xlu0 %1163 }
 0x1bb   : > { %6498 = vst [vmem:[#allocation26_spill] sm:$0xff] %v4587_v0 }
 0x1bc   : > { %623 = vrot.lane.b32.xlu1 %v592_v10, %s3544_s19  ;;  %621 = vrot.lane.b32.xlu0 %v591_v3, %s3544_s19  ;;  %v595_v10 = vmul.f32 %v6500_v1, %v4051_v62  ;;  %v596_v3 = vmul.f32 %v6500_v1, %v4150_v18 }
 0x1bd   : > { %v4591_v2 = vpop.permute.xlu1 %1165 }
 0x1be   : > { %6499 = vst [vmem:[#allocation79_spill] sm:$0xff] %v4591_v2  ;;  %v4597_v27 = vpop.permute.xlu0 %448 }
 0x1bf   : > { %6501 = vst [vmem:[#allocation27_spill] sm:$0xff] %v4597_v27 }
 0x1c0   : > { %627 = vrot.lane.b32.xlu1 %v594_v52, %s3544_s19  ;;  %625 = vrot.lane.b32.xlu0 %v593_v39, %s3544_s19  ;;  %v6506_v52 = vld [vmem:[#allocation36_spill] sm:$0xff]  ;;  %v6507_v39 = vld [vmem:[#allocation10_spill] sm:$0xff] }
 0x1c1   : > { %v4601_v20 = vpop.permute.xlu1 %450  ;;  %v1035_v2 = vmul.f32 %v6507_v39, %v6506_v52 }
 0x1c2   : > { %6502 = vst [vmem:[#allocation80_spill] sm:$0xff] %v4601_v20  ;;  %v4607_v0 = vpop.permute.xlu0 %452  ;;  %v6508_v20 = vld [vmem:[#allocation35_spill] sm:$0xff] }
 0x1c3   : > { %6503 = vst [vmem:[#allocation81_spill] sm:$0xff] %v4607_v0  ;;  %v1034_v56 = vmul.f32 %v6507_v39, %v6508_v20  ;;  %v6511_v0 = vld [vmem:[#allocation28_spill] sm:$0xff] }
 0x1c4   : > { %631 = vrot.lane.b32.xlu1 %v596_v3, %s3544_s19  ;;  %629 = vrot.lane.b32.xlu0 %v595_v10, %s3544_s19  ;;  %v1036_v3 = vmul.f32 %v6507_v39, %v4180_v41  ;;  %v6510_v10 = vld [vmem:[#allocation38_spill] sm:$0xff]  ;;  %v1038_v20 = vmul.f32 %v6511_v0, %v4186_v32  ;;  %v4639_v41 = vmul.f32 %v4379_v21, %v4023_v22  ;;  %v6516_v32 = vld [vmem:[#allocation29_spill] sm:$0xff] }
 0x1c5   : > { %v4611_v59 = vpop.permute.xlu1 %454  ;;  %v4645_v39 = vmul.f32 %v3860_v49, %v4136_v46 }
 0x1c6   : > { %6504 = vst [vmem:[#allocation82_spill] sm:$0xff] %v4611_v59  ;;  %v4613_v27 = vpop.permute.xlu0 %952  ;;  %v1037_v59 = vmul.f32 %v6511_v0, %v6510_v10 }
 0x1c7   : > { %6505 = vst [vmem:[#allocation83_spill] sm:$0xff] %v4613_v27  ;;  %v4681_v27 = vmul.f32 %v4222_v30, %v4014_v6 }
 0x1c8   : > { %1060 = vrot.lane.b32.xlu1 %v1035_v2, %s3556_s22  ;;  %1058 = vrot.lane.b32.xlu0 %v1034_v56, %s3556_s22  ;;  %v1039_v56 = vmul.f32 %v6511_v0, %v4196_v28  ;;  %v1566_v28 = vmul.f32 %v6516_v32, %v4639_v41  ;;  %v1567_v0 = vmul.f32 %v6516_v32, %v4645_v39 }
 0x1c9   : > { %v4621_v1 = vpop.permute.xlu1 %954 }
 0x1ca   : > { %6509 = vst [vmem:[#allocation36_spill] sm:$0xff] %v4621_v1  ;;  %v4627_v23 = vpop.permute.xlu0 %956 }
 0x1cb   : > { %6512 = vst [vmem:[#allocation10_spill] sm:$0xff] %v4627_v23 }
 0x1cc   : > { %1064 = vrot.lane.b32.xlu1 %v1037_v59, %s3556_s22  ;;  %1062 = vrot.lane.b32.xlu0 %v1036_v3, %s3556_s22  ;;  %v4657_v3 = vmul.f32 %v4379_v21, %v4051_v62 }
 0x1cd   : > { %v4631_v52 = vpop.permute.xlu1 %958 }
 0x1ce   : > { %6513 = vst [vmem:[#allocation35_spill] sm:$0xff] %v4631_v52  ;;  %v4641_v2 = vpop.permute.xlu0 %960  ;;  %v4663_v52 = vsel %vm1836_vm4, %v4210_v43, %v4222_v30 }
 0x1cf   : > { %6514 = vst [vmem:[#allocation38_spill] sm:$0xff] %v4641_v2  ;;  %v6519_v2 = vld [vmem:[#allocation14_spill] sm:$0xff] }
 0x1d0   : > { %1068 = vrot.lane.b32.xlu1 %v1039_v56, %s3556_s22  ;;  %1066 = vrot.lane.b32.xlu0 %v1038_v20, %s3556_s22  ;;  %v4667_v20 = vmul.f32 %v3860_v49, %v4150_v18  ;;  %v1569_v49 = vmul.f32 %v6519_v2, %v4657_v3 }
 0x1d1   : > { %v4649_v59 = vpop.permute.xlu1 %962 }
 0x1d2   : > { %6515 = vst [vmem:[#allocation28_spill] sm:$0xff] %v4649_v59  ;;  %v4659_v10 = vpop.permute.xlu0 %1371  ;;  %v1570_v21 = vmul.f32 %v6519_v2, %v4667_v20  ;;  %v4677_v59 = vmul.f32 %v4663_v52, %v3952_v16  ;;  %v6523_v16 = vld [vmem:[#allocation30_spill] sm:$0xff] }
 0x1d3   : > { %6517 = vst [vmem:[#allocation29_spill] sm:$0xff] %v4659_v10  ;;  %v1968_v23 = vmul.f32 %v6523_v16, %v4681_v27 }
 0x1d4   : > { %1599 = vrot.lane.b32.xlu1 %v1567_v0, %s3558_s24  ;;  %1597 = vrot.lane.b32.xlu0 %v1566_v28, %s3558_s24  ;;  %v1967_v10 = vmul.f32 %v6523_v16, %v4677_v59 }
 0x1d5   : > { %v4671_v56 = vpop.permute.xlu1 %1373 }
 0x1d6   : > { %6518 = vst [vmem:[#allocation84_spill] sm:$0xff] %v4671_v56  ;;  %v4683_v1 = vpop.permute.xlu0 %1377  ;;  %v4703_v56 = vmul.f32 %v4663_v52, %v3984_v29 }
 0x1d7   : > { %6520 = vst [vmem:[#allocation14_spill] sm:$0xff] %v4683_v1  ;;  %v4699_v1 = vmul.f32 %v4222_v30, %v4026_v24 }
 0x1d8   : > { %1605 = vrot.lane.b32.xlu1 %v1570_v21, %s3558_s24  ;;  %1603 = vrot.lane.b32.xlu0 %v1569_v49, %s3558_s24  ;;  %v4711_v49 = vmul.f32 %v4053_v8, %v4048_v5  ;;  %v4739_v8 = vmul.f32 %v4210_v43, %v3987_v31 }
 0x1d9   : > { %v4689_v28 = vpop.permute.xlu1 %1379 }
 0x1da   : > { %6521 = vst [vmem:[#allocation85_spill] sm:$0xff] %v4689_v28  ;;  %v4691_v0 = vpop.permute.xlu0 %1369  ;;  %v6526_v28 = vld [vmem:[#allocation31_spill] sm:$0xff]  ;;  %v1568_v26 = vmul.f32 %v6519_v2, %v4711_v49 }
 0x1db   : > { %6522 = vst [vmem:[#allocation86_spill] sm:$0xff] %v4691_v0  ;;  %v1971_v42 = vmul.f32 %v6526_v28, %v4699_v1  ;;  %v1970_v29 = vmul.f32 %v6526_v28, %v4703_v56 }
 0x1dc   : > { %1994 = vrot.lane.b32.xlu1 %v1968_v23, %s3560_s26  ;;  %1992 = vrot.lane.b32.xlu0 %v1967_v10, %s3560_s26  ;;  %v1565_v10 = vmul.f32 %v6516_v32, %v4721_v40 }
 0x1dd   : > { %v4707_v21 = vpop.permute.xlu1 %1375 }
 0x1de   : > { %6524 = vst [vmem:[#allocation30_spill] sm:$0xff] %v4707_v21  ;;  %v4713_v0 = vpop.permute.xlu0 %609 }
 0x1df   : > { %6525 = vst [vmem:[#allocation87_spill] sm:$0xff] %v4713_v0  ;;  %v4731_v0 = vmul.f32 %v4210_v43, %v3940_v13  ;;  %v1969_v13 = vmul.f32 %v6526_v28, %v4739_v8 }
 0x1e0   : > { %2000 = vrot.lane.b32.xlu1 %v1971_v42, %s3560_s26  ;;  %1998 = vrot.lane.b32.xlu0 %v1970_v29, %s3560_s26 }
 0x1e1   : > { %v4725_v23 = vpop.permute.xlu1 %611  ;;  %v1966_v29 = vmul.f32 %v6523_v16, %v4731_v0 }
 0x1e2   : > { %6527 = vst [vmem:[#allocation31_spill] sm:$0xff] %v4725_v23  ;;  %v4733_v21 = vpop.permute.xlu0 %613  ;;  %v6544_v23 = vld [vmem:[#allocation46_spill] sm:$0xff] }
 0x1e3   : > { %6528 = vst [vmem:[#allocation88_spill] sm:$0xff] %v4733_v21 }
 0x1e4   : > { %1601 = vrot.lane.b32.xlu1 %v1568_v26, %s3558_s24  ;;  %1595 = vrot.lane.b32.xlu0 %v1565_v10, %s3558_s24  ;;  %v6533_v26 = vld [vmem:[#allocation9_spill] sm:$0xff] }
 0x1e5   : > { %v4743_v42 = vpop.permute.xlu1 %615  ;;  %v826_v10 = vmul.f32 %v6533_v26, %v4220_v33  ;;  %v827_v16 = vmul.f32 %v6533_v26, %v4242_v12  ;;  %v6540_v12 = vld [vmem:[#allocation33_spill] sm:$0xff] }
 0x1e6   : > { %6529 = vst [vmem:[#allocation89_spill] sm:$0xff] %v4743_v42  ;;  %v4745_v32 = vpop.permute.xlu0 %617  ;;  %v825_v42 = vmul.f32 %v6533_v26, %v4228_v15  ;;  %v1249_v26 = vmul.f32 %v6540_v12, %v4270_v36 }
 0x1e7   : > { %6530 = vst [vmem:[#allocation90_spill] sm:$0xff] %v4745_v32 }
 0x1e8   : > { %1996 = vrot.lane.b32.xlu1 %v1969_v13, %s3560_s26  ;;  %1990 = vrot.lane.b32.xlu0 %v1966_v29, %s3560_s26  ;;  %v6535_v13 = vld [vmem:[#allocation32_spill] sm:$0xff] }
 0x1e9   : > { %v4753_v31 = vpop.permute.xlu1 %619  ;;  %v828_v29 = vmul.f32 %v6535_v13, %v4234_v55  ;;  %v829_v15 = vmul.f32 %v6535_v13, %v4250_v57 }
 0x1ea   : > { %6531 = vst [vmem:[#allocation91_spill] sm:$0xff] %v4753_v31  ;;  %v4755_v2 = vpop.permute.xlu0 %1167 }
 0x1eb   : > { %6532 = vst [vmem:[#allocation92_spill] sm:$0xff] %v4755_v2 }
 0x1ec   : > { %857 = vrot.lane.b32.xlu1 %v826_v10, %s3555_s21  ;;  %855 = vrot.lane.b32.xlu0 %v825_v42, %s3555_s21  ;;  %v830_v42 = vmul.f32 %v6535_v13, %v4260_v48  ;;  %v6542_v13 = vld [vmem:[#allocation45_spill] sm:$0xff] }
 0x1ed   : > { %v4763_v28 = vpop.permute.xlu1 %1169 }
 0x1ee   : > { %6534 = vst [vmem:[#allocation9_spill] sm:$0xff] %v4763_v28  ;;  %v4769_v32 = vpop.permute.xlu0 %1171 }
 0x1ef   : > { %6536 = vst [vmem:[#allocation32_spill] sm:$0xff] %v4769_v32 }
 0x1f0   : > { %861 = vrot.lane.b32.xlu1 %v828_v29, %s3555_s21  ;;  %859 = vrot.lane.b32.xlu0 %v827_v16, %s3555_s21  ;;  %v6541_v16 = vld [vmem:[#allocation43_spill] sm:$0xff] }
 0x1f1   : > { %v4773_v33 = vpop.permute.xlu1 %1173  ;;  %v1250_v29 = vmul.f32 %v6540_v12, %v6541_v16  ;;  %v6545_v16 = vld [vmem:[#allocation34_spill] sm:$0xff] }
 0x1f2   : > { %6537 = vst [vmem:[#allocation93_spill] sm:$0xff] %v4773_v33  ;;  %v4779_v10 = vpop.permute.xlu0 %1175 }
 0x1f3   : > { %6538 = vst [vmem:[#allocation94_spill] sm:$0xff] %v4779_v10 }
 0x1f4   : > { %865 = vrot.lane.b32.xlu1 %v830_v42, %s3555_s21  ;;  %863 = vrot.lane.b32.xlu0 %v829_v15, %s3555_s21  ;;  %v6543_v15 = vld [vmem:[#allocation12_spill] sm:$0xff] }
 0x1f5   : > { %v4783_v55 = vpop.permute.xlu1 %1177  ;;  %v1253_v42 = vmul.f32 %v6543_v15, %v6542_v13  ;;  %v1252_v21 = vmul.f32 %v6543_v15, %v6544_v23  ;;  %v6546_v23 = vld [vmem:[#allocation37_spill] sm:$0xff]  ;;  %v1251_v2 = vmul.f32 %v6543_v15, %v4308_v38 }
 0x1f6   : > { %6539 = vst [vmem:[#allocation95_spill] sm:$0xff] %v4783_v55  ;;  %v4789_v31 = vpop.permute.xlu0 %1585 }
 0x1f8   : > { %1276 = vrot.lane.b32.xlu1 %v1250_v29, %s3557_s23  ;;  %1274 = vrot.lane.b32.xlu0 %v1249_v26, %s3557_s23  ;;  %v1759_v29 = vmul.f32 %v6545_v16, %v4023_v22  ;;  %v1760_v26 = vmul.f32 %v6545_v16, %v4136_v46 }
 0x1f9   : > { %v4793_v57 = vpop.permute.xlu1 %1587 }
 0x1fa   : > { %v4795_v48 = vpop.permute.xlu0 %1591 }
 0x1fc   : > { %1282 = vrot.lane.b32.xlu1 %v1253_v42, %s3557_s23  ;;  %1280 = vrot.lane.b32.xlu0 %v1252_v21, %s3557_s23  ;;  %v1762_v42 = vmul.f32 %v6546_v23, %v4051_v62  ;;  %v1763_v21 = vmul.f32 %v6546_v23, %v4150_v18 }
 0x1fd   : > { %v4803_v36 = vpop.permute.xlu1 %1593 }
 0x1fe   : > { %v4809_v33 = vpop.permute.xlu0 %1583 }
 0x200   : > { %1792 = vrot.lane.b32.xlu1 %v1760_v26, %s3559_s25  ;;  %1790 = vrot.lane.b32.xlu0 %v1759_v29, %s3559_s25  ;;  %v1248_v26 = vmul.f32 %v6540_v12, %v4300_v58 }
 0x201   : > { %v4813_v13 = vpop.permute.xlu1 %1589 }
 0x202   : > { %v4819_v10 = vpop.permute.xlu0 %456 }
 0x204   : > { %1798 = vrot.lane.b32.xlu1 %v1763_v21, %s3559_s25  ;;  %1796 = vrot.lane.b32.xlu0 %v1762_v42, %s3559_s25  ;;  %v1758_v21 = vmul.f32 %v6545_v16, %v4029_v34  ;;  %v1761_v42 = vmul.f32 %v6546_v23, %v4048_v5 }
 0x205   : > { %v4823_v55 = vpop.permute.xlu1 %458 }
 0x206   : > { %v4827_v29 = vpop.permute.xlu0 %460 }
 0x207   : > { %6547 = vst [vmem:[#allocation33_spill] sm:$0xff] %v4827_v29  ;;  %v6615_v29 = vld [vmem:[#allocation55_spill] sm:$0xff] }
 0x208   : > { %1278 = vrot.lane.b32.xlu1 %v1251_v2, %s3557_s23  ;;  %1272 = vrot.lane.b32.xlu0 %v1248_v26, %s3557_s23  ;;  %v6552_v2 = vld [vmem:[#allocation11_spill] sm:$0xff] }
 0x209   : > { %v4833_v28 = vpop.permute.xlu1 %462  ;;  %v1041_v12 = vmul.f32 %v6552_v2, %v4342_v19  ;;  %v1040_v15 = vmul.f32 %v6552_v2, %v4346_v37  ;;  %v1042_v23 = vmul.f32 %v6552_v2, %v4362_v51  ;;  %v6554_v26 = vld [vmem:[#allocation39_spill] sm:$0xff]  ;;  %v6557_v37 = vld [vmem:[#allocation53_spill] sm:$0xff]  ;;  %v6562_v2 = vld [vmem:[#allocation40_spill] sm:$0xff] }
 0x20a   : > { %6548 = vst [vmem:[#allocation43_spill] sm:$0xff] %v4833_v28  ;;  %v4839_v32 = vpop.permute.xlu0 %843 }
 0x20b   : > { %6549 = vst [vmem:[#allocation45_spill] sm:$0xff] %v4839_v32 }
 0x20c   : > { %1794 = vrot.lane.b32.xlu1 %v1761_v42, %s3559_s25  ;;  %1788 = vrot.lane.b32.xlu0 %v1758_v21, %s3559_s25  ;;  %v1043_v21 = vmul.f32 %v6554_v26, %v4358_v61  ;;  %v6561_v61 = vld [vmem:[#allocation56_spill] sm:$0xff] }
 0x20d   : > { %v4843_v58 = vpop.permute.xlu1 %845 }
 0x20e   : > { %6550 = vst [vmem:[#allocation12_spill] sm:$0xff] %v4843_v58  ;;  %v4845_v38 = vpop.permute.xlu0 %847 }
 0x20f   : > { %6551 = vst [vmem:[#allocation46_spill] sm:$0xff] %v4845_v38  ;;  %v6568_v38 = vld [vmem:[#allocation60_spill] sm:$0xff] }
 0x210   : > { %1072 = vrot.lane.b32.xlu1 %v1041_v12, %s3556_s22  ;;  %1070 = vrot.lane.b32.xlu0 %v1040_v15, %s3556_s22  ;;  %v1044_v12 = vmul.f32 %v6554_v26, %v6557_v37  ;;  %v6558_v15 = vld [vmem:[#allocation54_spill] sm:$0xff]  ;;  %v6566_v37 = vld [vmem:[#allocation61_spill] sm:$0xff] }
 0x211   : > { %v4853_v16 = vpop.permute.xlu1 %849 }
 0x212   : > { %6553 = vst [vmem:[#allocation34_spill] sm:$0xff] %v4853_v16  ;;  %v4859_v42 = vpop.permute.xlu0 %851  ;;  %v1045_v16 = vmul.f32 %v6554_v26, %v6558_v15 }
 0x213   : > { %6555 = vst [vmem:[#allocation37_spill] sm:$0xff] %v4859_v42 }
 0x214   : > { %1076 = vrot.lane.b32.xlu1 %v1043_v21, %s3556_s22  ;;  %1074 = vrot.lane.b32.xlu0 %v1042_v23, %s3556_s22  ;;  %v1463_v21 = vmul.f32 %v6562_v2, %v6561_v61  ;;  %v6563_v23 = vld [vmem:[#allocation57_spill] sm:$0xff]  ;;  %v4893_v61 = vmul.f32 %v4222_v30, %v4136_v46 }
 0x215   : > { %v4863_v19 = vpop.permute.xlu1 %853  ;;  %v1464_v42 = vmul.f32 %v6562_v2, %v6563_v23  ;;  %v4897_v23 = vmul.f32 %v4663_v52, %v4023_v22  ;;  %v4915_v22 = vmul.f32 %v4222_v30, %v4150_v18 }
 0x216   : > { %6556 = vst [vmem:[#allocation11_spill] sm:$0xff] %v4863_v19  ;;  %v4869_v58 = vpop.permute.xlu0 %1383 }
 0x217   : > { %6559 = vst [vmem:[#allocation39_spill] sm:$0xff] %v4869_v58 }
 0x218   : > { %1080 = vrot.lane.b32.xlu1 %v1045_v16, %s3556_s22  ;;  %1078 = vrot.lane.b32.xlu0 %v1044_v12, %s3556_s22  ;;  %v6567_v16 = vld [vmem:[#allocation15_spill] sm:$0xff]  ;;  %s3181_s22 = sshll.u32 %s3630_s9, 10 }
 0x219   : > { %v4873_v51 = vpop.permute.xlu1 %1385  ;;  %v1467_v15 = vmul.f32 %v6567_v16, %v6566_v37  ;;  %v1466_v32 = vmul.f32 %v6567_v16, %v6568_v38  ;;  %v6569_v38 = vld [vmem:[#allocation17_spill] sm:$0xff]  ;;  %v1465_v58 = vmul.f32 %v6567_v16, %v4435_v45 }
 0x21a   : > { %6560 = vst [vmem:[#allocation53_spill] sm:$0xff] %v4873_v51  ;;  %v4879_v19 = vpop.permute.xlu0 %1389  ;;  %v1974_v46 = vmul.f32 %v6569_v38, %v4893_v61  ;;  %v4939_v51 = vmul.f32 %v4210_v43, %v4029_v34  ;;  %v6575_v34 = vld [vmem:[#allocation42_spill] sm:$0xff] }
 0x21b   : > { %6564 = vst [vmem:[#allocation54_spill] sm:$0xff] %v4879_v19  ;;  %v1973_v19 = vmul.f32 %v6569_v38, %v4897_v23 }
 0x21c   : > { %1490 = vrot.lane.b32.xlu1 %v1464_v42, %s3558_s24  ;;  %1488 = vrot.lane.b32.xlu0 %v1463_v21, %s3558_s24  ;;  %v4905_v21 = vmul.f32 %v4663_v52, %v4051_v62  ;;  %v6570_v62 = vld [vmem:[#allocation41_spill] sm:$0xff]  ;;  %v1972_v45 = vmul.f32 %v6569_v38, %v4939_v51 }
 0x21d   : > { %v4883_v26 = vpop.permute.xlu1 %1391 }
 0x21e   : > { %6565 = vst [vmem:[#allocation56_spill] sm:$0xff] %v4883_v26  ;;  %v4887_v12 = vpop.permute.xlu0 %1778  ;;  %v1976_v52 = vmul.f32 %v6570_v62, %v4905_v21 }
 0x220   : > { %1496 = vrot.lane.b32.xlu1 %v1467_v15, %s3558_s24  ;;  %1494 = vrot.lane.b32.xlu0 %v1466_v32, %s3558_s24  ;;  %v1977_v15 = vmul.f32 %v6570_v62, %v4915_v22 }
 0x221   : > { %v4901_v42 = vpop.permute.xlu1 %1780 }
 0x222   : > { %v4907_v37 = vpop.permute.xlu0 %1784 }
 0x224   : > { %2006 = vrot.lane.b32.xlu1 %v1974_v46, %s3560_s26  ;;  %2004 = vrot.lane.b32.xlu0 %v1973_v19, %s3560_s26  ;;  %v1462_v46 = vmul.f32 %v6562_v2, %v4427_v7 }
 0x225   : > { %v4919_v32 = vpop.permute.xlu1 %1786 }
 0x226   : > { %v4925_v26 = vpop.permute.xlu0 %1381 }
 0x227   : > { %6571 = vst [vmem:[#allocation40_spill] sm:$0xff] %v4925_v26  ;;  %v4943_v26 = vmul.f32 %v4210_v43, %v4048_v5  ;;  %v1255_v43 = vmul.f32 %v6575_v34, %v4493_v9 }
 0x228   : > { %2012 = vrot.lane.b32.xlu1 %v1977_v15, %s3560_s26  ;;  %2010 = vrot.lane.b32.xlu0 %v1976_v52, %s3560_s26  ;;  %v6579_v15 = vld [vmem:[#allocation13_spill] sm:$0xff] }
 0x229   : > { %v4929_v30 = vpop.permute.xlu1 %1387  ;;  %v1975_v7 = vmul.f32 %v6570_v62, %v4943_v26  ;;  %v1258_v9 = vmul.f32 %v6579_v15, %v4509_v54 }
 0x22a   : > { %6572 = vst [vmem:[#allocation57_spill] sm:$0xff] %v4929_v30  ;;  %v4933_v19 = vpop.permute.xlu0 %1776 }
 0x22c   : > { %1492 = vrot.lane.b32.xlu1 %v1465_v58, %s3558_s24  ;;  %1486 = vrot.lane.b32.xlu0 %v1462_v46, %s3558_s24  ;;  %v1256_v58 = vmul.f32 %v6575_v34, %v4497_v60  ;;  %v1259_v46 = vmul.f32 %v6579_v15, %v4519_v47  ;;  %v4993_v47 = vld [vmem:[%s3937_s18 + $0x20] sm:$0xff] }
 0x22d   : > { %v4947_v52 = vpop.permute.xlu1 %1782  ;;  %6585 = vst [vmem:[#allocation97_spill] sm:$0xff] %v4993_v47 }
 0x22e   : > { %v4951_v2 = vpop.permute.xlu0 %621 }
 0x22f   : > { %6573 = vst [vmem:[#allocation61_spill] sm:$0xff] %v4951_v2  ;;  %v6619_v2 = vld [vmem:[#allocation63_spill] sm:$0xff] }
 0x230   : > { %2008 = vrot.lane.b32.xlu1 %v1975_v7, %s3560_s26  ;;  %2002 = vrot.lane.b32.xlu0 %v1972_v45, %s3560_s26  ;;  %v4980_v7 = vld [vmem:[%s3937_s18 + $0x8] sm:$0xff]  ;;  %v6582_v45 = vld [vmem:[#allocation44_spill] sm:$0xff] }
 0x231   : > { %v4957_v5 = vpop.permute.xlu1 %623  ;;  %6581 = vst [vmem:[#allocation13_spill] sm:$0xff] %v4980_v7 }
 0x232   : > { %6574 = vst [vmem:[#allocation15_spill] sm:$0xff] %v4957_v5  ;;  %v4963_v16 = vpop.permute.xlu0 %625 }
 0x233   : > { %6576 = vst [vmem:[#allocation60_spill] sm:$0xff] %v4963_v16  ;;  %v6618_v16 = vld [vmem:[#allocation59_spill] sm:$0xff] }
 0x234   : > { %1288 = vrot.lane.b32.xlu1 %v1256_v58, %s3557_s23  ;;  %1286 = vrot.lane.b32.xlu0 %v1255_v43, %s3557_s23  ;;  %v1656_v43 = vmul.f32 %v4980_v7, %v6582_v45  ;;  %v1657_v58 = vmul.f32 %v6582_v45, %v4014_v6 }
 0x235   : > { %v4967_v38 = vpop.permute.xlu1 %627 }
 0x236   : > { %6577 = vst [vmem:[#allocation17_spill] sm:$0xff] %v4967_v38  ;;  %v4969_v62 = vpop.permute.xlu0 %629 }
 0x237   : > { %6578 = vst [vmem:[#allocation41_spill] sm:$0xff] %v4969_v62  ;;  %v6614_v62 = vld [vmem:[#allocation58_spill] sm:$0xff] }
 0x238   : > { %1294 = vrot.lane.b32.xlu1 %v1259_v46, %s3557_s23  ;;  %1292 = vrot.lane.b32.xlu0 %v1258_v9, %s3557_s23  ;;  %v6586_v46 = vld [vmem:[#allocation47_spill] sm:$0xff]  ;;  %v541_v28 = vsel %vm464_vm5, %v6615_v29, %v6614_v62 }
 0x239   : > { %v4977_v60 = vpop.permute.xlu1 %631  ;;  %v1659_v9 = vmul.f32 %v4993_v47, %v6586_v46 }
 0x23a   : > { %6580 = vst [vmem:[#allocation42_spill] sm:$0xff] %v4977_v60  ;;  %v4986_v30 = vpop.permute.xlu0 %1058  ;;  %v1660_v60 = vmul.f32 %v6586_v46, %v4026_v24 }
 0x23b   : > { %6583 = vst [vmem:[#allocation44_spill] sm:$0xff] %v4986_v30  ;;  %v6608_v30 = vld [vmem:[#allocation50_spill] sm:$0xff] }
 0x23c   : > { %1683 = vrot.lane.b32.xlu1 %v1657_v58, %s3559_s25  ;;  %1681 = vrot.lane.b32.xlu0 %v1656_v43, %s3559_s25  ;;  %v1254_v43 = vmul.f32 %v6575_v34, %v4551_v25 }
 0x23d   : > { %v4990_v54 = vpop.permute.xlu1 %1060 }
 0x23e   : > { %6584 = vst [vmem:[#allocation96_spill] sm:$0xff] %v4990_v54  ;;  %v4999_v38 = vpop.permute.xlu0 %1062  ;;  %v1257_v54 = vmul.f32 %v6579_v15, %v4557_v44  ;;  %v6595_v15 = vld [vmem:[#allocation16_spill] sm:$0xff] }
 0x23f   : > { %6587 = vst [vmem:[#allocation47_spill] sm:$0xff] %v4999_v38  ;;  %v5016_v38 = vld [vmem:[%s3937_s18] sm:$0xff] }
 0x240   : > { %1689 = vrot.lane.b32.xlu1 %v1660_v60, %s3559_s25  ;;  %1687 = vrot.lane.b32.xlu0 %v1659_v9, %s3559_s25  ;;  %6591 = vst [vmem:[#allocation101_spill] sm:$0xff] %v5016_v38  ;;  %v1655_v60 = vmul.f32 %v5016_v38, %v6582_v45  ;;  %v5021_v9 = vld [vmem:[%s3937_s18 + $0x18] sm:$0xff]  ;;  %v1469_v45 = vmul.f32 %v6595_v15, %v4639_v41  ;;  %v6599_v41 = vld [vmem:[#allocation49_spill] sm:$0xff] }
 0x241   : > { %v5003_v6 = vpop.permute.xlu1 %1064  ;;  %6592 = vst [vmem:[#allocation102_spill] sm:$0xff] %v5021_v9  ;;  %v1658_v25 = vmul.f32 %v5021_v9, %v6586_v46 }
 0x242   : > { %6588 = vst [vmem:[#allocation98_spill] sm:$0xff] %v5003_v6  ;;  %v5007_v58 = vpop.permute.xlu0 %1066 }
 0x243   : > { %6589 = vst [vmem:[#allocation99_spill] sm:$0xff] %v5007_v58 }
 0x244   : > { %1290 = vrot.lane.b32.xlu1 %v1257_v54, %s3557_s23  ;;  %1284 = vrot.lane.b32.xlu0 %v1254_v43, %s3557_s23  ;;  %v1470_v54 = vmul.f32 %v6595_v15, %v4645_v39 }
 0x245   : > { %v5013_v24 = vpop.permute.xlu1 %1068 }
 0x246   : > { %6590 = vst [vmem:[#allocation100_spill] sm:$0xff] %v5013_v24  ;;  %v5025_v34 = vpop.permute.xlu0 %1597 }
 0x247   : > { %6593 = vst [vmem:[#allocation103_spill] sm:$0xff] %v5025_v34 }
 0x248   : > { %1685 = vrot.lane.b32.xlu1 %v1658_v25, %s3559_s25  ;;  %1679 = vrot.lane.b32.xlu0 %v1655_v60, %s3559_s25  ;;  %v6598_v25 = vld [vmem:[#allocation48_spill] sm:$0xff] }
 0x249   : > { %v5029_v44 = vpop.permute.xlu1 %1599  ;;  %v1472_v6 = vmul.f32 %v6598_v25, %v4657_v3  ;;  %v1473_v60 = vmul.f32 %v6598_v25, %v4667_v20 }
 0x24a   : > { %6594 = vst [vmem:[#allocation104_spill] sm:$0xff] %v5029_v44  ;;  %v5033_v43 = vpop.permute.xlu0 %1603  ;;  %v5142_v44 = vld [vmem:[%s3937_s18 + $0x50] sm:$0xff] }
 0x24b   : > { %6596 = vst [vmem:[#allocation16_spill] sm:$0xff] %v5033_v43  ;;  %v5137_v43 = vld [vmem:[%s3937_s18 + $0x48] sm:$0xff]  ;;  %6612 = vst [vmem:[#allocation50_spill] sm:$0xff] %v5142_v44 }
 0x24c   : > { %1502 = vrot.lane.b32.xlu1 %v1470_v54, %s3558_s24  ;;  %1500 = vrot.lane.b32.xlu0 %v1469_v45, %s3558_s24  ;;  %v1870_v54 = vmul.f32 %v6599_v41, %v4677_v59  ;;  %v1871_v45 = vmul.f32 %v6599_v41, %v4681_v27 }
 0x24d   : > { %v5039_v46 = vpop.permute.xlu1 %1605 }
 0x24e   : > { %6597 = vst [vmem:[#allocation105_spill] sm:$0xff] %v5039_v46  ;;  %v5045_v58 = vpop.permute.xlu0 %1992  ;;  %v6611_v46 = vld [vmem:[#allocation51_spill] sm:$0xff] }
 0x24f   : > { %v1664_v34 = vmul.f32 %v5137_v43, %v6611_v46 }
 0x250   : > { %1508 = vrot.lane.b32.xlu1 %v1473_v60, %s3558_s24  ;;  %1506 = vrot.lane.b32.xlu0 %v1472_v6, %s3558_s24  ;;  %v6601_v6 = vld [vmem:[#allocation18_spill] sm:$0xff] }
 0x251   : > { %v5049_v39 = vpop.permute.xlu1 %1994  ;;  %v1874_v60 = vmul.f32 %v6601_v6, %v4699_v1  ;;  %v1873_v59 = vmul.f32 %v6601_v6, %v4703_v56  ;;  %v6603_v1 = vld [vmem:[#allocation7_spill] sm:$0xff] }
 0x252   : > { %v5055_v24 = vpop.permute.xlu0 %1998  ;;  %v381_v56 = vmul.f32 %v4993_v47, %v6603_v1 }
 0x254   : > { %1897 = vrot.lane.b32.xlu1 %v1871_v45, %s3560_s26  ;;  %1895 = vrot.lane.b32.xlu0 %v1870_v54, %s3560_s26  ;;  %v1471_v54 = vmul.f32 %v6598_v25, %v4711_v49  ;;  %v5084_v49 = vld [vmem:[%s3937_s18 + $0x28] sm:$0xff] }
 0x255   : > { %v5059_v3 = vpop.permute.xlu1 %2000  ;;  %6604 = vst [vmem:[#allocation18_spill] sm:$0xff] %v5084_v49  ;;  %v382_v25 = vmul.f32 %v5084_v49, %v6603_v1  ;;  %v6607_v49 = vld [vmem:[#allocation19_spill] sm:$0xff] }
 0x256   : > { %v5061_v20 = vpop.permute.xlu0 %1595  ;;  %6610 = vst [vmem:[#allocation19_spill] sm:$0xff] %v5137_v43 }
 0x257   : > { %6600 = vst [vmem:[#allocation48_spill] sm:$0xff] %v5061_v20  ;;  %v1468_v20 = vmul.f32 %v6595_v15, %v4721_v40  ;;  %v6605_v40 = vld [vmem:[#allocation22_spill] sm:$0xff] }
 0x258   : > { %1903 = vrot.lane.b32.xlu1 %v1874_v60, %s3560_s26  ;;  %1901 = vrot.lane.b32.xlu0 %v1873_v59, %s3560_s26  ;;  %v380_v60 = vmul.f32 %v5021_v9, %v6603_v1  ;;  %v378_v15 = vmul.f32 %v4980_v7, %v6605_v40  ;;  %v1872_v9 = vmul.f32 %v6601_v6, %v4739_v8  ;;  %v5114_v7 = vld [vmem:[%s3937_s18 + $0x30] sm:$0xff]  ;;  %v5121_v6 = vld [vmem:[%s3937_s18 + $0x38] sm:$0xff] }
 0x259   : > { %v5069_v27 = vpop.permute.xlu1 %1601  ;;  %v5118_v8 = vmul.f32 %v5114_v7, %v6608_v30 }
 0x25a   : > { %6602 = vst [vmem:[#allocation49_spill] sm:$0xff] %v5069_v27  ;;  %v5073_v45 = vpop.permute.xlu0 %1990  ;;  %v5101_v27 = vld [vmem:[%s3937_s18 + $0x10] sm:$0xff] }
 0x25b   : > { %6606 = vst [vmem:[#allocation7_spill] sm:$0xff] %v5101_v27  ;;  %v379_v1 = vmul.f32 %v5101_v27, %v6605_v40 }
 0x25c   : > { %1504 = vrot.lane.b32.xlu1 %v1471_v54, %s3558_s24  ;;  %1498 = vrot.lane.b32.xlu0 %v1468_v20, %s3558_s24  ;;  %v1869_v20 = vmul.f32 %v6599_v41, %v4731_v0  ;;  %v377_v54 = vmul.f32 %v5016_v38, %v6605_v40  ;;  %v5107_v0 = vmul.f32 %v6607_v49, %v4893_v61  ;;  %v5132_v61 = vld [vmem:[%s3937_s18 + $0x40] sm:$0xff] }
 0x25d   : > { %v5088_v59 = vpop.permute.xlu1 %1996  ;;  %v5111_v41 = vmul.f32 %v6607_v49, %v4939_v51  ;;  %v1662_v40 = vmul.f32 %v5121_v6, %v6608_v30  ;;  %v5129_v51 = vmul.f32 %v6607_v49, %v4897_v23  ;;  %6609 = vst [vmem:[#allocation22_spill] sm:$0xff] %v5132_v61  ;;  %v1663_v27 = vmul.f32 %v5132_v61, %v6608_v30  ;;  %v6613_v49 = vld [vmem:[#allocation52_spill] sm:$0xff] }
 0x25e   : > { %v5096_v47 = vpop.permute.xlu0 %855  ;;  %v5150_v38 = vmul.f32 %v6613_v49, %v4943_v26  ;;  %v5154_v30 = vmul.f32 %v6613_v49, %v4905_v21  ;;  %v557_v26 = vadd.f32 %v6615_v29, %v377_v54  ;;  %v559_v61 = vadd.f32 %v6614_v62, %v379_v1 }
 0x25f   : > { %v558_v29 = vadd.f32 %v541_v28, %v378_v15  ;;  %v560_v54 = vadd.f32 %v6618_v16, %v380_v60  ;;  %v732_v62 = vsel %vm633_vm1, %v4449_v53, %v4453_v35  ;;  %v6620_v15 = vld [vmem:[#allocation70_spill] sm:$0xff] }
 0x260   : > { %1899 = vrot.lane.b32.xlu1 %v1872_v9, %s3560_s26  ;;  %1893 = vrot.lane.b32.xlu0 %v1869_v20, %s3560_s26  ;;  %v1665_v9 = vmul.f32 %v5142_v44, %v6611_v46  ;;  %v1666_v20 = vmul.f32 %v6611_v46, %v4150_v18  ;;  %v5165_v18 = vmul.f32 %v6613_v49, %v4915_v22  ;;  %v6617_v46 = vld [vmem:[#allocation62_spill] sm:$0xff] }
 0x261   : > { %v858_v23 = vpop.permute.xlu1 %857  ;;  %v542_v21 = vsel %vm464_vm5, %v6618_v16, %v6617_v46  ;;  %v731_v22 = vsel %vm633_vm1, %v4439_v63, %v4441_v4  ;;  %v750_v49 = vadd.f32 %v6619_v2, %v557_v26  ;;  %v964_v4 = vsel %vm867_vm6, %v4481_v14, %v4487_v50 }
 0x262   : > { %v5161_v43 = vsel %vm867_vm6, %v5096_v47, %v858_v23  ;;  %v860_v44 = vpop.permute.xlu0 %859  ;;  %v753_v60 = vadd.f32 %v4449_v53, %v560_v54  ;;  %v6627_v54 = vld [vmem:[#allocation26_spill] sm:$0xff] }
 0x263   : > { %6616 = vst [vmem:[#allocation51_spill] sm:$0xff] %v5161_v43  ;;  %v5172_v5 = vsel %vm867_vm6, %v858_v23, %v860_v44  ;;  %v730_v43 = vsel %vm633_vm1, %v6619_v2, %v4439_v63  ;;  %v562_v44 = vadd.f32 %v6617_v46, %v382_v25  ;;  %v561_v23 = vadd.f32 %v542_v21, %v381_v56  ;;  %v6623_v21 = vld [vmem:[#allocation76_spill] sm:$0xff] }
 0x264   : > { %1695 = vrot.lane.b32.xlu1 %v1663_v27, %s3559_s25  ;;  %1693 = vrot.lane.b32.xlu0 %v1662_v40, %s3559_s25  ;;  %v733_v63 = vsel %vm633_vm1, %v4453_v35, %v4457_v11  ;;  %v751_v16 = vadd.f32 %v730_v43, %v558_v29  ;;  %v752_v27 = vadd.f32 %v731_v22, %v559_v61  ;;  %v6621_v35 = vld [vmem:[#allocation69_spill] sm:$0xff]  ;;  %v6622_v61 = vld [vmem:[#allocation68_spill] sm:$0xff] }
 0x265   : > { %v5188_v1 = vpop.permute.xlu1 %861  ;;  %v754_v56 = vadd.f32 %v732_v62, %v561_v23  ;;  %v965_v2 = vsel %vm867_vm6, %v4487_v50, %v4499_v17  ;;  %v967_v11 = vsel %vm867_vm6, %v6621_v35, %v6620_v15  ;;  %v755_v43 = vadd.f32 %v733_v63, %v562_v44  ;;  %v6624_v50 = vld [vmem:[#allocation75_spill] sm:$0xff]  ;;  %v6625_v22 = vld [vmem:[#allocation77_spill] sm:$0xff]  ;;  %v6628_v63 = vld [vmem:[#allocation78_spill] sm:$0xff] }
 0x266   : > { %v864_v28 = vpop.permute.xlu0 %863  ;;  %v984_v53 = vadd.f32 %v4481_v14, %v750_v49  ;;  %v985_v40 = vadd.f32 %v964_v4, %v751_v16  ;;  %v966_v26 = vsel %vm867_vm6, %v6622_v61, %v6621_v35  ;;  %v1179_v17 = vsel %vm1082_vm7, %v6624_v50, %v6623_v21  ;;  %v6629_v35 = vld [vmem:[#allocation84_spill] sm:$0xff] }
 0x267   : > { %v5200_v25 = vsel %vm867_vm6, %v5188_v1, %v864_v28  ;;  %v1180_v29 = vsel %vm1082_vm7, %v6623_v21, %v6625_v22  ;;  %v986_v62 = vadd.f32 %v965_v2, %v752_v27  ;;  %v987_v23 = vadd.f32 %v6622_v61, %v753_v60  ;;  %v6630_v21 = vld [vmem:[#allocation29_spill] sm:$0xff] }
 0x268   : > { %1701 = vrot.lane.b32.xlu1 %v1666_v20, %s3559_s25  ;;  %1699 = vrot.lane.b32.xlu0 %v1665_v9, %s3559_s25  ;;  %v6626_v20 = vld [vmem:[#allocation79_spill] sm:$0xff]  ;;  %v989_v49 = vadd.f32 %v967_v11, %v755_v43  ;;  %v1181_v4 = vsel %vm1082_vm7, %v6628_v63, %v6627_v54  ;;  %v988_v16 = vadd.f32 %v966_v26, %v754_v56  ;;  %v6631_v2 = vld [vmem:[#allocation85_spill] sm:$0xff]  ;;  %v6632_v11 = vld [vmem:[#allocation14_spill] sm:$0xff] }
 0x269   : > { %v866_v46 = vpop.permute.xlu1 %865  ;;  %v1182_v9 = vsel %vm1082_vm7, %v6627_v54, %v6626_v20  ;;  %v1199_v15 = vadd.f32 %v6624_v50, %v984_v53  ;;  %v1394_v22 = vsel %vm1296_vm8, %v6630_v21, %v6629_v35  ;;  %v1201_v27 = vadd.f32 %v1180_v29, %v986_v62  ;;  %v6633_v20 = vld [vmem:[#allocation86_spill] sm:$0xff] }
 0x26a   : > { %v5224_v14 = vsel %vm867_vm6, %v864_v28, %v866_v46  ;;  %v5226_v44 = vpop.permute.xlu0 %1274  ;;  %v1200_v28 = vadd.f32 %v1179_v17, %v985_v40  ;;  %v1204_v60 = vadd.f32 %v1182_v9, %v989_v49  ;;  %v1396_v43 = vsel %vm1296_vm8, %v6632_v11, %v6631_v2  ;;  %v6634_v9 = vld [vmem:[#allocation30_spill] sm:$0xff] }
 0x26b   : > { %v1202_v53 = vadd.f32 %v6628_v63, %v987_v23  ;;  %v1203_v61 = vadd.f32 %v1181_v4, %v988_v16  ;;  %v1608_v26 = vsel %vm1510_vm9, %v4789_v31, %v4793_v57  ;;  %v1415_v46 = vadd.f32 %v6629_v35, %v1201_v27 }
 0x26c   : > { %1697 = vrot.lane.b32.xlu1 %v1664_v34, %s3559_s25  ;;  %1691 = vrot.lane.b32.xlu0 %v5118_v8, %s3559_s25  ;;  %v1414_v40 = vadd.f32 %v1394_v22, %v1200_v28  ;;  %v1418_v50 = vadd.f32 %v6631_v2, %v1204_v60  ;;  %v1610_v17 = vsel %vm1510_vm9, %v4795_v48, %v4803_v36 }
 0x26d   : > { %v5242_v56 = vpop.permute.xlu1 %1276  ;;  %v1417_v29 = vadd.f32 %v1396_v43, %v1203_v61  ;;  %v1393_v54 = vsel %vm1296_vm8, %v6633_v20, %v6630_v21  ;;  %v1395_v62 = vsel %vm1296_vm8, %v6634_v9, %v6632_v11  ;;  %v1629_v49 = vadd.f32 %v4793_v57, %v1415_v46 }
 0x26e   : > { %v5251_v34 = vsel %vm1296_vm8, %v5226_v44, %v5242_v56  ;;  %v5253_v8 = vpop.permute.xlu0 %1280  ;;  %v1628_v23 = vadd.f32 %v1608_v26, %v1414_v40  ;;  %v1801_v63 = vsel %vm1703_vm10, %v4887_v12, %v4901_v42  ;;  %v1803_v4 = vsel %vm1703_vm10, %v4907_v37, %v4919_v32 }
 0x26f   : > { %v1631_v35 = vadd.f32 %v1610_v17, %v1417_v29  ;;  %v1632_v21 = vadd.f32 %v4803_v36, %v1418_v50  ;;  %v1416_v22 = vadd.f32 %v1395_v62, %v1202_v53  ;;  %v1822_v28 = vadd.f32 %v4901_v42, %v1629_v49  ;;  %v6637_v62 = vld [vmem:[#allocation22_spill] sm:$0xff]  ;;  %v6638_v49 = vld [vmem:[#allocation15_spill] sm:$0xff] }
 0x270   : > { %1909 = vrot.lane.b32.xlu1 %v5107_v0, %s3560_s26  ;;  %1907 = vrot.lane.b32.xlu0 %v5129_v51, %s3560_s26  ;;  %v1609_v0 = vsel %vm1510_vm9, %v4813_v13, %v4795_v48  ;;  %v2015_v27 = vsel %vm1917_vm11, %v5045_v58, %v5049_v39  ;;  %v2017_v36 = vsel %vm1917_vm11, %v5055_v24, %v5059_v3 }
 0x271   : > { %v5277_v16 = vpop.permute.xlu1 %1282  ;;  %v1821_v60 = vadd.f32 %v1801_v63, %v1628_v23  ;;  %v1824_v48 = vadd.f32 %v1803_v4, %v1631_v35  ;;  %v1825_v13 = vadd.f32 %v4919_v32, %v1632_v21  ;;  %v1413_v2 = vadd.f32 %v1393_v54, %v1199_v15  ;;  %v6636_v54 = vld [vmem:[#allocation61_spill] sm:$0xff]  ;;  %v6639_v4 = vld [vmem:[#allocation60_spill] sm:$0xff] }
 0x272   : > { %v5286_v57 = vsel %vm1296_vm8, %v5253_v8, %v5277_v16  ;;  %v5288_v51 = vpop.permute.xlu0 %1790  ;;  %v1607_v42 = vsel %vm1510_vm9, %v4809_v33, %v4789_v31  ;;  %v1630_v11 = vadd.f32 %v1609_v0, %v1416_v22  ;;  %v1802_v43 = vsel %vm1703_vm10, %v4947_v52, %v4907_v37  ;;  %v6640_v22 = vld [vmem:[#allocation6_spill] sm:$0xff] }
 0x273   : > { %v2035_v61 = vadd.f32 %v2015_v27, %v1821_v60  ;;  %v2036_v32 = vadd.f32 %v5049_v39, %v1822_v28  ;;  %v2038_v26 = vadd.f32 %v2017_v36, %v1824_v48  ;;  %v2016_v31 = vsel %vm1917_vm11, %v5088_v59, %v5055_v24  ;;  %v6635_v24 = vld [vmem:[#allocation5_spill] sm:$0xff]  ;;  %v6641_v28 = vld [vmem:[#allocation19_spill] sm:$0xff] }
 0x274   : > { %1915 = vrot.lane.b32.xlu1 %v5165_v18, %s3560_s26  ;;  %1913 = vrot.lane.b32.xlu0 %v5154_v30, %s3560_s26  ;;  %v2039_v18 = vadd.f32 %v5059_v3, %v1825_v13  ;;  %v1800_v30 = vsel %vm1703_vm10, %v4933_v19, %v4887_v12  ;;  %v1627_v33 = vadd.f32 %v1607_v42, %v1413_v2  ;;  %v6642_v60 = vld [vmem:[#allocation43_spill] sm:$0xff]  ;;  %v6643_v48 = vld [vmem:[#allocation33_spill] sm:$0xff] }
 0x275   : > { %v5308_v53 = vpop.permute.xlu1 %1792  ;;  %v1823_v37 = vadd.f32 %v1802_v43, %v1630_v11  ;;  %v2014_v52 = vsel %vm1917_vm11, %v5073_v45, %v5045_v58  ;;  %v3339_v12 = vpack.i.bf16 %v2036_v32, %v2035_v61  ;;  %v351_v59 = vmul.f32 %v5114_v7, %v6635_v24  ;;  %v6644_v11 = vld [vmem:[#allocation50_spill] sm:$0xff]  ;;  %v6645_v32 = vld [vmem:[#allocation41_spill] sm:$0xff] }
 0x276   : > { %v5312_v40 = vpop.permute.xlu0 %1796  ;;  %v1820_v3 = vadd.f32 %v1800_v30, %v1627_v33  ;;  %v3344_v19 = vpack.i.bf16 %v2039_v18, %v2038_v26  ;;  %v353_v23 = vmul.f32 %v6637_v62, %v6635_v24  ;;  %v638_v63 = vsel %vm633_vm1, %v6636_v54, %v6638_v49  ;;  %v6647_v18 = vld [vmem:[#allocation51_spill] sm:$0xff] }
 0x277   : > { %v2037_v15 = vadd.f32 %v2016_v31, %v1823_v37  ;;  %v487_v58 = vadd.f32 %v4819_v10, %v351_v59  ;;  %v354_v27 = vmul.f32 %v6641_v28, %v6640_v22  ;;  %v468_v13 = vsel %vm464_vm5, %v6643_v48, %v6642_v60 }
 0x278   : > { %1911 = vrot.lane.b32.xlu1 %v5150_v38, %s3560_s26  ;;  %1905 = vrot.lane.b32.xlu0 %v5111_v41, %s3560_s26  ;;  %v2034_v50 = vadd.f32 %v2014_v52, %v1820_v3  ;;  %v467_v41 = vsel %vm464_vm5, %v4819_v10, %v4823_v55  ;;  %v489_v0 = vadd.f32 %v4823_v55, %v353_v23  ;;  %v6646_v55 = vld [vmem:[#allocation17_spill] sm:$0xff]  ;;  %v6651_v23 = vld [vmem:[#allocation64_spill] sm:$0xff] }
 0x279   : > { %v5327_v39 = vpop.permute.xlu1 %1798  ;;  %v660_v9 = vadd.f32 %v6636_v54, %v487_v58  ;;  %v355_v43 = vmul.f32 %v6644_v11, %v6640_v22  ;;  %v640_v26 = vsel %vm633_vm1, %v6646_v55, %v6645_v32 }
 0x27a   : > { %v1273_v46 = vpop.permute.xlu0 %1272  ;;  %v3349_v17 = vpack.i.bf16 %v2037_v15, %v2034_v50  ;;  %v6648_v50 = vld [vmem:[#allocation42_spill] sm:$0xff] }
 0x27b   : > { %v5333_v38 = vsel %vm1296_vm8, %v1273_v46, %v5226_v44  ;;  %v352_v44 = vmul.f32 %v5121_v6, %v6635_v24  ;;  %v894_v35 = vadd.f32 %v5096_v47, %v660_v9  ;;  %v490_v47 = vadd.f32 %v6643_v48, %v354_v27  ;;  %v6650_v9 = vld [vmem:[#allocation65_spill] sm:$0xff] }
 0x27c   : > { %3340 = vrot.lane.b32.xlu0 %v3339_v12, %s3560_s26  ;;  %3345 = vrot.lane.b32.xlu1 %v3344_v19, %s3560_s26  ;;  %v491_v33 = vadd.f32 %v468_v13, %v355_v43  ;;  %v3475_v19 = vld [vmem:[%s3937_s18 + $0x58] sm:$0xff]  ;;  %v641_v58 = vsel %vm633_vm1, %v6645_v32, %v6648_v50  ;;  %v6656_v43 = vld [vmem:[#allocation10_spill] sm:$0xff]  ;;  %s296_s18 = sand.u32 1, %s3530_s28  }
 0x27d   : > { %v1279_v45 = vpop.permute.xlu1 %1278  ;;  %v488_v10 = vadd.f32 %v467_v41, %v352_v44  ;;  %v663_v37 = vadd.f32 %v6646_v55, %v490_v47  ;;  %v356_v15 = vmul.f32 %v3475_v19, %v6640_v22  ;;  %v6649_v44 = vld [vmem:[#allocation23_spill] sm:$0xff]  ;;  %v6657_v47 = vld [vmem:[#allocation36_spill] sm:$0xff]  ;;  %s3154_s20 = sshll.u32 %s296_s18, 6  ;;  %s6237_s9 = scalar_lea.sflag [#allocation3], %s296_s18 }
 0x27e   : > { %v5343_v29 = vsel %vm1296_vm8, %v1279_v45, %v5253_v8  ;;  %v5345_v20 = vpop.permute.xlu0 %1788  ;;  %v639_v8 = vsel %vm633_vm1, %v6638_v49, %v6639_v4  ;;  %v664_v59 = vadd.f32 %v640_v26, %v491_v33  ;;  %v385_v54 = vmul.f32 %v6637_v62, %v6649_v44  ;;  %v6654_v62 = vld [vmem:[#allocation24_spill] sm:$0xff]  ;;  %v6658_v26 = vld [vmem:[#allocation67_spill] sm:$0xff]  ;;  %s298_s21 = scalar_lea.vmem [#allocation2], %s3154_s20 }
 0x27f   : > { %v661_v2 = vadd.f32 %v638_v63, %v488_v10  ;;  %v662_v61 = vadd.f32 %v639_v8, %v489_v0  ;;  %v897_v45 = vadd.f32 %v5188_v1, %v663_v37  ;;  %v543_v49 = vsel %vm464_vm5, %v6651_v23, %v6650_v9  ;;  %v6652_v8 = vld [vmem:[#allocation25_spill] sm:$0xff]  ;;  %s3088_s23 = sshll.u32 %s298_s21, 4  ;;  %s6233_s23 = int_to_ptr.vmem [resolvable:$true] %s3088_s23 }
 0x280   : > { %3350 = vrot.lane.b32.xlu0 %v3349_v17, %s3560_s26  ;;  %v898_v63 = vadd.f32 %v5200_v25, %v664_v59  ;;  %v384_v1 = vmul.f32 %v5121_v6, %v6649_v44  ;;  %v6655_v25 = vld [vmem:[#allocation71_spill] sm:$0xff]  ;;  %v388_v6 = vmul.f32 %v3475_v19, %v6654_v62  ;;  %v6662_v19 = vld [vmem:[#allocation8_spill] sm:$0xff]  ;;  %s3476_s10 = scalar_lea.vmem %s6233_s23, 1024  ;;  %p3483_p0 = scmp.lt.s32.totalorder %s6233_s23, %s3481_s13 }
 0x281   : > { %v5360_v21 = vpop.permute.xlu1 %1794  ;;  %v895_v30 = vadd.f32 %v6647_v18, %v661_v2  ;;  %v896_v52 = vadd.f32 %v5172_v5, %v662_v61  ;;  %v492_v5 = vadd.f32 %v6642_v60, %v356_v15  ;;  %v565_v60 = vadd.f32 %v6650_v9, %v385_v54  ;;  %v6666_v54 = vld [vmem:[#allocation92_spill] sm:$0xff]  ;;  %p3477_p11 = scmp.ne.s32.totalorder %s6233_s23, %s3476_s10  ;;  %p3484_p1 = scmp.lt.s32.totalorder %s3482_s17, %s3476_s10 }
 0x282   : > { %v1071_v36 = vpop.permute.xlu0 %1070  ;;  %v564_v2 = vadd.f32 %v543_v49, %v384_v1  ;;  %v969_v61 = vsel %vm867_vm6, %v6657_v47, %v6656_v43  ;;  %v6672_v43 = vld [vmem:[#allocation53_spill] sm:$0xff] }
 0x283   : > { %v5368_v42 = vadd.f32 %v1071_v36, %v894_v35  ;;  %v6653_v35 = vld [vmem:[#allocation72_spill] sm:$0xff]  ;;  %v665_v22 = vadd.f32 %v641_v58, %v492_v5  ;;  %v568_v58 = vadd.f32 %v6658_v26, %v388_v6  ;;  %p3478_p12 = pnand %p3477_p11, %p3647_p5  ;;  %p3485_p2 = por %p3484_p1, %p3483_p0 }
 0x284   : > { %v735_v0 = vsel %vm633_vm1, %v6653_v35, %v6652_v8  ;;  %v734_v48 = vsel %vm633_vm1, %v6655_v25, %v6653_v35  ;;  %v6669_v35 = vld [vmem:[#allocation28_spill] sm:$0xff] }
 0x285   : > { %v1073_v31 = vpop.permute.xlu1 %1072  ;;  %v899_v32 = vadd.f32 %v5224_v14, %v665_v22  ;;  %v6663_v14 = vld [vmem:[#allocation32_spill] sm:$0xff]  ;;  %p3479_p13 = pneg %p3478_p12 }
 0x286   : > { %v1087_v3 = vsel %vm1082_vm7, %v1071_v36, %v1073_v31  ;;  %v1075_v12 = vpop.permute.xlu0 %1074  ;;  %v387_v36 = vmul.f32 %v6644_v11, %v6654_v62  ;;  %v6659_v11 = vld [vmem:[#allocation66_spill] sm:$0xff] }
 0x287   : > { %v5382_v46 = vadd.f32 %v1087_v3, %v895_v30  ;;  %v1088_v24 = vsel %vm1082_vm7, %v1073_v31, %v1075_v12  ;;  %v544_v18 = vsel %vm464_vm5, %v6659_v11, %v6658_v26  ;;  %v758_v30 = vadd.f32 %v735_v0, %v565_v60  ;;  %v6660_v31 = vld [vmem:[#allocation83_spill] sm:$0xff]  ;;  %v6661_v12 = vld [vmem:[#allocation74_spill] sm:$0xff]  ;;  %p3486_p3 = pnand %p3485_p2, %p3479_p13 }
 0x288   : > { %v5389_v41 = vadd.f32 %v1088_v24, %v896_v52  ;;  %v968_v33 = vsel %vm867_vm6, %v6660_v31, %v6657_v47  ;;  %v757_v3 = vadd.f32 %v734_v48, %v564_v2  ;;  %v737_v15 = vsel %vm633_vm1, %v6662_v19, %v6661_v12  ;;  %v6664_v24 = vld [vmem:[#allocation9_spill] sm:$0xff]  ;;  %v6670_v0 = vld [vmem:[#allocation38_spill] sm:$0xff]  ;;  %v6671_v48 = vld [vmem:[#allocation35_spill] sm:$0xff] }
 0x289   : > { %v1077_v17 = vpop.permute.xlu1 %1076  ;;  %v1184_v59 = vsel %vm1082_vm7, %v6664_v24, %v6663_v14  ;;  %v1183_v9 = vsel %vm1082_vm7, %v6666_v54, %v6664_v24  ;;  %v567_v49 = vadd.f32 %v544_v18, %v387_v36  ;;  %v971_v22 = vsel %vm867_vm6, %v6670_v0, %v6669_v35  ;;  %v6673_v47 = vld [vmem:[#allocation39_spill] sm:$0xff] }
 0x28a   : > { %v5398_v10 = vadd.f32 %v1077_v17, %v897_v45  ;;  %v1079_v4 = vpop.permute.xlu0 %1078  ;;  %v6665_v45 = vld [vmem:[#allocation73_spill] sm:$0xff]  ;;  %v991_v8 = vadd.f32 %v968_v33, %v757_v3  ;;  %v761_v60 = vadd.f32 %v737_v15, %v568_v58  ;;  %v970_v2 = vsel %vm867_vm6, %v6671_v48, %v6670_v0  ;;  %v6674_v18 = vld [vmem:[#allocation95_spill] sm:$0xff]  ;;  %v6677_v15 = vld [vmem:[#allocation104_spill] sm:$0xff] }
 0x28b   : > { %v1089_v27 = vsel %vm1082_vm7, %v1077_v17, %v1079_v4  ;;  %v736_v5 = vsel %vm633_vm1, %v6665_v45, %v6662_v19  ;;  %v992_v17 = vadd.f32 %v969_v61, %v758_v30  ;;  %v1398_v36 = vsel %vm1296_vm8, %v6673_v47, %v6672_v43  ;;  %v6675_v30 = vld [vmem:[#allocation94_spill] sm:$0xff]  ;;  %v6676_v3 = vld [vmem:[#allocation93_spill] sm:$0xff]  ;;  %v6678_v14 = vld [vmem:[#allocation103_spill] sm:$0xff] }
 0x28c   : > { %v5412_v13 = vadd.f32 %v1089_v27, %v898_v63  ;;  %v6667_v63 = vld [vmem:[#allocation20_spill] sm:$0xff]  ;;  %v1206_v26 = vadd.f32 %v1183_v9, %v991_v8  ;;  %v1186_v33 = vsel %vm1082_vm7, %v6675_v30, %v6674_v18  ;;  %v1185_v12 = vsel %vm1082_vm7, %v6676_v3, %v6675_v30 }
 0x28d   : > { %v1081_v55 = vpop.permute.xlu1 %1080  ;;  %v1207_v6 = vadd.f32 %v1184_v59, %v992_v17  ;;  %v1612_v24 = vsel %vm1510_vm9, %v6678_v14, %v6677_v15  ;;  %v1805_v0 = vsel %vm1703_vm10, %v5288_v51, %v5308_v53 }
 0x28e   : > { %v1090_v37 = vsel %vm1082_vm7, %v1079_v4, %v1081_v55  ;;  %v5426_v52 = vpop.permute.xlu0 %1488  ;;  %v6668_v4 = vld [vmem:[#allocation101_spill] sm:$0xff]  ;;  %v760_v55 = vadd.f32 %v736_v5, %v567_v49  ;;  %v1420_v5 = vadd.f32 %v1398_v36, %v1206_v26  ;;  %v6680_v49 = vld [vmem:[#allocation56_spill] sm:$0xff] }
 0x28f   : > { %v5434_v50 = vadd.f32 %v1090_v37, %v899_v32  ;;  %v345_v1 = vmul.f32 %v6668_v4, %v6667_v63  ;;  %v383_v32 = vmul.f32 %v5114_v7, %v6649_v44  ;;  %v995_v37 = vadd.f32 %v971_v22, %v761_v60  ;;  %v6679_v44 = vld [vmem:[#allocation27_spill] sm:$0xff]  ;;  %v6681_v4 = vld [vmem:[#allocation54_spill] sm:$0xff]  ;;  %v6683_v36 = vld [vmem:[#allocation105_spill] sm:$0xff] }
 0x290   : > { %v1421_v19 = vadd.f32 %v6672_v43, %v1207_v6  ;;  %v386_v7 = vmul.f32 %v6641_v28, %v6654_v62  ;;  %v994_v58 = vadd.f32 %v970_v2, %v760_v55  ;;  %v1400_v8 = vsel %vm1296_vm8, %v6681_v4, %v6680_v49  ;;  %v6682_v62 = vld [vmem:[#allocation87_spill] sm:$0xff]  ;;  %v6684_v55 = vld [vmem:[#allocation16_spill] sm:$0xff] }
 0x291   : > { %v5448_v27 = vpop.permute.xlu1 %1490  ;;  %v481_v59 = vadd.f32 %v6679_v44, %v345_v1  ;;  %v1210_v9 = vadd.f32 %v1186_v33, %v995_v37  ;;  %v563_v28 = vadd.f32 %v6651_v23, %v383_v32  ;;  %v1634_v2 = vadd.f32 %v1612_v24, %v1420_v5  ;;  %v6685_v33 = vld [vmem:[#allocation45_spill] sm:$0xff]  ;;  %v6686_v5 = vld [vmem:[#allocation44_spill] sm:$0xff] }
 0x292   : > { %v5456_v61 = vpop.permute.xlu0 %1494  ;;  %v1635_v35 = vadd.f32 %v6677_v15, %v1421_v19  ;;  %v1209_v60 = vadd.f32 %v1185_v12, %v994_v58  ;;  %v566_v6 = vadd.f32 %v6659_v11, %v386_v7  ;;  %v1614_v26 = vsel %vm1510_vm9, %v6684_v55, %v6683_v36 }
 0x293   : > { %v654_v1 = vadd.f32 %v6682_v62, %v481_v59  ;;  %v1424_v43 = vadd.f32 %v6680_v49, %v1210_v9  ;;  %v756_v30 = vadd.f32 %v6655_v25, %v563_v28  ;;  %v1827_v23 = vadd.f32 %v1805_v0, %v1634_v2  ;;  %v6688_v2 = vld [vmem:[#allocation57_spill] sm:$0xff] }
 0x294   : > { %v1828_v18 = vadd.f32 %v5308_v53, %v1635_v35  ;;  %v1423_v19 = vadd.f32 %v1400_v8, %v1209_v60  ;;  %v1807_v11 = vsel %vm1703_vm10, %v5312_v40, %v5327_v39  ;;  %v759_v59 = vadd.f32 %v6665_v45, %v566_v6  ;;  %v6687_v35 = vld [vmem:[#allocation40_spill] sm:$0xff] }
 0x295   : > { %v5473_v17 = vpop.permute.xlu1 %1496  ;;  %v888_v37 = vadd.f32 %v6685_v33, %v654_v1  ;;  %v1638_v12 = vadd.f32 %v6683_v36, %v1424_v43  ;;  %v990_v25 = vadd.f32 %v6660_v31, %v756_v30  ;;  %v1397_v0 = vsel %vm1296_vm8, %v6687_v35, %v6673_v47 }
 0x296   : > { %v2005_v22 = vpop.permute.xlu0 %2004  ;;  %v1637_v53 = vadd.f32 %v1614_v26, %v1423_v19  ;;  %v993_v8 = vadd.f32 %v6671_v48, %v759_v59  ;;  %v1399_v45 = vsel %vm1296_vm8, %v6688_v2, %v6681_v4  ;;  %v6691_v2 = vld [vmem:[#allocation7_spill] sm:$0xff] }
 0x297   : > { %v1103_v9 = vadd.f32 %v6686_v5, %v888_v37  ;;  %v1831_v49 = vadd.f32 %v5327_v39, %v1638_v12  ;;  %v1205_v39 = vadd.f32 %v6666_v54, %v990_v25  ;;  %v1806_v12 = vsel %vm1703_vm10, %v5360_v21, %v5312_v40 }
 0x298   : > { %v1830_v28 = vadd.f32 %v1807_v11, %v1637_v53  ;;  %v1208_v48 = vadd.f32 %v6676_v3, %v993_v8 }
 0x299   : > { %v2007_v32 = vpop.permute.xlu1 %2006  ;;  %v1317_v6 = vadd.f32 %v5333_v38, %v1103_v9  ;;  %v6690_v38 = vld [vmem:[#allocation49_spill] sm:$0xff]  ;;  %v1419_v19 = vadd.f32 %v1397_v0, %v1205_v39 }
 0x29a   : > { %v2019_v15 = vsel %vm1917_vm11, %v2005_v22, %v2007_v32  ;;  %v2042_v24 = vadd.f32 %v2007_v32, %v1828_v18  ;;  %v2011_v7 = vpop.permute.xlu0 %2010  ;;  %v6689_v18 = vld [vmem:[#allocation48_spill] sm:$0xff]  ;;  %v1613_v30 = vsel %vm1510_vm9, %v6690_v38, %v6684_v55  ;;  %v1422_v54 = vadd.f32 %v1399_v45, %v1208_v48  ;;  %v6696_v38 = vld [vmem:[#allocation46_spill] sm:$0xff] }
 0x29b   : > { %v2041_v58 = vadd.f32 %v2019_v15, %v1827_v23  ;;  %v1611_v4 = vsel %vm1510_vm9, %v6689_v18, %v6678_v14  ;;  %v1804_v32 = vsel %vm1703_vm10, %v5345_v20, %v5288_v51  ;;  %v347_v45 = vmul.f32 %v6691_v2, %v6667_v63  ;;  %v6694_v48 = vld [vmem:[#allocation88_spill] sm:$0xff]  ;;  %v6707_v2 = vld [vmem:[#allocation89_spill] sm:$0xff] }
 0x29c   : > { %v1633_v11 = vadd.f32 %v1611_v4, %v1419_v19  ;;  %v1636_v15 = vadd.f32 %v1613_v30, %v1422_v54  ;;  %v6697_v30 = vld [vmem:[#allocation12_spill] sm:$0xff]  ;;  %v6698_v54 = vld [vmem:[#allocation21_spill] sm:$0xff] }
 0x29d   : > { %v3354_v1 = vpack.i.bf16 %v2042_v24, %v2041_v58  ;;  %v2013_v60 = vpop.permute.xlu1 %2012 }
 0x29e   : > { %v2021_v31 = vsel %vm1917_vm11, %v2011_v7, %v2013_v60  ;;  %v2045_v43 = vadd.f32 %v2013_v60, %v1831_v49  ;;  %v1487_v36 = vpop.permute.xlu0 %1486  ;;  %v1826_v24 = vadd.f32 %v1804_v32, %v1633_v11  ;;  %v1829_v59 = vadd.f32 %v1806_v12, %v1636_v15  ;;  %v6700_v32 = vld [vmem:[#allocation82_spill] sm:$0xff]  ;;  %v6701_v12 = vld [vmem:[#allocation81_spill] sm:$0xff] }
 0x29f   : > { %v2044_v26 = vadd.f32 %v2021_v31, %v1830_v28  ;;  %v1511_v47 = vsel %vm1510_vm9, %v1487_v36, %v5426_v52  ;;  %3355 = vrot.lane.b32.xlu1 %v3354_v1, %s3560_s26  ;;  %v6693_v36 = vld [vmem:[#allocation13_spill] sm:$0xff]  ;;  %v868_v15 = vsel %vm867_vm6, %v6685_v33, %v6697_v30 }
 0x2a0   : > { %v5521_v37 = vadd.f32 %v1511_v47, %v1317_v6  ;;  %v6692_v6 = vld [vmem:[#allocation80_spill] sm:$0xff]  ;;  %v346_v39 = vmul.f32 %v6693_v36, %v6667_v63 }
 0x2a1   : > { %v3359_v23 = vpack.i.bf16 %v2045_v43, %v2044_v26  ;;  %v5523_v3 = vpop.permute.xlu1 %1492  ;;  %v465_v31 = vsel %vm464_vm5, %v6679_v44, %v6692_v6  ;;  %v6695_v26 = vld [vmem:[#allocation31_spill] sm:$0xff]  ;;  %v869_v44 = vsel %vm867_vm6, %v6697_v30, %v6696_v38 }
 0x2a2   : > { %v2003_v14 = vpop.permute.xlu0 %2002  ;;  %v635_v47 = vsel %vm633_vm1, %v6695_v26, %v6694_v48  ;;  %v634_v18 = vsel %vm633_vm1, %v6682_v62, %v6695_v26  ;;  %v482_v4 = vadd.f32 %v465_v31, %v346_v39  ;;  %v6708_v39 = vld [vmem:[#allocation11_spill] sm:$0xff]  ;;  %v6709_v48 = vld [vmem:[#allocation37_spill] sm:$0xff] }
 0x2a3   : > { %3360 = vrot.lane.b32.xlu0 %v3359_v23, %s3560_s26  ;;  %v2018_v55 = vsel %vm1917_vm11, %v2003_v14, %v2005_v22  ;;  %v6699_v23 = vld [vmem:[#allocation18_spill] sm:$0xff]  ;;  %v466_v14 = vsel %vm464_vm5, %v6701_v12, %v6700_v32  ;;  %v871_v26 = vsel %vm867_vm6, %v6709_v48, %v6708_v39 }
 0x2a4   : > { %v2040_v9 = vadd.f32 %v2018_v55, %v1826_v24  ;;  %v350_v63 = vmul.f32 %v6699_v23, %v6698_v54  ;;  %v6702_v55 = vld [vmem:[#allocation97_spill] sm:$0xff] }
 0x2a5   : > { %v2009_v53 = vpop.permute.xlu1 %2008  ;;  %v349_v24 = vmul.f32 %v6702_v55, %v6698_v54 }
 0x2a6   : > { %v2020_v58 = vsel %vm1917_vm11, %v2009_v53, %v2011_v7  ;;  %v5534_v25 = vpop.permute.xlu0 %1286  ;;  %v6703_v53 = vld [vmem:[#allocation91_spill] sm:$0xff] }
 0x2a7   : > { %v2043_v51 = vadd.f32 %v2020_v58, %v1829_v59  ;;  %v655_v59 = vadd.f32 %v634_v18, %v482_v4  ;;  %v6704_v58 = vld [vmem:[#allocation90_spill] sm:$0xff]  ;;  %v485_v31 = vadd.f32 %v466_v14, %v349_v24  ;;  %v1512_v24 = vsel %vm1510_vm9, %v5426_v52, %v5448_v27 }
 0x2a8   : > { %v636_v33 = vsel %vm633_vm1, %v6707_v2, %v6704_v58  ;;  %v6710_v18 = vld [vmem:[#allocation34_spill] sm:$0xff] }
 0x2a9   : > { %v3364_v20 = vpack.i.bf16 %v2043_v51, %v2040_v9  ;;  %v5536_v49 = vpop.permute.xlu1 %1288  ;;  %v637_v9 = vsel %vm633_vm1, %v6704_v58, %v6703_v53  ;;  %v6705_v51 = vld [vmem:[#allocation47_spill] sm:$0xff]  ;;  %v889_v36 = vadd.f32 %v868_v15, %v655_v59  ;;  %v870_v4 = vsel %vm867_vm6, %v6710_v18, %v6709_v48 }
 0x2aa   : > { %v5538_v40 = vpop.permute.xlu0 %1292 }
 0x2ab   : > { %3365 = vrot.lane.b32.xlu1 %v3364_v20, %s3560_s26  ;;  %v6706_v20 = vld [vmem:[#allocation96_spill] sm:$0xff] }
 0x2ad   : > { %v5541_v21 = vpop.permute.xlu1 %1294 }
 0x2ae   : > { %v5543_v8 = vpop.permute.xlu0 %1681 }
 0x2b1   : > { %v1684_v22 = vpop.permute.xlu1 %1683 }
 0x2b2   : > { %v5545_v35 = vpop.permute.xlu0 %1687 }
 0x2b5   : > { %v5547_v0 = vpop.permute.xlu1 %1689 }
 0x2b6   : > { %v1285_v7 = vpop.permute.xlu0 %1284 }
 0x2b7   : > { %v1301_v28 = vsel %vm1296_vm8, %v1285_v7, %v5534_v25  ;;  %v1084_v7 = vsel %vm1082_vm7, %v6706_v20, %v6705_v51 }
 0x2b8   : > { %v5552_v1 = vadd.f32 %v1301_v28, %v5368_v42  ;;  %v483_v42 = vadd.f32 %v6692_v6, %v347_v45  ;;  %v486_v28 = vadd.f32 %v6700_v32, %v350_v63  ;;  %v1083_v6 = vsel %vm1082_vm7, %v6686_v5, %v6706_v20  ;;  %v6711_v63 = vld [vmem:[#allocation100_spill] sm:$0xff]  ;;  %v6712_v5 = vld [vmem:[#allocation99_spill] sm:$0xff] }
 0x2b9   : > { %v5554_v60 = vpop.permute.xlu1 %1290  ;;  %v1104_v23 = vadd.f32 %v1083_v6, %v889_v36  ;;  %v1086_v32 = vsel %vm1082_vm7, %v6712_v5, %v6711_v63  ;;  %v1705_v20 = vsel %vm1703_vm10, %v5543_v8, %v1684_v22 }
 0x2ba   : > { %v5561_v43 = vpop.permute.xlu0 %1679  ;;  %v656_v11 = vadd.f32 %v635_v47, %v483_v42  ;;  %v659_v42 = vadd.f32 %v637_v9, %v486_v28  ;;  %v6714_v28 = vld [vmem:[#allocation102_spill] sm:$0xff] }
 0x2bb   : > { %v1318_v53 = vadd.f32 %v5251_v34, %v1104_v23  ;;  %v1514_v34 = vsel %vm1510_vm9, %v5456_v61, %v5473_v17 }
 0x2bc   : > { %v890_v45 = vadd.f32 %v869_v44, %v656_v11  ;;  %v658_v44 = vadd.f32 %v636_v33, %v485_v31  ;;  %v893_v14 = vadd.f32 %v871_v26, %v659_v42  ;;  %v6713_v11 = vld [vmem:[#allocation98_spill] sm:$0xff]  ;;  %v348_v33 = vmul.f32 %v6714_v28, %v6698_v54 }
 0x2bd   : > { %v5575_v19 = vpop.permute.xlu1 %1685  ;;  %v1085_v15 = vsel %vm1082_vm7, %v6713_v11, %v6712_v5  ;;  %v1707_v54 = vsel %vm1703_vm10, %v5545_v35, %v5547_v0 }
 0x2be   : > { %v5585_v62 = vpop.permute.xlu0 %1500  ;;  %v1105_v38 = vadd.f32 %v1084_v7, %v890_v45  ;;  %v892_v59 = vadd.f32 %v870_v4, %v658_v44  ;;  %v1108_v9 = vadd.f32 %v1086_v32, %v893_v14  ;;  %v1532_v45 = vadd.f32 %v1512_v24, %v1318_v53 }
 0x2bf   : > { %v484_v31 = vadd.f32 %v6701_v12, %v348_v33  ;;  %v1704_v24 = vsel %vm1703_vm10, %v5561_v43, %v5543_v8  ;;  %v6415_v53 = vmov 0.0  }
 0x2c0   : > { %v1319_v55 = vadd.f32 %v5242_v56, %v1105_v38  ;;  %v1107_v56 = vadd.f32 %v1085_v15, %v892_v59  ;;  %v1322_v6 = vadd.f32 %v5277_v16, %v1108_v9  ;;  %v1725_v36 = vadd.f32 %v1705_v20, %v1532_v45  ;;  %2202 = vmatprep.mubr.f32.mxu0 %v6415_v53 }
 0x2c1   : > { %v5605_v47 = vpop.permute.xlu1 %1502  ;;  %v657_v4 = vadd.f32 %v6707_v2, %v484_v31  ;;  %v1513_v2 = vsel %vm1510_vm9, %v5523_v3, %v5456_v61  ;;  %v1706_v59 = vsel %vm1703_vm10, %v5575_v19, %v5545_v35  ;;  %2214 = vmatprep.mubr.f32.mxu1 %v6415_v53  ;;  %v1724_v61 = vadd.f32 %v1704_v24, %v5521_v37 }
 0x2c2   : > { %v5610_v30 = vpop.permute.xlu0 %1506  ;;  %v1533_v51 = vadd.f32 %v5448_v27, %v1319_v55  ;;  %v1321_v27 = vadd.f32 %v5286_v57, %v1107_v56  ;;  %v1536_v48 = vadd.f32 %v5473_v17, %v1322_v6  ;;  %v1302_v45 = vsel %vm1296_vm8, %v5534_v25, %v5536_v49 }
 0x2c3   : > { %v891_v57 = vadd.f32 %v6710_v18, %v657_v4  ;;  %v1325_v37 = vadd.f32 %v5536_v49, %v5389_v41  ;;  %v1516_v6 = vsel %vm1510_vm9, %v5585_v62, %v5605_v47  ;;  %v1304_v31 = vsel %vm1296_vm8, %v5538_v40, %v5541_v21 }
 0x2c4   : > { %v1726_v52 = vadd.f32 %v1684_v22, %v1533_v51  ;;  %v1535_v38 = vadd.f32 %v1514_v34, %v1321_v27  ;;  %v1729_v12 = vadd.f32 %v5547_v0, %v1536_v48  ;;  %v1324_v34 = vadd.f32 %v1302_v45, %v5382_v46 }
 0x2c5   : > { %v5623_v58 = vpop.permute.xlu1 %1508  ;;  %v1106_v14 = vadd.f32 %v6713_v11, %v891_v57  ;;  %v1539_v27 = vadd.f32 %v5605_v47, %v1325_v37  ;;  %v1328_v41 = vadd.f32 %v5541_v21, %v5434_v50  ;;  %v1327_v46 = vadd.f32 %v1304_v31, %v5412_v13  ;;  %v2943_v31 = vld [vmem:[%s6285_s6 + $0x18] sm:$0xff] }
 0x2c6   : > { %v1896_v7 = vpop.permute.xlu0 %1895  ;;  %v1728_v44 = vadd.f32 %v1707_v54, %v1535_v38  ;;  %v1518_v49 = vsel %vm1510_vm9, %v5610_v30, %v5623_v58  ;;  %v1303_v54 = vsel %vm1296_vm8, %v5554_v60, %v5538_v40 }
 0x2c7   : > { %v1320_v0 = vadd.f32 %v5343_v29, %v1106_v14  ;;  %v1541_v38 = vadd.f32 %v1518_v49, %v1327_v46  ;;  %v1326_v40 = vadd.f32 %v1303_v54, %v5398_v10 }
 0x2c9   : > { %v1898_v39 = vpop.permute.xlu1 %1897  ;;  %v1534_v9 = vadd.f32 %v1513_v2, %v1320_v0 }
 0x2ca   : > { %v1919_v26 = vsel %vm1917_vm11, %v1896_v7, %v1898_v39  ;;  %v1940_v16 = vadd.f32 %v1898_v39, %v1726_v52  ;;  %v1902_v42 = vpop.permute.xlu0 %1901  ;;  %v1538_v39 = vadd.f32 %v1516_v6, %v1324_v34  ;;  %v2445_v6 = vld [vmem:[%s6283_s4 + $0x28] sm:$0xff]  ;;  %v2447_v34 = vld [vmem:[%s6283_s4 + $0x38] sm:$0xff] }
 0x2cb   : > { %v1939_v22 = vadd.f32 %v1919_v26, %v1725_v36  ;;  %v1727_v3 = vadd.f32 %v1706_v59, %v1534_v9 }
 0x2cd   : > { %v3369_v23 = vpack.i.bf16 %v1940_v16, %v1939_v22  ;;  %v1904_v63 = vpop.permute.xlu1 %1903  ;;  %v1542_v16 = vadd.f32 %v5623_v58, %v1328_v41 }
 0x2ce   : > { %v1921_v17 = vsel %vm1917_vm11, %v1902_v42, %v1904_v63  ;;  %v1943_v5 = vadd.f32 %v1904_v63, %v1729_v12  ;;  %v1499_v32 = vpop.permute.xlu0 %1498 }
 0x2cf   : > { %v1942_v15 = vadd.f32 %v1921_v17, %v1728_v44  ;;  %3370 = vrot.lane.b32.xlu0 %v3369_v23, %s3560_s26  ;;  %v1515_v12 = vsel %vm1510_vm9, %v1499_v32, %v5585_v62 }
 0x2d1   : > { %v3374_v55 = vpack.i.bf16 %v1943_v5, %v1942_v15  ;;  %v1505_v18 = vpop.permute.xlu1 %1504  ;;  %v1537_v15 = vadd.f32 %v1515_v12, %v5552_v1  ;;  %v2440_v1 = vld [vmem:[%s6283_s4] sm:$0xff] }
 0x2d2   : > { %v1894_v11 = vpop.permute.xlu0 %1893  ;;  %v1517_v13 = vsel %vm1510_vm9, %v1505_v18, %v5610_v30 }
 0x2d3   : > { %3375 = vrot.lane.b32.xlu1 %v3374_v55, %s3560_s26  ;;  %v1918_v29 = vsel %vm1917_vm11, %v1894_v11, %v1896_v7  ;;  %v1540_v62 = vadd.f32 %v1517_v13, %v1326_v40  ;;  %v2054_v40 = vld [vmem:[%s6282_s3] sm:$0xff] }
 0x2d4   : > { %v1938_v20 = vadd.f32 %v1918_v29, %v1724_v61 }
 0x2d5   : > { %v1900_v51 = vpop.permute.xlu1 %1899 }
 0x2d6   : > { %v1920_v8 = vsel %vm1917_vm11, %v1900_v51, %v1902_v42  ;;  %v1694_v43 = vpop.permute.xlu0 %1693 }
 0x2d7   : > { %v1941_v35 = vadd.f32 %v1920_v8, %v1727_v3 }
 0x2d9   : > { %v3379_v19 = vpack.i.bf16 %v1941_v35, %v1938_v20  ;;  %v1696_v28 = vpop.permute.xlu1 %1695 }
 0x2da   : > { %v1700_v33 = vpop.permute.xlu0 %1699  ;;  %v1709_v36 = vsel %vm1703_vm10, %v1694_v43, %v1696_v28  ;;  %v1732_v48 = vadd.f32 %v1696_v28, %v1539_v27  ;;  %v2441_v27 = vld [vmem:[%s6283_s4 + $0x8] sm:$0xff] }
 0x2db   : > { %3380 = vrot.lane.b32.xlu0 %v3379_v19, %s3560_s26  ;;  %v1731_v26 = vadd.f32 %v1709_v36, %v1538_v39  ;;  %v2442_v36 = vld [vmem:[%s6283_s4 + $0x10] sm:$0xff] }
 0x2dd   : > { %v1702_v56 = vpop.permute.xlu1 %1701 }
 0x2de   : > { %v1692_v7 = vpop.permute.xlu0 %1691  ;;  %v1711_v42 = vsel %vm1703_vm10, %v1700_v33, %v1702_v56  ;;  %v1735_v57 = vadd.f32 %v1702_v56, %v1542_v16  ;;  %v2443_v56 = vld [vmem:[%s6283_s4 + $0x18] sm:$0xff] }
 0x2df   : > { %v1734_v60 = vadd.f32 %v1711_v42, %v1541_v38  ;;  %v1708_v23 = vsel %vm1703_vm10, %v1692_v7, %v1694_v43 }
 0x2e0   : > { %v1730_v10 = vadd.f32 %v1708_v23, %v1537_v15  ;;  %v2058_v23 = vld [vmem:[%s6282_s3 + $0x20] sm:$0xff] }
 0x2e1   : > { %v1698_v52 = vpop.permute.xlu1 %1697 }
 0x2e2   : > { %v1908_v25 = vpop.permute.xlu0 %1907  ;;  %v1710_v63 = vsel %vm1703_vm10, %v1698_v52, %v1700_v33  ;;  %v2941_v52 = vld [vmem:[%s6285_s6 + $0x8] sm:$0xff] }
 0x2e3   : > { %v1733_v2 = vadd.f32 %v1710_v63, %v1540_v62  ;;  %v2059_v63 = vld [vmem:[%s6282_s3 + $0x28] sm:$0xff] }
 0x2e5   : > { %v1910_v47 = vpop.permute.xlu1 %1909 }
 0x2e6   : > { %v1923_v4 = vsel %vm1917_vm11, %v1908_v25, %v1910_v47  ;;  %v1946_v50 = vadd.f32 %v1910_v47, %v1732_v48  ;;  %v1914_v21 = vpop.permute.xlu0 %1913  ;;  %v2446_v48 = vld [vmem:[%s6283_s4 + $0x30] sm:$0xff] }
 0x2e7   : > { %v1945_v22 = vadd.f32 %v1923_v4, %v1731_v26  ;;  %v2940_v4 = vld [vmem:[%s6285_s6] sm:$0xff] }
 0x2e9   : > { %v3384_v44 = vpack.i.bf16 %v1946_v50, %v1945_v22  ;;  %v1916_v58 = vpop.permute.xlu1 %1915 }
 0x2ea   : > { %v1925_v17 = vsel %vm1917_vm11, %v1914_v21, %v1916_v58  ;;  %v1949_v5 = vadd.f32 %v1916_v58, %v1735_v57  ;;  %v1906_v14 = vpop.permute.xlu0 %1905  ;;  %v2057_v58 = vld [vmem:[%s6282_s3 + $0x18] sm:$0xff] }
 0x2eb   : > { %v1948_v32 = vadd.f32 %v1925_v17, %v1734_v60  ;;  %3385 = vrot.lane.b32.xlu1 %v3384_v44, %s3560_s26  ;;  %v1922_v30 = vsel %vm1917_vm11, %v1906_v14, %v1908_v25  ;;  %v2444_v25 = vld [vmem:[%s6283_s4 + $0x20] sm:$0xff]  ;;  %v2056_v60 = vld [vmem:[%s6282_s3 + $0x10] sm:$0xff]  ;;  %v2055_v44 = vld [vmem:[%s6282_s3 + $0x8] sm:$0xff] }
 0x2ec   : > { %v1944_v59 = vadd.f32 %v1922_v30, %v1730_v10  ;;  %v2060_v17 = vld [vmem:[%s6282_s3 + $0x30] sm:$0xff] }
 0x2ed   : > { %v3389_v0 = vpack.i.bf16 %v1949_v5, %v1948_v32  ;;  %v1912_v55 = vpop.permute.xlu1 %1911  ;;  %v2061_v5 = vld [vmem:[%s6282_s3 + $0x38] sm:$0xff] }
 0x2ee   : > { %v1924_v18 = vsel %vm1917_vm11, %v1912_v55, %v1914_v21  ;;  %v3341_v24 = vpop.permute.xlu0 %3340  ;;  %v2942_v21 = vld [vmem:[%s6285_s6 + $0x10] sm:$0xff] }
 0x2ef   : > { %v1947_v11 = vadd.f32 %v1924_v18, %v1733_v2  ;;  %3390 = vrot.lane.b32.xlu0 %v3389_v0, %s3560_s26  ;;  %v3343_v9 = vunpack.i.h.bf16 %v3341_v24  ;;  %v3342_v29 = vunpack.i.l.bf16 %v3341_v24 }
 0x2f1   : > { %v3394_v61 = vpack.i.bf16 %v1947_v11, %v1944_v59  ;;  %v3346_v3 = vpop.permute.xlu1 %3345  ;;  %v2099_v19 = vsel %vm1917_vm11, %v3342_v29, %v3343_v9 }
 0x2f2   : > { %v3348_v51 = vunpack.i.h.bf16 %v3346_v3  ;;  %v3347_v8 = vunpack.i.l.bf16 %v3346_v3  ;;  %v3351_v43 = vpop.permute.xlu0 %3350 }
 0x2f3   : > { %v3353_v20 = vunpack.i.h.bf16 %v3351_v43  ;;  %v3352_v35 = vunpack.i.l.bf16 %v3351_v43  ;;  %3395 = vrot.lane.b32.xlu1 %v3394_v61, %s3560_s26  ;;  %2450 = vperm.xlu0 %3338, %v2440_v1   ;;  %s6231_s26 = scalar_lea.hbm %s6287_s8, %s3181_s22 }
 0x2f4   : > { %v2101_v28 = vsel %vm1917_vm11, %v3347_v8, %v3348_v51 }
 0x2f5   : > { %v3182_v33 = vpack.c.bf16 %v2101_v28, %v2099_v19  ;;  %v2098_v45 = vsel %vm1917_vm11, %v3352_v35, %v3342_v29  ;;  %v2100_v7 = vsel %vm1917_vm11, %v3353_v20, %v3347_v8 }
 0x2f6   : > { %v3184_v37 = vpack.c.bf16 %v2100_v7, %v2098_v45 }
 0x2f7   : > { %3183 = vmatprep.subr.bf16.mxu0 %v3182_v33  ;;  %3214 = vmatprep.subr.bf16.mxu1 %v3182_v33 }
 0x2f8   : > { %2465 = vperm.xlu0 %3338, %v2443_v56   ;;  %3185 = vmatpush1.bf16.msra.mxu0 %v3184_v37 }
 0x2f9   : > { %3216 = vmatpush1.bf16.msra.mxu1 %v3184_v37  ;;  %2455 = vperm.xlu1 %3399, %v2441_v27   ;;  %v2050_v27 = vld [vmem:[%s6281_s2 + $0x20] sm:$0xff] }
 0x2fc   : > { %2475 = vperm.xlu0 %3338, %v2445_v6   ;;  %v2046_v6 = vld [vmem:[%s6281_s2] sm:$0xff] }
 0x2fd   : > { %2460 = vperm.xlu1 %3399, %v2442_v36   ;;  %v2051_v36 = vld [vmem:[%s6281_s2 + $0x28] sm:$0xff] }
 0x300   : > { %2485 = vperm.xlu0 %3338, %v2447_v34   ;;  %v2047_v34 = vld [vmem:[%s6281_s2 + $0x8] sm:$0xff] }
 0x301   : > { %2470 = vperm.xlu1 %3399, %v2444_v25   ;;  %v2052_v25 = vld [vmem:[%s6281_s2 + $0x30] sm:$0xff] }
 0x304   : > { %2951 = vperm.xlu0 %3338, %v2941_v52   ;;  %v2048_v52 = vld [vmem:[%s6281_s2 + $0x10] sm:$0xff] }
 0x305   : > { %2480 = vperm.xlu1 %3399, %v2446_v48  }
 0x308   : > { %2961 = vperm.xlu0 %3338, %v2943_v31   ;;  %v2049_v31 = vld [vmem:[%s6281_s2 + $0x18] sm:$0xff] }
 0x309   : > { %2946 = vperm.xlu1 %3399, %v2940_v4  }
 0x30d   : > { %2956 = vperm.xlu1 %3399, %v2942_v21  }
 0x311   : > { %v3356_v39 = vpop.permute.xlu1 %3355 }
 0x312   : > { %v3358_v41 = vunpack.i.h.bf16 %v3356_v39  ;;  %v3357_v49 = vunpack.i.l.bf16 %v3356_v39  ;;  %v2053_v39 = vld [vmem:[%s6281_s2 + $0x38] sm:$0xff] }
 0x314   : > { %v2103_v47 = vsel %vm1917_vm11, %v3357_v49, %v3358_v41 }
 0x315   : > { %v3361_v46 = vpop.permute.xlu0 %3360 }
 0x316   : > { %v3363_v54 = vunpack.i.h.bf16 %v3361_v46  ;;  %v3362_v26 = vunpack.i.l.bf16 %v3361_v46 }
 0x318   : > { %v2105_v16 = vsel %vm1917_vm11, %v3362_v26, %v3363_v54 }
 0x319   : > { %v3186_v42 = vpack.c.bf16 %v2105_v16, %v2103_v47 }
 0x31b   : > { %3187 = vmatprep.subr.bf16.mxu0 %v3186_v42  ;;  %3215 = vmatprep.subr.bf16.mxu1 %v3186_v42 }
 0x31d   : > { %v3366_v50 = vpop.permute.xlu1 %3365 }
 0x31e   : > { %v3368_v38 = vunpack.i.h.bf16 %v3366_v50  ;;  %v3367_v22 = vunpack.i.l.bf16 %v3366_v50 }
 0x320   : > { %v2102_v12 = vsel %vm1917_vm11, %v3367_v22, %v3357_v49  ;;  %v2104_v13 = vsel %vm1917_vm11, %v3368_v38, %v3362_v26 }
 0x321   : > { %v3188_v57 = vpack.c.bf16 %v2104_v13, %v2102_v12 }
 0x323   : > { %3189 = vmatpush1.bf16.msra.mxu0 %v3188_v57  ;;  %3217 = vmatpush1.bf16.msra.mxu1 %v3188_v57 }
 0x326   : > { %3156 = vmatmul.mubr.msk.f32.vlgmr.msra.gmra.mrb[0].mxu0 %vm1429_vm3, %v2054_v40  ;;  %3158 = vmatmul.mubr.msk.f32.vlgmr.msra.gmra.mrb[0].mxu1 %vm1429_vm3, %v2056_v60 }
 0x327   : > { %2208 = vmatprep.mubr.f32.mxu0 %v6415_v53  ;;  %2220 = vmatprep.mubr.f32.mxu1 %v6415_v53 }
 0x32a   : > { %3157 = vmatmul.mubr.msk.f32.gmra.mrb[2].mxu0 %vm1429_vm3, %v2055_v44  ;;  %3159 = vmatmul.mubr.msk.f32.gmra.mrb[2].mxu1 %vm1429_vm3, %v2057_v58 }
 0x32b   : > { %2391 = vmatprep.mubr.f32.mxu0 %v6415_v53  ;;  %2226 = vmatprep.mubr.f32.mxu1 %v6415_v53 }
 0x32e   : > { %3160 = vmatmul.mubr.msk.f32.gmra.mrb[4].mxu1 %vm1429_vm3, %v2058_v23 }
 0x32f   : > { %2232 = vmatprep.mubr.f32.mxu1 %v6415_v53 }
 0x332   : > { %3161 = vmatmul.mubr.msk.f32.gmra.mrb[6].mxu1 %vm1429_vm3, %v2059_v63 }
 0x333   : > { %2238 = vmatprep.mubr.f32.mxu1 %v6415_v53 }
 0x336   : > { %3162 = vmatmul.mubr.msk.f32.gmra.mrb[8].mxu1 %vm1429_vm3, %v2060_v17 }
 0x337   : > { %2244 = vmatprep.mubr.f32.mxu1 %v6415_v53 }
 0x33a   : > { %3163 = vmatmul.mubr.msk.f32.gmra.mrb[10].mxu1 %vm1429_vm3, %v2061_v5 }
 0x33b   : > { %3041 = vmatprep.mubr.f32.mxu1 %v6415_v53 }
 0x341   : > { %v3371_v14 = vpop.permute.xlu0 %3370 }
 0x342   : > { %v3373_v15 = vunpack.i.h.bf16 %v3371_v14  ;;  %v3372_v62 = vunpack.i.l.bf16 %v3371_v14 }
 0x344   : > { %v2288_v2 = vsel %vm1917_vm11, %v3372_v62, %v3373_v15 }
 0x345   : > { %v3376_v32 = vpop.permute.xlu1 %3375 }
 0x346   : > { %v3378_v30 = vunpack.i.h.bf16 %v3376_v32  ;;  %v3377_v10 = vunpack.i.l.bf16 %v3376_v32 }
 0x348   : > { %v2290_v0 = vsel %vm1917_vm11, %v3377_v10, %v3378_v30 }
 0x349   : > { %v3190_v55 = vpack.c.bf16 %v2290_v0, %v2288_v2 }
 0x34b   : > { %3191 = vmatprep.subr.bf16.mxu0 %v3190_v55 }
 0x34d   : > { %v3381_v18 = vpop.permute.xlu0 %3380 }
 0x34e   : > { %v3383_v24 = vunpack.i.h.bf16 %v3381_v18  ;;  %v3382_v59 = vunpack.i.l.bf16 %v3381_v18 }
 0x350   : > { %v2289_v11 = vsel %vm1917_vm11, %v3383_v24, %v3377_v10  ;;  %v2287_v9 = vsel %vm1917_vm11, %v3382_v59, %v3372_v62 }
 0x351   : > { %v3192_v29 = vpack.c.bf16 %v2289_v11, %v2287_v9 }
 0x353   : > { %3193 = vmatpush1.bf16.msra.mxu0 %v3192_v29 }
 0x35d   : > { %v3386_v1 = vpop.permute.xlu1 %3385 }
 0x35e   : > { %v3388_v61 = vunpack.i.h.bf16 %v3386_v1  ;;  %v3387_v3 = vunpack.i.l.bf16 %v3386_v1 }
 0x360   : > { %v2292_v20 = vsel %vm1917_vm11, %v3387_v3, %v3388_v61 }
 0x361   : > { %v3391_v51 = vpop.permute.xlu0 %3390 }
 0x362   : > { %v3393_v8 = vunpack.i.h.bf16 %v3391_v51  ;;  %v3392_v43 = vunpack.i.l.bf16 %v3391_v51 }
 0x364   : > { %v2294_v35 = vsel %vm1917_vm11, %v3392_v43, %v3393_v8 }
 0x365   : > { %v3396_v19 = vpop.permute.xlu1 %3395  ;;  %v3194_v28 = vpack.c.bf16 %v2294_v35, %v2292_v20 }
 0x366   : > { %v3398_v33 = vunpack.i.h.bf16 %v3396_v19  ;;  %v3397_v56 = vunpack.i.l.bf16 %v3396_v19 }
 0x367   : > { %3195 = vmatprep.subr.bf16.mxu0 %v3194_v28 }
 0x368   : > { %v2291_v45 = vsel %vm1917_vm11, %v3397_v56, %v3387_v3  ;;  %v2293_v7 = vsel %vm1917_vm11, %v3398_v33, %v3392_v43 }
 0x369   : > { %v3196_v37 = vpack.c.bf16 %v2293_v7, %v2291_v45 }
 0x36b   : > { %3197 = vmatpush1.bf16.msra.mxu0 %v3196_v37 }
 0x36e   : > { %3164 = vmatmul.mubr.msk.f32.vlgmr.msra.gmra.mrb[0].mxu0 %vm1429_vm3, %v2046_v6 }
 0x36f   : > { %2397 = vmatprep.mubr.f32.mxu0 %v6415_v53 }
 0x372   : > { %3165 = vmatmul.mubr.msk.f32.gmra.mrb[2].mxu0 %vm1429_vm3, %v2047_v34  ;;  %v2451_v38 = vpop.permute.xlu0 %2450 }
 0x373   : > { %2403 = vmatprep.mubr.f32.mxu0 %v6415_v53 }
 0x376   : > { %3166 = vmatmul.mubr.msk.f32.gmra.mrb[4].mxu0 %vm1429_vm3, %v2048_v52 }
 0x377   : > { %2409 = vmatprep.mubr.f32.mxu0 %v6415_v53  ;;  %v2466_v28 = vpop.permute.xlu0 %2465 }
 0x378   : > { %v2456_v60 = vpop.permute.xlu1 %2455 }
 0x37a   : > { %3167 = vmatmul.mubr.msk.f32.gmra.mrb[6].mxu0 %vm1429_vm3, %v2049_v31 }
 0x37b   : > { %2415 = vmatprep.mubr.f32.mxu0 %v6415_v53 }
 0x37c   : > { %v2461_v51 = vpop.permute.xlu1 %2460 }
 0x37e   : > { %3168 = vmatmul.mubr.msk.f32.gmra.mrb[8].mxu0 %vm1429_vm3, %v2050_v27 }
 0x37f   : > { %2421 = vmatprep.mubr.f32.mxu0 %v6415_v53 }
 0x382   : > { %3169 = vmatmul.mubr.msk.f32.gmra.mrb[10].mxu0 %vm1429_vm3, %v2051_v36 }
 0x383   : > { %2427 = vmatprep.mubr.f32.mxu0 %v6415_v53 }
 0x386   : > { %3170 = vmatmul.mubr.msk.f32.gmra.mrb[12].mxu0 %vm1429_vm3, %v2052_v25 }
 0x387   : > { %2433 = vmatprep.mubr.f32.mxu0 %v6415_v53 }
 0x38a   : > { %3171 = vmatmul.mubr.msk.f32.gmra.mrb[14].mxu0 %vm1429_vm3, %v2053_v39 }
 0x3f9   : > { %v2216_v41 = vpop.f32.mrb[0].mxu1 }
 0x3fa   : > { %v2218_v49 = vpop.f32.mrb[1].mxu1 }
 0x3fd   : > { %v2222_v48 = vpop.f32.mrb[2].mxu1 }
 0x3fe   : > { %v2224_v46 = vpop.f32.mrb[3].mxu1 }
 0x401   : > { %v5835_v54 = vpop.f32.mrb[4].mxu1 }
 0x402   : > { %v5837_v26 = vpop.f32.mrb[5].mxu1 }
 0x405   : > { %v5839_v47 = vpop.f32.mrb[6].mxu1 }
 0x406   : > { %v5841_v16 = vpop.f32.mrb[7].mxu1 }
 0x409   : > { %v5843_v42 = vpop.f32.mrb[8].mxu1 }
 0x40a   : > { %v5845_v4 = vpop.f32.mrb[9].mxu1 }
 0x40d   : > { %v5847_v50 = vpop.f32.mrb[10].mxu1 }
 0x40e   : > { %v5849_v21 = vpop.f32.mrb[11].mxu1 }
 0x441   : > { %v2393_v22 = vpop.f32.mrb[0].mxu0 }
 0x442   : > { %v2488_v12 = vadd.f32 %v2451_v38, %v2393_v22  ;;  %v2395_v13 = vpop.f32.mrb[1].mxu0 }
 0x443   : > { %v2489_v57 = vadd.f32 %v2451_v38, %v2395_v13 }
 0x444   : > { %v5851_v40 = vmul.f32 0.70710677, %v2488_v12 }
 0x445   : > { %v5853_v44 = vmul.f32 0.70710677, %v2489_v57  ;;  %v2399_v58 = vpop.f32.mrb[2].mxu0 }
 0x446   : > { %v2536_v23 = vand.u32 2147483647, %v5851_v40  ;;  %v2490_v63 = vadd.f32 %v2456_v60, %v2399_v58  ;;  %v2401_v17 = vpop.f32.mrb[3].mxu0  ;;  %vm2856_vm12 = vcmp.lt.f32.partialorder %v5851_v40, 0.0 }
 0x447   : > { %v2537_v5 = vand.u32 2147483647, %v5853_v44  ;;  %v5857_v14 = vadd.f32 %v2456_v60, %v2401_v17  ;;  %vm2857_vm14 = vcmp.lt.f32.partialorder %v5853_v44, 0.0 }
 0x448   : > { %v2552_v15 = vmul.f32 0.3275911, %v2536_v23  ;;  %v5859_v62 = vmul.f32 0.70710677, %v2490_v63  ;;  %v2760_v11 = vsub.f32 0.0, %v2536_v23 }
 0x449   : > { %v2553_v32 = vmul.f32 0.3275911, %v2537_v5  ;;  %v5862_v30 = vmul.f32 0.70710677, %v5857_v14  ;;  %v2405_v0 = vpop.f32.mrb[4].mxu0  ;;  %v2761_v8 = vsub.f32 0.0, %v2537_v5 }
 0x44a   : > { %v2568_v10 = vadd.f32 1.0, %v2552_v15  ;;  %v2538_v2 = vand.u32 2147483647, %v5859_v62  ;;  %v2407_v24 = vpop.f32.mrb[5].mxu0  ;;  %v2406_v61 = vadd.f32 %v2405_v0, %v2216_v41  ;;  %v2776_v33 = vmul.f32 %v2760_v11, %v2536_v23 }
 0x44b   : > { %v2569_v55 = vadd.f32 1.0, %v2553_v32  ;;  %v2539_v18 = vand.u32 2147483647, %v5862_v30  ;;  %v2408_v20 = vadd.f32 %v2407_v24, %v2218_v49  ;;  %v2777_v52 = vmul.f32 %v2761_v8, %v2537_v5 }
 0x44c   : > { %3400 = vrcp.f32 %v2568_v10  ;;  %v2554_v59 = vmul.f32 0.3275911, %v2538_v2  ;;  %v2492_v35 = vadd.f32 %v2461_v51, %v2406_v61  ;;  %v2762_v56 = vsub.f32 0.0, %v2538_v2 }
 0x44d   : > { %3402 = vrcp.f32 %v2569_v55  ;;  %v2555_v9 = vmul.f32 0.3275911, %v2539_v18  ;;  %v2411_v29 = vpop.f32.mrb[6].mxu0  ;;  %v2493_v31 = vadd.f32 %v2461_v51, %v2408_v20  ;;  %v2763_v27 = vsub.f32 0.0, %v2539_v18 }
 0x44e   : > { %v2570_v1 = vadd.f32 1.0, %v2554_v59  ;;  %v2413_v3 = vpop.f32.mrb[7].mxu0  ;;  %v2412_v19 = vadd.f32 %v2411_v29, %v2222_v48  ;;  %v5866_v37 = vmul.f32 0.70710677, %v2492_v35  ;;  %v2792_v39 = vmul.f32 1.442695, %v2776_v33 }
 0x44f   : > { %v2571_v43 = vadd.f32 1.0, %v2555_v9  ;;  %v2414_v45 = vadd.f32 %v2413_v3, %v2224_v46  ;;  %v2778_v41 = vmul.f32 %v2762_v56, %v2538_v2  ;;  %v5880_v48 = vmul.f32 0.5, %v2488_v12 }
 0x450   : > { %3404 = vrcp.f32 %v2570_v1  ;;  %v5868_v6 = vadd.f32 %v2466_v28, %v2412_v19  ;;  %v5873_v36 = vand.u32 2147483647, %v5866_v37  ;;  %v5882_v46 = vmul.f32 0.5, %v2489_v57 }
 0x451   : > { %3406 = vrcp.f32 %v2571_v43  ;;  %v2417_v7 = vpop.f32.mrb[8].mxu0  ;;  %v2794_v58 = vmul.f32 1.442695, %v2777_v52  ;;  %v5891_v23 = vmul.f32 0.70710677, %v2493_v31  ;;  %v2779_v5 = vmul.f32 %v2763_v27, %v2539_v18 }
 0x452   : > { %v5870_v34 = vpop.f32.mrb[9].mxu0  ;;  %v5876_v25 = vmul.f32 0.70710677, %v5868_v6  ;;  %v2556_v38 = vmul.f32 0.3275911, %v5873_v36  ;;  %3408 = vpow2.f32 %v2792_v39  ;;  %v5897_v10 = vmul.f32 0.5, %v2490_v63 }
 0x453   : > { %v2796_v2 = vmul.f32 1.442695, %v2778_v41  ;;  %v5904_v59 = vmul.f32 0.5, %v5857_v14  ;;  %v2541_v1 = vand.u32 2147483647, %v5891_v23  ;;  %v5917_v8 = vadd.f32 %v2466_v28, %v2414_v45 }
 0x454   : > { %v5886_v22 = vand.u32 2147483647, %v5876_v25  ;;  %v2572_v15 = vadd.f32 1.0, %v2556_v38  ;;  %v2798_v51 = vmul.f32 1.442695, %v2779_v5  ;;  %v5919_v19 = vmul.f32 0.5, %v2492_v35  ;;  %v2471_v5 = vpop.permute.xlu1 %2470 }
 0x455   : > { %v5895_v57 = vpop.f32.mrb[10].mxu0  ;;  %v5921_v52 = vmul.f32 0.5, %v2493_v31  ;;  %v2764_v41 = vsub.f32 0.0, %v5873_v36  ;;  %v2557_v38 = vmul.f32 0.3275911, %v2541_v1  ;;  %v2418_v31 = vadd.f32 %v2417_v7, %v5835_v54 }
 0x456   : > { %v5878_v49 = vpop.eup %3400  ;;  %v2558_v12 = vmul.f32 0.3275911, %v5886_v22  ;;  %v5899_v0 = vpop.f32.mrb[11].mxu0  ;;  %3410 = vrcp.f32 %v2572_v15  ;;  %v5931_v35 = vmul.f32 0.70710677, %v5917_v8  ;;  %vm2858_vm13 = vcmp.lt.f32.partialorder %v5859_v62, 0.0 }
 0x457   : > { %v5888_v13 = vpop.eup %3402  ;;  %v2616_v60 = vmul.f32 1.0614054, %v5878_v49  ;;  %3412 = vpow2.f32 %v2794_v58  ;;  %6715 = vst [vmem:[#allocation52_spill] sm:$0xff] %v5921_v52  ;;  %v2780_v7 = vmul.f32 %v2764_v41, %v5873_v36  ;;  %v5986_v40 = vmul.f32 0.5, %v5917_v8 }
 0x458   : > { %v2617_v17 = vmul.f32 1.0614054, %v5888_v13  ;;  %v2574_v18 = vadd.f32 1.0, %v2558_v12  ;;  %3414 = vpow2.f32 %v2796_v2  ;;  %v2765_v12 = vsub.f32 0.0, %v2541_v1 }
 0x459   : > { %v2632_v32 = vadd.f32 -1.4531521, %v2616_v60  ;;  %v5906_v11 = vpop.f32.mrb[12].mxu0  ;;  %vm2859_vm15 = vcmp.lt.f32.partialorder %v5862_v30, 0.0  ;;  %v2424_v8 = vadd.f32 %v5895_v57, %v5839_v47  ;;  %vm2860_vm0 = vcmp.lt.f32.partialorder %v5866_v37, 0.0 }
 0x45a   : > { %v5901_v55 = vpop.eup %3404  ;;  %v2633_v24 = vadd.f32 -1.4531521, %v2617_v17  ;;  %v5913_v61 = vpop.f32.mrb[13].mxu0  ;;  %3416 = vrcp.f32 %v2574_v18  ;;  %v5939_v18 = vadd.f32 %v2471_v5, %v2418_v31  ;;  %vm2862_vm1 = vcmp.lt.f32.partialorder %v5876_v25, 0.0 }
 0x45b   : > { %v5908_v9 = vpop.eup %3406  ;;  %v2648_v29 = vmul.f32 %v5878_v49, %v2632_v32  ;;  %v2618_v63 = vmul.f32 1.0614054, %v5901_v55  ;;  %v5937_v32 = vmul.f32 0.5, %v5868_v6  ;;  %3418 = vpow2.f32 %v2798_v51 }
 0x45c   : > { %v2649_v3 = vmul.f32 %v5888_v13, %v2633_v24  ;;  %v2619_v14 = vmul.f32 1.0614054, %v5908_v9  ;;  %v2800_v51 = vmul.f32 1.442695, %v2780_v7  ;;  %vm2861_vm4 = vcmp.lt.f32.partialorder %v5891_v23, 0.0 }
 0x45d   : > { %v2664_v43 = vadd.f32 1.4214138, %v2648_v29  ;;  %v2634_v20 = vadd.f32 -1.4531521, %v2618_v63  ;;  %v5926_v60 = vpop.f32.mrb[14].mxu0  ;;  %v2420_v29 = vadd.f32 %v5870_v34, %v5837_v26  ;;  %v3409_v63 = vpop.eup %3408  ;;  %vm2863_vm5 = vcmp.lt.f32.partialorder %v5931_v35, 0.0 }
 0x45e   : > { %v2665_v33 = vadd.f32 1.4214138, %v2649_v3  ;;  %v2635_v56 = vadd.f32 -1.4531521, %v2619_v14  ;;  %v5934_v58 = vpop.f32.mrb[15].mxu0  ;;  %v5946_v14 = vadd.f32 1.0, %v2557_v38 }
 0x45f   : > { %v2680_v27 = vmul.f32 %v5878_v49, %v2664_v43  ;;  %v2650_v39 = vmul.f32 %v5901_v55, %v2634_v20 }
 0x460   : > { %v2681_v28 = vmul.f32 %v5888_v13, %v2665_v33  ;;  %v2651_v45 = vmul.f32 %v5908_v9, %v2635_v56  ;;  %v5948_v43 = vpop.eup %3410  ;;  %v2766_v33 = vsub.f32 0.0, %v5886_v22  ;;  %v5954_v56 = vmul.f32 0.70710677, %v5939_v18 }
 0x461   : > { %v2696_v17 = vadd.f32 -0.28449672, %v2680_v27  ;;  %v2666_v15 = vadd.f32 1.4214138, %v2650_v39  ;;  %v3413_v26 = vpop.eup %3412  ;;  %v2620_v39 = vmul.f32 1.0614054, %v5948_v43 }
 0x462   : > { %v2697_v2 = vadd.f32 -0.28449672, %v2681_v28  ;;  %v2667_v24 = vadd.f32 1.4214138, %v2651_v45  ;;  %v2544_v38 = vand.u32 2147483647, %v5954_v56  ;;  %v3415_v28 = vpop.eup %3414 }
 0x463   : > { %v2712_v3 = vmul.f32 %v5878_v49, %v2696_v17  ;;  %v2682_v54 = vmul.f32 %v5901_v55, %v2666_v15  ;;  %v2636_v17 = vadd.f32 -1.4531521, %v2620_v39  ;;  %v2781_v15 = vmul.f32 %v2765_v12, %v2541_v1 }
 0x464   : > { %v2713_v6 = vmul.f32 %v5888_v13, %v2697_v2  ;;  %v2683_v20 = vmul.f32 %v5908_v9, %v2667_v24  ;;  %v5961_v2 = vpop.eup %3416  ;;  %v2543_v1 = vand.u32 2147483647, %v5931_v35  ;;  %vm2864_vm2 = vcmp.lt.f32.partialorder %v5954_v56, 0.0 }
 0x465   : > { %v2728_v34 = vadd.f32 0.2548296, %v2712_v3  ;;  %v2698_v27 = vadd.f32 -0.28449672, %v2682_v54  ;;  %v2782_v3 = vmul.f32 %v2766_v33, %v5886_v22  ;;  %v2560_v54 = vmul.f32 0.3275911, %v2544_v38 }
 0x466   : > { %v2729_v36 = vadd.f32 0.2548296, %v2713_v6  ;;  %v2699_v41 = vadd.f32 -0.28449672, %v2683_v20  ;;  %v2652_v20 = vmul.f32 %v5948_v43, %v2636_v17  ;;  %v2622_v52 = vmul.f32 1.0614054, %v5961_v2 }
 0x467   : > { %v2744_v45 = vmul.f32 %v5878_v49, %v2728_v34  ;;  %v2714_v31 = vmul.f32 %v5901_v55, %v2698_v27  ;;  %v2576_v12 = vadd.f32 1.0, %v2560_v54  ;;  %v2804_v33 = vmul.f32 1.442695, %v2782_v3  ;;  %v3419_v54 = vpop.eup %3418 }
 0x468   : > { %v2715_v24 = vmul.f32 %v5908_v9, %v2699_v41  ;;  %v2745_v49 = vmul.f32 %v5888_v13, %v2729_v36  ;;  %v2668_v39 = vadd.f32 1.4214138, %v2652_v20  ;;  %v2638_v22 = vadd.f32 -1.4531521, %v2622_v52 }
 0x469   : > { %v2824_v53 = vmul.f32 %v3409_v63, %v2744_v45  ;;  %v2730_v6 = vadd.f32 0.2548296, %v2714_v31  ;;  %3420 = vrcp.f32 %v2576_v12  ;;  %v5972_v41 = vadd.f32 %v2471_v5, %v2420_v29 }
 0x46a   : > { %v2731_v34 = vadd.f32 0.2548296, %v2715_v24  ;;  %v2684_v13 = vmul.f32 %v5948_v43, %v2668_v39  ;;  %v2654_v36 = vmul.f32 %v5961_v2, %v2638_v22  ;;  %v2825_v17 = vmul.f32 %v3413_v26, %v2745_v49 }
 0x46b   : > { %v2840_v27 = vsub.f32 1.0, %v2824_v53  ;;  %v2746_v7 = vmul.f32 %v5901_v55, %v2730_v6  ;;  %3422 = vpow2.f32 %v2800_v51  ;;  %v2802_v24 = vmul.f32 1.442695, %v2781_v15 }
 0x46c   : > { %v2747_v63 = vmul.f32 %v5908_v9, %v2731_v34  ;;  %v2559_v53 = vmul.f32 0.3275911, %v2543_v1  ;;  %v2700_v9 = vadd.f32 -0.28449672, %v2684_v13  ;;  %v2670_v3 = vadd.f32 1.4214138, %v2654_v36 }
 0x46d   : > { %v2872_v45 = vsub.f32 0.0, %v2840_v27  ;;  %v2826_v31 = vmul.f32 %v3415_v28, %v2746_v7  ;;  %3424 = vpow2.f32 %v2804_v33  ;;  %v2767_v5 = vsub.f32 0.0, %v2543_v1 }
 0x46e   : > { %v2827_v6 = vmul.f32 %v3419_v54, %v2747_v63  ;;  %v2768_v29 = vsub.f32 0.0, %v2544_v38  ;;  %v2716_v20 = vmul.f32 %v5948_v43, %v2700_v9  ;;  %v2686_v34 = vmul.f32 %v5961_v2, %v2670_v3 }
 0x46f   : > { %v2888_v55 = vsel %vm2856_vm12, %v2872_v45, %v2840_v27  ;;  %v2842_v52 = vsub.f32 1.0, %v2826_v31  ;;  %v5981_v26 = vmul.f32 0.70710677, %v5972_v41  ;;  %3426 = vrcp.f32 %v5946_v14 }
 0x470   : > { %v2904_v15 = vadd.f32 1.0, %v2888_v55  ;;  %v2575_v51 = vadd.f32 1.0, %v2559_v53  ;;  %v2841_v49 = vsub.f32 1.0, %v2825_v17  ;;  %v2732_v27 = vadd.f32 0.2548296, %v2716_v20  ;;  %v2476_v17 = vpop.permute.xlu0 %2475 }
 0x471   : > { %v2874_v28 = vsub.f32 0.0, %v2842_v52  ;;  %v2702_v7 = vadd.f32 -0.28449672, %v2686_v34  ;;  %v2843_v22 = vsub.f32 1.0, %v2827_v6  ;;  %3428 = vpow2.f32 %v2802_v24 }
 0x472   : > { %v2784_v63 = vmul.f32 %v2768_v29, %v2544_v38  ;;  %v2783_v45 = vmul.f32 %v2767_v5, %v2543_v1  ;;  %v2545_v14 = vand.u32 2147483647, %v5981_v26  ;;  %v5998_v62 = vmul.f32 %v2904_v15, %v5880_v48  ;;  %v2481_v15 = vpop.permute.xlu1 %2480 }
 0x473   : > { %v2890_v12 = vsel %vm2858_vm13, %v2874_v28, %v2842_v52  ;;  %v2718_v33 = vmul.f32 %v5961_v2, %v2702_v7  ;;  %v5995_v31 = vpop.eup %3420  ;;  %v2748_v36 = vmul.f32 %v5948_v43, %v2732_v27  ;;  %v2426_v38 = vadd.f32 %v5899_v0, %v5841_v16 }
 0x474   : > { %v2906_v39 = vadd.f32 1.0, %v2890_v12  ;;  %v2873_v1 = vsub.f32 0.0, %v2841_v49  ;;  %3430 = vrcp.f32 %v2575_v51  ;;  %v2624_v53 = vmul.f32 1.0614054, %v5995_v31 }
 0x475   : > { %v2734_v24 = vadd.f32 0.2548296, %v2718_v33  ;;  %v3423_v47 = vpop.eup %3422  ;;  %v2875_v48 = vsub.f32 0.0, %v2843_v22  ;;  %v2808_v54 = vmul.f32 1.442695, %v2784_v63  ;;  %v6009_v55 = vadd.f32 %v2476_v17, %v2424_v8 }
 0x476   : > { %v6001_v13 = vmul.f32 %v2906_v39, %v5897_v10  ;;  %v2640_v43 = vadd.f32 -1.4531521, %v2624_v53  ;;  %v2769_v52 = vsub.f32 0.0, %v2545_v14  ;;  %v6012_v9 = vadd.f32 %v2476_v17, %v2426_v38 }
 0x477   : > { %v2750_v10 = vmul.f32 %v5961_v2, %v2734_v24  ;;  %v3425_v16 = vpop.eup %3424  ;;  %v2828_v0 = vmul.f32 %v3423_v47, %v2748_v36  ;;  %v2806_v3 = vmul.f32 1.442695, %v2783_v45  ;;  %v6015_v6 = vmul.f32 0.70710677, %v6009_v55 }
 0x478   : > { %v3200_v57 = vpack.c.bf16 %v6001_v13, %v5998_v62  ;;  %v2430_v5 = vadd.f32 %v5906_v11, %v5843_v42  ;;  %v2889_v29 = vsel %vm2857_vm14, %v2873_v1, %v2841_v49  ;;  %v2656_v20 = vmul.f32 %v5995_v31, %v2640_v43 }
 0x479   : > { %v2830_v28 = vmul.f32 %v3425_v16, %v2750_v10  ;;  %v2561_v2 = vmul.f32 0.3275911, %v2545_v14  ;;  %v6022_v34 = vpop.eup %3426  ;;  %v2891_v51 = vsel %vm2859_vm15, %v2875_v48, %v2843_v22  ;;  %3432 = vpow2.f32 %v2808_v54 }
 0x47a   : > { %v2546_v12 = vand.u32 2147483647, %v6015_v6  ;;  %v6028_v27 = vmul.f32 0.70710677, %v6012_v9  ;;  %v2672_v42 = vadd.f32 1.4214138, %v2656_v20  ;;  %v2785_v44 = vmul.f32 %v2769_v52, %v2545_v14 }
 0x47b   : > { %v6031_v11 = vadd.f32 %v2481_v15, %v2430_v5  ;;  %v2432_v49 = vadd.f32 %v5913_v61, %v5845_v4  ;;  %v6035_v7 = vpop.eup %3428  ;;  %v2905_v39 = vadd.f32 1.0, %v2889_v29  ;;  %v2844_v30 = vsub.f32 1.0, %v2828_v0 }
 0x47c   : > { %v2562_v22 = vmul.f32 0.3275911, %v2546_v12  ;;  %v2547_v63 = vand.u32 2147483647, %v6028_v27  ;;  %v2846_v33 = vsub.f32 1.0, %v2830_v28  ;;  %v6040_v45 = vmul.f32 0.5, %v5939_v18 }
 0x47d   : > { %v2688_v14 = vmul.f32 %v5995_v31, %v2672_v42  ;;  %v2577_v8 = vadd.f32 1.0, %v2561_v2  ;;  %v2907_v36 = vadd.f32 1.0, %v2891_v51  ;;  %v6044_v38 = vmul.f32 0.5, %v5972_v41 }
 0x47e   : > { %v2578_v4 = vadd.f32 1.0, %v2562_v22  ;;  %v2563_v61 = vmul.f32 0.3275911, %v2547_v63  ;;  %v6046_v17 = vpop.eup %3430  ;;  %3434 = vpow2.f32 %v2806_v3  ;;  %v2810_v24 = vmul.f32 1.442695, %v2785_v44  ;;  %v2486_v3 = vpop.permute.xlu0 %2485 }
 0x47f   : > { %v2704_v1 = vadd.f32 -0.28449672, %v2688_v14  ;;  %v6049_v53 = vmul.f32 0.70710677, %v6031_v11  ;;  %v2921_v18 = vmul.f32 %v2905_v39, %v5882_v46  ;;  %v2876_v47 = vsub.f32 0.0, %v2844_v30 }
 0x480   : > { %3436 = vrcp.f32 %v2578_v4  ;;  %v2770_v48 = vsub.f32 0.0, %v2546_v12  ;;  %v2878_v54 = vsub.f32 0.0, %v2846_v33  ;;  %v2579_v43 = vadd.f32 1.0, %v2563_v61 }
 0x481   : > { %v2720_v10 = vmul.f32 %v5995_v31, %v2704_v1  ;;  %3438 = vrcp.f32 %v2577_v8  ;;  %v2548_v41 = vand.u32 2147483647, %v6049_v53  ;;  %v2771_v52 = vsub.f32 0.0, %v2547_v63 }
 0x482   : > { %v6054_v16 = vadd.f32 %v2481_v15, %v2432_v49  ;;  %v2436_v0 = vadd.f32 %v5926_v60, %v5847_v50  ;;  %v2923_v5 = vmul.f32 %v2907_v36, %v5904_v59  ;;  %3440 = vpow2.f32 %v2810_v24 }
 0x483   : > { %v2736_v46 = vadd.f32 0.2548296, %v2720_v10  ;;  %v2564_v29 = vmul.f32 0.3275911, %v2548_v41  ;;  %v3433_v28 = vpop.eup %3432  ;;  %v2892_v20 = vsel %vm2860_vm0, %v2876_v47, %v2844_v30  ;;  %v2786_v2 = vmul.f32 %v2770_v48, %v2546_v12 }
 0x484   : > { %v6062_v51 = vmul.f32 0.70710677, %v6054_v16  ;;  %v6064_v42 = vadd.f32 %v2486_v3, %v2436_v0  ;;  %v2894_v15 = vsel %vm2862_vm1, %v2878_v54, %v2846_v33  ;;  %v2438_v59 = vadd.f32 %v5934_v58, %v5849_v21 }
 0x485   : > { %v2752_v50 = vmul.f32 %v5995_v31, %v2736_v46  ;;  %v2580_v60 = vadd.f32 1.0, %v2564_v29  ;;  %3442 = vrcp.f32 %v2579_v43  ;;  %v2787_v37 = vmul.f32 %v2771_v52, %v2547_v63 }
 0x486   : > { %v2772_v44 = vsub.f32 0.0, %v2548_v41  ;;  %v2549_v12 = vand.u32 2147483647, %v6062_v51  ;;  %v6074_v39 = vmul.f32 0.70710677, %v6064_v42  ;;  %v6076_v25 = vadd.f32 %v2486_v3, %v2438_v59 }
 0x487   : > { %v2832_v49 = vmul.f32 %v3433_v28, %v2752_v50  ;;  %3444 = vrcp.f32 %v2580_v60  ;;  %v2908_v30 = vadd.f32 1.0, %v2892_v20  ;;  %v2910_v31 = vadd.f32 1.0, %v2894_v15 }
 0x488   : > { %v2565_v22 = vmul.f32 0.3275911, %v2549_v12  ;;  %v3198_v33 = vpack.c.bf16 %v2923_v5, %v2921_v18  ;;  %v6078_v14 = vpop.eup %3434  ;;  %v2812_v58 = vmul.f32 1.442695, %v2786_v2  ;;  %v2773_v8 = vsub.f32 0.0, %v2549_v12 }
 0x489   : > { %v2848_v21 = vsub.f32 1.0, %v2832_v49  ;;  %v2550_v63 = vand.u32 2147483647, %v6074_v39  ;;  %v2814_v4 = vmul.f32 1.442695, %v2787_v37  ;;  %v2788_v61 = vmul.f32 %v2772_v44, %v2548_v41 }
 0x48a   : > { %v6081_v36 = vpop.eup %3436  ;;  %v2581_v1 = vadd.f32 1.0, %v2565_v22  ;;  %v6084_v24 = vmul.f32 0.70710677, %v6076_v25  ;;  %3199 = vmatprep.subr.bf16.mxu1 %v3198_v33  ;;  %v6089_v18 = vmul.f32 0.5, %v6009_v55  ;;  %v6096_v41 = vmul.f32 %v2910_v31, %v5937_v32 }
 0x48b   : > { %v6086_v47 = vpop.eup %3438  ;;  %v2880_v48 = vsub.f32 0.0, %v2848_v21  ;;  %v2626_v54 = vmul.f32 1.0614054, %v6081_v36  ;;  %v2566_v10 = vmul.f32 0.3275911, %v2550_v63  ;;  %3201 = vmatpush1.bf16.msra.mxu1 %v3200_v57  ;;  %v2774_v43 = vsub.f32 0.0, %v2550_v63 }
 0x48c   : > { %3446 = vrcp.f32 %v2581_v1  ;;  %v2551_v52 = vand.u32 2147483647, %v6084_v24  ;;  %v6099_v0 = vpop.eup %3440  ;;  %v2789_v55 = vmul.f32 %v2773_v8, %v2549_v12  ;;  %v6102_v46 = vmul.f32 %v2908_v30, %v5919_v19 }
 0x48d   : > { %v2642_v3 = vadd.f32 -1.4531521, %v2626_v54  ;;  %3448 = vpow2.f32 %v2812_v58  ;;  %v2582_v5 = vadd.f32 1.0, %v2566_v10  ;;  %v2816_v29 = vmul.f32 1.442695, %v2788_v61 }
 0x48e   : > { %3450 = vpow2.f32 %v2814_v4  ;;  %v2567_v62 = vmul.f32 0.3275911, %v2551_v52  ;;  %v2896_v32 = vsel %vm2864_vm2, %v2880_v48, %v2848_v21  ;;  %v2621_v57 = vmul.f32 1.0614054, %v6022_v34 }
 0x48f   : > { %v2658_v13 = vmul.f32 %v6081_v36, %v2642_v3  ;;  %3452 = vrcp.f32 %v2582_v5  ;;  %v6108_v28 = vpop.eup %3442  ;;  %v2790_v20 = vmul.f32 %v2774_v43, %v2550_v63  ;;  %v2775_v15 = vsub.f32 0.0, %v2551_v52 }
 0x490   : > { %v2583_v2 = vadd.f32 1.0, %v2567_v62  ;;  %v2623_v50 = vmul.f32 1.0614054, %v6046_v17  ;;  %v2818_v59 = vmul.f32 1.442695, %v2789_v55  ;;  %v3204_v56 = vpack.c.bf16 %v6096_v41, %v6102_v46 }
 0x491   : > { %v6111_v19 = vpop.eup %3444  ;;  %v2674_v60 = vadd.f32 1.4214138, %v2658_v13  ;;  %v2637_v37 = vadd.f32 -1.4531521, %v2621_v57  ;;  %v6115_v44 = vadd.f32 1.0, %v2896_v32  ;;  %v2791_v8 = vmul.f32 %v2775_v15, %v2551_v52 }
 0x492   : > { %v2628_v12 = vmul.f32 1.0614054, %v6111_v19  ;;  %3454 = vrcp.f32 %v2583_v2  ;;  %v2639_v49 = vadd.f32 -1.4531521, %v2623_v50  ;;  %v2625_v22 = vmul.f32 1.0614054, %v6086_v47 }
 0x493   : > { %v2690_v30 = vmul.f32 %v6081_v36, %v2674_v60  ;;  %v2653_v31 = vmul.f32 %v6022_v34, %v2637_v37  ;;  %v2627_v33 = vmul.f32 1.0614054, %v6108_v28  ;;  %v2820_v58 = vmul.f32 1.442695, %v2790_v20 }
 0x494   : > { %v2644_v21 = vadd.f32 -1.4531521, %v2628_v12  ;;  %v2655_v63 = vmul.f32 %v6046_v17, %v2639_v49  ;;  %3456 = vpow2.f32 %v2816_v29  ;;  %v2641_v1 = vadd.f32 -1.4531521, %v2625_v22 }
 0x495   : > { %v2706_v4 = vadd.f32 -0.28449672, %v2690_v30  ;;  %v2669_v61 = vadd.f32 1.4214138, %v2653_v31  ;;  %3458 = vpow2.f32 %v2818_v59  ;;  %v2643_v43 = vadd.f32 -1.4531521, %v2627_v33 }
 0x496   : > { %v6123_v48 = vpop.eup %3446  ;;  %v2660_v54 = vmul.f32 %v6111_v19, %v2644_v21  ;;  %v2671_v10 = vadd.f32 1.4214138, %v2655_v63  ;;  %v2657_v52 = vmul.f32 %v6086_v47, %v2641_v1  ;;  %v6132_v13 = vmul.f32 1.442695, %v2791_v8 }
 0x497   : > { %v3449_v3 = vpop.eup %3448  ;;  %v2722_v55 = vmul.f32 %v6081_v36, %v2706_v4  ;;  %v2685_v5 = vmul.f32 %v6022_v34, %v2669_v61  ;;  %v2629_v62 = vmul.f32 1.0614054, %v6123_v48  ;;  %v2659_v20 = vmul.f32 %v6108_v28, %v2643_v43 }
 0x498   : > { %v6130_v32 = vpop.eup %3450  ;;  %v2676_v29 = vadd.f32 1.4214138, %v2660_v54  ;;  %v2687_v57 = vmul.f32 %v6046_v17, %v2671_v10  ;;  %3460 = vpow2.f32 %v2820_v58  ;;  %v2673_v60 = vadd.f32 1.4214138, %v2657_v52 }
 0x499   : > { %v6136_v2 = vpop.eup %3452  ;;  %v2738_v15 = vadd.f32 0.2548296, %v2722_v55  ;;  %v2701_v50 = vadd.f32 -0.28449672, %v2685_v5  ;;  %vm2866_vm3 = vcmp.lt.f32.partialorder %v6015_v6, 0.0  ;;  %vm2865_vm6 = vcmp.lt.f32.partialorder %v5981_v26, 0.0 }
 0x49a   : > { %v2692_v59 = vmul.f32 %v6111_v19, %v2676_v29  ;;  %v2630_v37 = vmul.f32 1.0614054, %v6136_v2  ;;  %v2703_v12 = vadd.f32 -0.28449672, %v2687_v57  ;;  %v2675_v49 = vadd.f32 1.4214138, %v2659_v20 }
 0x49b   : > { %v2754_v30 = vmul.f32 %v6081_v36, %v2738_v15  ;;  %v2717_v31 = vmul.f32 %v6022_v34, %v2701_v50  ;;  %v2689_v22 = vmul.f32 %v6086_v47, %v2673_v60  ;;  %v2645_v33 = vadd.f32 -1.4531521, %v2629_v62 }
 0x49c   : > { %v6144_v21 = vpop.eup %3454  ;;  %v2708_v58 = vadd.f32 -0.28449672, %v2692_v59  ;;  %v2646_v8 = vadd.f32 -1.4531521, %v2630_v37  ;;  %v2719_v63 = vmul.f32 %v6046_v17, %v2703_v12  ;;  %v2691_v4 = vmul.f32 %v6108_v28, %v2675_v49 }
 0x49d   : > { %v2834_v61 = vmul.f32 %v3449_v3, %v2754_v30  ;;  %v2733_v1 = vadd.f32 0.2548296, %v2717_v31  ;;  %v2705_v54 = vadd.f32 -0.28449672, %v2689_v22  ;;  %v2631_v10 = vmul.f32 1.0614054, %v6144_v21 }
 0x49e   : > { %v2724_v36 = vmul.f32 %v6111_v19, %v2708_v58  ;;  %v2662_v43 = vmul.f32 %v6136_v2, %v2646_v8  ;;  %v2735_v55 = vadd.f32 0.2548296, %v2719_v63  ;;  %v2707_v5 = vadd.f32 -0.28449672, %v2691_v4  ;;  %v3457_v52 = vpop.eup %3456 }
 0x49f   : > { %v2850_v62 = vsub.f32 1.0, %v2834_v61  ;;  %v2749_v29 = vmul.f32 %v6022_v34, %v2733_v1  ;;  %v2721_v3 = vmul.f32 %v6086_v47, %v2705_v54  ;;  %v2647_v57 = vadd.f32 -1.4531521, %v2631_v10  ;;  %v6155_v20 = vpop.eup %3458 }
 0x4a0   : > { %v2740_v15 = vadd.f32 0.2548296, %v2724_v36  ;;  %v2678_v50 = vadd.f32 1.4214138, %v2662_v43  ;;  %v2751_v60 = vmul.f32 %v6046_v17, %v2735_v55  ;;  %v2723_v59 = vmul.f32 %v6108_v28, %v2707_v5 }
 0x4a1   : > { %v2882_v37 = vsub.f32 0.0, %v2850_v62  ;;  %v2829_v12 = vmul.f32 %v6035_v7, %v2749_v29  ;;  %v2737_v49 = vadd.f32 0.2548296, %v2721_v3  ;;  %v2661_v30 = vmul.f32 %v6123_v48, %v2645_v33 }
 0x4a2   : > { %v2756_v34 = vmul.f32 %v6111_v19, %v2740_v15  ;;  %v2694_v31 = vmul.f32 %v6136_v2, %v2678_v50  ;;  %v2831_v22 = vmul.f32 %v6078_v14, %v2751_v60  ;;  %v2739_v58 = vadd.f32 0.2548296, %v2723_v59  ;;  %v3461_v8 = vpop.eup %3460 }
 0x4a3   : > { %v2898_v17 = vsel %vm2866_vm3, %v2882_v37, %v2850_v62  ;;  %v2845_v63 = vsub.f32 1.0, %v2829_v12  ;;  %v2753_v4 = vmul.f32 %v6086_v47, %v2737_v49  ;;  %v2663_v7 = vmul.f32 %v6144_v21, %v2647_v57 }
 0x4a4   : > { %v2914_v61 = vadd.f32 1.0, %v2898_v17  ;;  %vm2867_vm7 = vcmp.lt.f32.partialorder %v6028_v27, 0.0  ;;  %v2836_v33 = vmul.f32 %v3457_v52, %v2756_v34  ;;  %v2710_v1 = vadd.f32 -0.28449672, %v2694_v31 }
 0x4a5   : > { %v2847_v19 = vsub.f32 1.0, %v2831_v22  ;;  %v2877_v54 = vsub.f32 0.0, %v2845_v63  ;;  %v2755_v10 = vmul.f32 %v6108_v28, %v2739_v58  ;;  %v2833_v14 = vmul.f32 %v6099_v0, %v2753_v4 }
 0x4a6   : > { %v2677_v36 = vadd.f32 1.4214138, %v2661_v30  ;;  %v2930_v6 = vmul.f32 %v2914_v61, %v6089_v18  ;;  %v2852_v43 = vsub.f32 1.0, %v2836_v33  ;;  %v2726_v55 = vmul.f32 %v6136_v2, %v2710_v1 }
 0x4a7   : > { %v2879_v47 = vsub.f32 0.0, %v2847_v19  ;;  %v2928_v5 = vmul.f32 %v6115_v44, %v6040_v45  ;;  %v2893_v52 = vsel %vm2861_vm4, %v2877_v54, %v2845_v63  ;;  %v2835_v62 = vmul.f32 %v6130_v32, %v2755_v10  ;;  %v6716_v45 = vld [vmem:[#allocation52_spill] sm:$0xff] }
 0x4a8   : > { %v2849_v29 = vsub.f32 1.0, %v2833_v14  ;;  %v2742_v3 = vadd.f32 0.2548296, %v2726_v55  ;;  %v2909_v28 = vadd.f32 1.0, %v2893_v52  ;;  %v2679_v57 = vadd.f32 1.4214138, %v2663_v7 }
 0x4a9   : > { %v2895_v0 = vsel %vm2863_vm5, %v2879_v47, %v2847_v19  ;;  %v2851_v15 = vsub.f32 1.0, %v2835_v62  ;;  %v3208_v60 = vpack.c.bf16 %v2930_v6, %v2928_v5  ;;  %v2884_v59 = vsub.f32 0.0, %v2852_v43 }
 0x4aa   : > { %v2911_v18 = vadd.f32 1.0, %v2895_v0  ;;  %v2881_v50 = vsub.f32 0.0, %v2849_v29  ;;  %v2758_v37 = vmul.f32 %v6136_v2, %v2742_v3  ;;  %3462 = vpow2.f32 %v6132_v13  ;;  %v2939_v0 = vld [vmem:[%s6284_s5 + $0x18] sm:$0xff] }
 0x4ab   : > { %v2693_v23 = vmul.f32 %v6123_v48, %v2677_v36  ;;  %v2925_v44 = vmul.f32 %v2909_v28, %v6716_v45  ;;  %v2883_v12 = vsub.f32 0.0, %v2851_v15  ;;  %v2695_v34 = vmul.f32 %v6144_v21, %v2679_v57  ;;  %v2947_v28 = vpop.permute.xlu1 %2946 }
 0x4ac   : > { %v2927_v32 = vmul.f32 %v2911_v18, %v5986_v40  ;;  %v2897_v35 = vsel %vm2865_vm6, %v2881_v50, %v2849_v29  ;;  %v2838_v49 = vmul.f32 %v3461_v8, %v2758_v37  ;;  %v2515_v22 = vmul.f32 0.5, %v6012_v9 }
 0x4ad   : > { %v2913_v30 = vadd.f32 1.0, %v2897_v35  ;;  %v2709_v31 = vadd.f32 -0.28449672, %v2693_v23  ;;  %vm2868_vm8 = vcmp.lt.f32.partialorder %v6049_v53, 0.0  ;;  %v2899_v2 = vsel %vm2867_vm7, %v2883_v12, %v2851_v15 }
 0x4ae   : > { %v3202_v13 = vpack.c.bf16 %v2927_v32, %v2925_v44  ;;  %v2900_v58 = vsel %vm2868_vm8, %v2884_v59, %v2852_v43  ;;  %v2854_v17 = vsub.f32 1.0, %v2838_v49  ;;  %v2915_v40 = vadd.f32 1.0, %v2899_v2 }
 0x4af   : > { %v2711_v63 = vadd.f32 -0.28449672, %v2695_v34  ;;  %v2725_v26 = vmul.f32 %v6123_v48, %v2709_v31  ;;  %v2929_v9 = vmul.f32 %v2913_v30, %v6044_v38  ;;  %v2916_v7 = vadd.f32 1.0, %v2900_v58  ;;  %v2957_v44 = vpop.permute.xlu1 %2956 }
 0x4b0   : > { %3203 = vmatprep.subr.bf16.mxu1 %v3202_v13  ;;  %v2886_v8 = vsub.f32 0.0, %v2854_v17  ;;  %v2931_v4 = vmul.f32 %v2915_v40, %v2515_v22  ;;  %vm2870_vm9 = vcmp.lt.f32.partialorder %v6074_v39, 0.0  ;;  %v2516_v19 = vmul.f32 0.5, %v6031_v11 }
 0x4b1   : > { %3205 = vmatpush1.bf16.msra.mxu1 %v3204_v56  ;;  %v2727_v53 = vmul.f32 %v6144_v21, %v2711_v63  ;;  %v2741_v27 = vadd.f32 0.2548296, %v2725_v26  ;;  %v2518_v54 = vmul.f32 0.5, %v6064_v42  ;;  %vm2869_vm10 = vcmp.lt.f32.partialorder %v6062_v51, 0.0  ;;  %v2936_v51 = vld [vmem:[%s6284_s5] sm:$0xff] }
 0x4b2   : > { %v2902_v61 = vsel %vm2870_vm9, %v2886_v8, %v2854_v17  ;;  %v3206_v33 = vpack.c.bf16 %v2931_v4, %v2929_v9  ;;  %v2932_v56 = vmul.f32 %v2916_v7, %v2516_v19  ;;  %vm2871_vm11 = vcmp.lt.f32.partialorder %v6084_v24, 0.0 }
 0x4b3   : > { %v2743_v1 = vadd.f32 0.2548296, %v2727_v53  ;;  %v2918_v10 = vadd.f32 1.0, %v2902_v61  ;;  %v2757_v41 = vmul.f32 %v6123_v48, %v2741_v27  ;;  %v2519_v52 = vmul.f32 0.5, %v6076_v25  ;;  %v2938_v25 = vld [vmem:[%s6284_s5 + $0x10] sm:$0xff] }
 0x4b4   : > { %v3463_v46 = vpop.eup %3462  ;;  %3207 = vmatprep.subr.bf16.mxu1 %v3206_v33  ;;  %vm2964_vm12 = vcmask 523264   ;;  %v6717_v24 = vmov 0.0  }
 0x4b5   : > { %v2759_v38 = vmul.f32 %v6144_v21, %v2743_v1  ;;  %v2934_v14 = vmul.f32 %v2918_v10, %v2518_v54  ;;  %3209 = vmatpush1.bf16.msra.mxu1 %v3208_v60  ;;  %v2837_v39 = vmul.f32 %v6155_v20, %v2757_v41  ;;  %v2517_v21 = vmul.f32 0.5, %v6054_v16  ;;  %v2937_v16 = vld [vmem:[%s6284_s5 + $0x8] sm:$0xff]  ;;  %v2952_v60 = vpop.permute.xlu0 %2951 }
 0x4b7   : > { %v2839_v36 = vmul.f32 %v3463_v46, %v2759_v38  ;;  %v2853_v6 = vsub.f32 1.0, %v2837_v39  ;;  %v3212_v43 = vpack.c.bf16 %v2934_v14, %v2932_v56 }
 0x4b9   : > { %v2855_v55 = vsub.f32 1.0, %v2839_v36  ;;  %v2885_v47 = vsub.f32 0.0, %v2853_v6  ;;  %v2962_v30 = vpop.permute.xlu0 %2961 }
 0x4bb   : > { %v2887_v11 = vsub.f32 0.0, %v2855_v55  ;;  %v2901_v42 = vsel %vm2869_vm10, %v2885_v47, %v2853_v6 }
 0x4bc   : > { %v2917_v5 = vadd.f32 1.0, %v2901_v42 }
 0x4bd   : > { %v2903_v48 = vsel %vm2871_vm11, %v2887_v11, %v2855_v55 }
 0x4be   : > { %v2919_v62 = vadd.f32 1.0, %v2903_v48  ;;  %v2933_v29 = vmul.f32 %v2917_v5, %v2517_v21 }
 0x4c0   : > { %v2935_v20 = vmul.f32 %v2919_v62, %v2519_v52 }
 0x4c2   : > { %v3210_v3 = vpack.c.bf16 %v2935_v20, %v2933_v29 }
 0x4c4   : > { %3211 = vmatprep.subr.bf16.mxu1 %v3210_v3 }
 0x4c5   : > { %3213 = vmatpush1.bf16.msra.mxu1 %v3212_v43 }
 0x4c8   : > { %3172 = vmatmul.mubr.msk.f32.vlgmr.msra.gmra.mrb[12].mxu1 %vm2964_vm12, %v2936_v51 }
 0x4c9   : > { %3047 = vmatprep.mubr.f32.mxu1 %v6717_v24 }
 0x4cc   : > { %3173 = vmatmul.mubr.msk.f32.gmra.mrb[14].mxu1 %vm2964_vm12, %v2937_v16 }
 0x4cd   : > { %3053 = vmatprep.mubr.f32.mxu1 %v6717_v24 }
 0x4d0   : > { %3174 = vmatmul.mubr.msk.f32.gmra.mrb[16].mxu1 %vm2964_vm12, %v2938_v25 }
 0x4d1   : > { %3059 = vmatprep.mubr.f32.mxu1 %v6717_v24 }
 0x4d4   : > { %3175 = vmatmul.mubr.msk.f32.gmra.mrb[18].mxu1 %vm2964_vm12, %v2939_v0 }
 0x59b   : > { %v3043_v57 = vpop.f32.mrb[12].mxu1 }
 0x59c   : > { %v3044_v18 = vadd.f32 %v3043_v57, %v2947_v28  ;;  %v3045_v15 = vpop.f32.mrb[13].mxu1 }
 0x59d   : > { %v3046_v50 = vadd.f32 %v3045_v15, %v2947_v28 }
 0x59e   : > { %3066 = vst [vmem:[%s298_s21] sm:$0xff] %v3044_v18 }
 0x59f   : > { %3067 = vst [vmem:[%s298_s21 + $0x8] sm:$0xff] %v3046_v50  ;;  %v3049_v59 = vpop.f32.mrb[14].mxu1 }
 0x5a0   : > { %v3050_v37 = vadd.f32 %v3049_v59, %v2952_v60  ;;  %v3051_v23 = vpop.f32.mrb[15].mxu1 }
 0x5a1   : > { %v3052_v45 = vadd.f32 %v3051_v23, %v2952_v60 }
 0x5a2   : > { %3068 = vst [vmem:[%s298_s21 + $0x10] sm:$0xff] %v3050_v37 }
 0x5a3   : > { %3069 = vst [vmem:[%s298_s21 + $0x18] sm:$0xff] %v3052_v45  ;;  %v3055_v32 = vpop.f32.mrb[16].mxu1 }
 0x5a4   : > { %v3056_v12 = vadd.f32 %v3055_v32, %v2957_v44  ;;  %v3057_v35 = vpop.f32.mrb[17].mxu1 }
 0x5a5   : > { %v3058_v49 = vadd.f32 %v3057_v35, %v2957_v44 }
 0x5a6   : > { %3070 = vst [vmem:[%s298_s21 + $0x20] sm:$0xff] %v3056_v12 }
 0x5a7   : > { %3071 = vst [vmem:[%s298_s21 + $0x28] sm:$0xff] %v3058_v49  ;;  %v3061_v34 = vpop.f32.mrb[18].mxu1 }
 0x5a8   : > { %v3062_v31 = vadd.f32 %v3061_v34, %v2962_v30  ;;  %v3063_v22 = vpop.f32.mrb[19].mxu1 }
 0x5a9   : > { %v3064_v13 = vadd.f32 %v3063_v22, %v2962_v30 }
 0x5aa   : > { %3072 = vst [vmem:[%s298_s21 + $0x30] sm:$0xff] %v3062_v31 }
 0x5ab   : > { %3073 = vst [vmem:[%s298_s21 + $0x38] sm:$0xff] %v3064_v13 }
 0x5ac   : > { %3489 = shalt.err (!%p3486_p3)
}
 0x5ad   : > { %s3490_s18 = scalar_lea.hbm %s6231_s26, 1024  ;;  %s3494_s22 = scalar_lea.hbm %s6287_s8, 2048 }
 0x5ae   : > { %p3491_p4 = scmp.ne.s32.totalorder %s6231_s26, %s3490_s18  ;;  %p3495_p9 = scmp.lt.u32.totalorder %s6231_s26, %s6287_s8 }
 0x5af   : > { %p3496_p10 = scmp.lt.u32.totalorder %s3494_s22, %s3490_s18  ;;  %p3498_p12 = scmp.lt.u32.totalorder %s3490_s18, %s6231_s26 }
 0x5b0   : > { %p3492_p7 = pnand %p3491_p4, %p3647_p5 }
 0x5b1   : > { %p3497_p11 = por %p3496_p10, %p3495_p9 }
 0x5b2   : > { %p3493_p8 = pneg %p3492_p7 }
 0x5b3   : > { %p3499_p13 = por %p3498_p12, %p3497_p11 }
 0x5b5   : > { %p3500_p0 = pnand %p3499_p13, %p3493_p8 }
 0x5b7   : > { %3503 = shalt.err (!%p3500_p0)
}
 0x5b8   : > { %s3563_s10 = smov 256  }
 0x5b9   : > { %3235 = dma.vmem_to_hbm [thread:$0]  (%p3647_p5), %s6233_s23, 1024, %s6231_s26, %s6237_s9, %s3563_s10, %s3563_s10, %s3544_s19  }
 0x5ba PF: > { %p3241_p1 = scmp.ge.s32.totalorder %s3538_s30, 2  ;;  %s3103_s12 = sand.u32 1, %s3526_s27  }
 0x5bb   : > { %s3104_s13 = scalar_lea.sflag [#allocation3], %s3103_s12 }
 0x5bc   : > { %p3238_p2 = pnand %p3241_p1, %p3651_p6 }
 0x5be   : > { %3521 = dma.done.wait (!%p3238_p2), %s3104_s13, 1024  }
 0x5bf   : > { %3523 = vsyncadd (!%p3238_p2), %s3104_s13, 4294966272  ;;  %p18_p3 = scmp.ge.s32.totalorder %s3634_s11, 4   ;;  %s6718_s27 = smov %s3530_s28 }
 0x5c0   : > { %s6719_s28 = smov %s3534_s29  ;;  %s6720_s29 = smov %s3645_s14 }
 0x5c1   : > { %s6721_s30 = smov %s3634_s11  ;;  %20 = sbr.rel (!%p18_p3) target bundleno = 3 (0x3), region = 87 }
 0x5c8   :  { %3109 = vsyncpa [#allocation3], 1 }
 0x5c9   :  { %3111 = vsyncpa [#allocation3 + $0x1], 1 }

</bundles_post_ra>
